<compile_context>
chip_gen: v6e
topology: v6e:2x2x1
jax: 0.10.0
libtpu: 0.0.40
codegen_flags: <defaults>
</compile_context>

<pallas_src>
import numpy as np
import jax
import jax.numpy as jnp
from jax import lax
from jax.experimental import pallas as pl
from jax.experimental.pallas import tpu as pltpu

MODEL_DIM = 14
NUM_HEADS = 4
DIM_PER_HEAD = MODEL_DIM // NUM_HEADS          # 3
HEAD_TOTAL = NUM_HEADS * DIM_PER_HEAD          # 12
FFN_DIM = 64                                   # small ffn_dim for the example (ctor arg)
LN_EPS = 1e-5
NEG_BIG = -1e30                                # finite stand-in for -inf (no inf-inf -> NaN)

# weight-slab row offsets (sublane-aligned to multiples of 8)
_W_QKV_ROW = 0
_W_WO_ROW = 16
_W_W1_ROW = 32
_W_W2_ROW = 48
_W_ROWS = _W_W2_ROW + FFN_DIM                  # 112
_W_COLS = max(3 * HEAD_TOTAL, MODEL_DIM, FFN_DIM)  # 64


# ---------------------------------------------------------------------------
# kernel
# ---------------------------------------------------------------------------
def encoder_layer_kernel(x_ref, w_ref, v_ref, o_ref):
    x3 = x_ref[...]                                        # (Bt, S, D) f32
    Bt, S, D = x3.shape
    HT = HEAD_TOTAL
    R = Bt * S

    # ---- unpack parameter slabs (static slices, zero runtime cost) ----
    wqkv = w_ref[_W_QKV_ROW:_W_QKV_ROW + D, 0:3 * HT]      # (D, 3*HT)
    wo = w_ref[_W_WO_ROW:_W_WO_ROW + HT, 0:D]              # (HT, D)
    w1 = w_ref[_W_W1_ROW:_W_W1_ROW + D, 0:FFN_DIM]         # (D, F)
    w2 = w_ref[_W_W2_ROW:_W_W2_ROW + FFN_DIM, 0:D]         # (F, D)

    bqkv = v_ref[0:1, 0:3 * HT]                            # (1, 3*HT)
    bo = v_ref[1:2, 0:D]
    ln1_g = v_ref[2:3, 0:D]
    ln1_b = v_ref[3:4, 0:D]
    b1 = v_ref[4:5, 0:FFN_DIM]
    b2 = v_ref[5:6, 0:D]
    ln2_g = v_ref[6:7, 0:D]
    ln2_b = v_ref[7:8, 0:D]

    x = x3.reshape(R, D)                                   # flattened rows for dense ops

    # ---- padding mask: key k is padding iff all D features are exactly 0 (lane reduce) ----
    zero_cnt = jnp.sum((x3 == 0.0).astype(jnp.float32), axis=-1)   # (Bt, S)
    key_masked = (zero_cnt == float(D))[:, None, :]                # (Bt, 1, S) bool

    # ---- fused Q/K/V projection on the flattened row matrix ----
    qkv = jnp.dot(x, wqkv, preferred_element_type=jnp.float32) + bqkv   # (R, 3*HT)
    q = qkv[:, 0:HT].reshape(Bt, S, HT)
    k = qkv[:, HT:2 * HT].reshape(Bt, S, HT)
    v = qkv[:, 2 * HT:3 * HT].reshape(Bt, S, HT)

    # ---- multi-head attention via head-column masks (no lane slices / concat) ----
    col = lax.broadcasted_iota(jnp.int32, (1, 1, HT), 2)
    scale = 1.0 / float(np.sqrt(DIM_PER_HEAD))
    context = jnp.zeros((Bt, S, HT), jnp.float32)
    for h in range(NUM_HEADS):
        lo, hi = h * DIM_PER_HEAD, (h + 1) * DIM_PER_HEAD
        hm = ((col >= lo) & (col < hi)).astype(jnp.float32)        # (1, 1, HT)
        s = jnp.einsum('bqd,bkd->bqk', q * hm, k,
                       preferred_element_type=jnp.float32) * scale  # (Bt, S, S)
        s = jnp.where(key_masked, NEG_BIG, s)
        s = s - jnp.max(s, axis=-1, keepdims=True)
        e = jnp.exp(s)
        p = e * pl.reciprocal(jnp.sum(e, axis=-1, keepdims=True), approx=True)
        context = context + jnp.einsum('bqk,bkd->bqd', p, v * hm,
                                       preferred_element_type=jnp.float32)
    context = context.reshape(R, HT)

    # ---- MHA output projection + residual + LayerNorm ----
    y = x + jnp.dot(context, wo, preferred_element_type=jnp.float32) + bo
    mu = jnp.mean(y, axis=-1, keepdims=True)
    var = jnp.mean((y - mu) ** 2, axis=-1, keepdims=True)
    y = (y - mu) * lax.rsqrt(var + LN_EPS) * ln1_g + ln1_b

    # ---- positional-wise feed forward (two 1x1 convs) + residual + LayerNorm ----
    h1 = jnp.maximum(jnp.dot(y, w1, preferred_element_type=jnp.float32) + b1, 0.0)
    z = y + jnp.dot(h1, w2, preferred_element_type=jnp.float32) + b2
    mu2 = jnp.mean(z, axis=-1, keepdims=True)
    var2 = jnp.mean((z - mu2) ** 2, axis=-1, keepdims=True)
    z = (z - mu2) * lax.rsqrt(var2 + LN_EPS) * ln2_g + ln2_b

    o_ref[...] = z.reshape(Bt, S, D)


# ---------------------------------------------------------------------------
# wrapper
# ---------------------------------------------------------------------------
def _pack_params(params):
    """Pack the 16 small parameter arrays into 2 padded slabs (2 DMAs instead of 16)."""
    D, HT, F = MODEL_DIM, HEAD_TOTAL, FFN_DIM
    wqkv = jnp.concatenate([params["wq"], params["wk"], params["wv"]], axis=1)  # (D, 3*HT)
    W = jnp.zeros((_W_ROWS, _W_COLS), jnp.float32)
    W = W.at[_W_QKV_ROW:_W_QKV_ROW + D, 0:3 * HT].set(wqkv)
    W = W.at[_W_WO_ROW:_W_WO_ROW + HT, 0:D].set(params["wo"])
    W = W.at[_W_W1_ROW:_W_W1_ROW + D, 0:F].set(params["w1"])
    W = W.at[_W_W2_ROW:_W_W2_ROW + F, 0:D].set(params["w2"])

    bqkv = jnp.concatenate([params["bq"], params["bk"], params["bv"]], axis=1)  # (1, 3*HT)
    V = jnp.zeros((8, _W_COLS), jnp.float32)
    V = V.at[0, 0:3 * HT].set(bqkv[0])
    V = V.at[1, 0:D].set(params["bo"][0])
    V = V.at[2, 0:D].set(params["ln1_g"][0])
    V = V.at[3, 0:D].set(params["ln1_b"][0])
    V = V.at[4, 0:F].set(params["b1"][0])
    V = V.at[5, 0:D].set(params["b2"][0])
    V = V.at[6, 0:D].set(params["ln2_g"][0])
    V = V.at[7, 0:D].set(params["ln2_b"][0])
    return W, V


def _pick_block_b(B, max_bt=128):
    """Largest divisor of B not exceeding max_bt (many sequences per grid step)."""
    for cand in range(min(B, max_bt), 0, -1):
        if B % cand == 0:
            return cand
    return 1


def encoder_layer(x, params):
    B, S, D = x.shape
    assert D == MODEL_DIM
    W, V = _pack_params(params)
    block_b = _pick_block_b(B)
    grid = (B // block_b,)
    # NOTE: for very large block_b on v7x (64 MiB VMEM) raise vmem_limit_bytes explicitly.

    return pl.pallas_call(
        encoder_layer_kernel,
        out_shape=jax.ShapeDtypeStruct((B, S, D), jnp.float32),
        grid_spec=pltpu.PrefetchScalarGridSpec(
            num_scalar_prefetch=0,
            grid=grid,
            in_specs=[
                pl.BlockSpec((block_b, S, D), lambda b: (b, 0, 0)),
                pl.BlockSpec(W.shape, lambda b: (0, 0)),
                pl.BlockSpec(V.shape, lambda b: (0, 0)),
            ],
            out_specs=pl.BlockSpec((block_b, S, D), lambda b: (b, 0, 0)),
        ),
        compiler_params=pltpu.CompilerParams(dimension_semantics=("parallel",)),
    )(x, W, V)


# ---------------------------------------------------------------------------
# pure-JAX reference (faithful to the PyTorch module)
# ---------------------------------------------------------------------------
def encoder_layer_ref(x, params):
    B, S, D = x.shape
    mask_k = jnp.all(x == 0.0, axis=-1)[:, None, :]        # (B, 1, S)

    q = jnp.dot(x, params["wq"]) + params["bq"]            # (B, S, HT)
    k = jnp.dot(x, params["wk"]) + params["bk"]
    v = jnp.dot(x, params["wv"]) + params["bv"]

    scale = 1.0 / np.sqrt(DIM_PER_HEAD)
    ctx = []
    for h in range(NUM_HEADS):
        lo, hi = h * DIM_PER_HEAD, (h + 1) * DIM_PER_HEAD
        s = jnp.einsum('bqd,bkd->bqk', q[..., lo:hi], k[..., lo:hi]) * scale
        s = jnp.where(mask_k, -jnp.inf, s)
        a = jax.nn.softmax(s, axis=-1)
        ctx.append(jnp.einsum('bqk,bkd->bqd', a, v[..., lo:hi]))
    context = jnp.concatenate(ctx, axis=-1)

    y = x + jnp.dot(context, params["wo"]) + params["bo"]
    mu = jnp.mean(y, axis=-1, keepdims=True)
    var = jnp.mean((y - mu) ** 2, axis=-1, keepdims=True)
    y = (y - mu) * lax.rsqrt(var + LN_EPS) * params["ln1_g"] + params["ln1_b"]

    h1 = jnp.maximum(jnp.dot(y, params["w1"]) + params["b1"], 0.0)
    z = y + jnp.dot(h1, params["w2"]) + params["b2"]
    mu2 = jnp.mean(z, axis=-1, keepdims=True)
    var2 = jnp.mean((z - mu2) ** 2, axis=-1, keepdims=True)
    return (z - mu2) * lax.rsqrt(var2 + LN_EPS) * params["ln2_g"] + params["ln2_b"]


# ---------------------------------------------------------------------------
# params / main
# ---------------------------------------------------------------------------
def init_params(key):
    ks = jax.random.split(key, 12)

    def w(k, shape, scale=0.1):
        return scale * jax.random.normal(k, shape, jnp.float32)

    return {
        "wq": w(ks[0], (MODEL_DIM, HEAD_TOTAL)),
        "bq": w(ks[1], (1, HEAD_TOTAL), 0.02),
        "wk": w(ks[2], (MODEL_DIM, HEAD_TOTAL)),
        "bk": w(ks[3], (1, HEAD_TOTAL), 0.02),
        "wv": w(ks[4], (MODEL_DIM, HEAD_TOTAL)),
        "bv": w(ks[5], (1, HEAD_TOTAL), 0.02),
        "wo": w(ks[6], (HEAD_TOTAL, MODEL_DIM)),
        "bo": w(ks[7], (1, MODEL_DIM), 0.02),
        "ln1_g": jnp.ones((1, MODEL_DIM), jnp.float32),
        "ln1_b": jnp.zeros((1, MODEL_DIM), jnp.float32),
        "w1": w(ks[8], (MODEL_DIM, FFN_DIM)),
        "b1": w(ks[9], (1, FFN_DIM), 0.02),
        "w2": w(ks[10], (FFN_DIM, MODEL_DIM)),
        "b2": w(ks[11], (1, MODEL_DIM), 0.02),
        "ln2_g": jnp.ones((1, MODEL_DIM), jnp.float32),
        "ln2_b": jnp.zeros((1, MODEL_DIM), jnp.float32),
    }


if __name__ == "__main__":
    key = jax.random.PRNGKey(0)
    pkey, xkey = jax.random.split(key)
    params = init_params(pkey)

    B, S = 2, 8
    x = jax.random.normal(xkey, (B, S, MODEL_DIM), jnp.float32)
    # Zero one sequence position so the padding-mask path (masked_fill) is exercised.
    x = x.at[1, 5, :].set(0.0)

    out = jax.block_until_ready(encoder_layer(x, params))
    ref = encoder_layer_ref(x, params)

    assert out.shape == (B, S, MODEL_DIM)
    assert np.isfinite(np.asarray(out)).all()
    # tolerance covers the EUP approximate-reciprocal softmax denominator in the kernel
    assert np.allclose(np.asarray(out), np.asarray(ref), rtol=2e-3, atol=2e-3), "kernel/ref mismatch"
    print("KERNEL_OK")
</pallas_src>

<mosaic_0001>
module attributes {stable_mosaic.version = 11 : i64} {
  func.func @encoder_layer_kernel(%arg0: i32, %arg1: memref<2x8x14xf32, #tpu.memory_space<vmem>>, %arg2: memref<112x64xf32, #tpu.memory_space<vmem>>, %arg3: memref<8x64xf32, #tpu.memory_space<vmem>>, %arg4: memref<2x8x14xf32, #tpu.memory_space<vmem>>) attributes {dimension_semantics = [#tpu.dimension_semantics<parallel>], iteration_bounds = array<i64: 1>, scalar_prefetch = 0 : i64, scratch_operands = 0 : i64, tpu.core_type = #tpu.core_type<tc>, window_params = [{transform_indices = @transform_0, window_bounds = array<i64: 2, 8, 14>}, {pipeline_mode = #tpu.pipeline_mode<synchronous>, transform_indices = @transform_1, window_bounds = array<i64: 112, 64>}, {pipeline_mode = #tpu.pipeline_mode<synchronous>, transform_indices = @transform_2, window_bounds = array<i64: 8, 64>}, {transform_indices = @transform_3, window_bounds = array<i64: 2, 8, 14>}]} {
    %c0 = arith.constant 0 : index
    %c0_0 = arith.constant 0 : index
    %c0_1 = arith.constant 0 : index
    %0 = vector.load %arg1[%c0, %c0_0, %c0_1] : memref<2x8x14xf32, #tpu.memory_space<vmem>>, vector<2x8x14xf32>
    %c0_2 = arith.constant 0 : index
    %c0_3 = arith.constant 0 : index
    %1 = vector.load %arg2[%c0_2, %c0_3] : memref<112x64xf32, #tpu.memory_space<vmem>>, vector<14x36xf32>
    %c16 = arith.constant 16 : index
    %c0_4 = arith.constant 0 : index
    %2 = vector.load %arg2[%c16, %c0_4] : memref<112x64xf32, #tpu.memory_space<vmem>>, vector<12x14xf32>
    %c32 = arith.constant 32 : index
    %c0_5 = arith.constant 0 : index
    %3 = vector.load %arg2[%c32, %c0_5] : memref<112x64xf32, #tpu.memory_space<vmem>>, vector<14x64xf32>
    %c48 = arith.constant 48 : index
    %c0_6 = arith.constant 0 : index
    %4 = vector.load %arg2[%c48, %c0_6] : memref<112x64xf32, #tpu.memory_space<vmem>>, vector<64x14xf32>
    %c0_7 = arith.constant 0 : index
    %c0_8 = arith.constant 0 : index
    %5 = vector.load %arg3[%c0_7, %c0_8] : memref<8x64xf32, #tpu.memory_space<vmem>>, vector<1x36xf32>
    %c1 = arith.constant 1 : index
    %c0_9 = arith.constant 0 : index
    %6 = vector.load %arg3[%c1, %c0_9] : memref<8x64xf32, #tpu.memory_space<vmem>>, vector<1x14xf32>
    %c2 = arith.constant 2 : index
    %c0_10 = arith.constant 0 : index
    %7 = vector.load %arg3[%c2, %c0_10] : memref<8x64xf32, #tpu.memory_space<vmem>>, vector<1x14xf32>
    %c3 = arith.constant 3 : index
    %c0_11 = arith.constant 0 : index
    %8 = vector.load %arg3[%c3, %c0_11] : memref<8x64xf32, #tpu.memory_space<vmem>>, vector<1x14xf32>
    %c4 = arith.constant 4 : index
    %c0_12 = arith.constant 0 : index
    %9 = vector.load %arg3[%c4, %c0_12] : memref<8x64xf32, #tpu.memory_space<vmem>>, vector<1x64xf32>
    %c5 = arith.constant 5 : index
    %c0_13 = arith.constant 0 : index
    %10 = vector.load %arg3[%c5, %c0_13] : memref<8x64xf32, #tpu.memory_space<vmem>>, vector<1x14xf32>
    %c6 = arith.constant 6 : index
    %c0_14 = arith.constant 0 : index
    %11 = vector.load %arg3[%c6, %c0_14] : memref<8x64xf32, #tpu.memory_space<vmem>>, vector<1x14xf32>
    %c7 = arith.constant 7 : index
    %c0_15 = arith.constant 0 : index
    %12 = vector.load %arg3[%c7, %c0_15] : memref<8x64xf32, #tpu.memory_space<vmem>>, vector<1x14xf32>
    %13 = vector.shape_cast %0 : vector<2x8x14xf32> to vector<16x14xf32>
    %cst = arith.constant 0.000000e+00 : f32
    %14 = vector.broadcast %cst : f32 to vector<2x8x14xf32>
    %15 = arith.cmpf oeq, %0, %14 : vector<2x8x14xf32>
    %16 = arith.extui %15 : vector<2x8x14xi1> to vector<2x8x14xi32>
    %17 = arith.sitofp %16 : vector<2x8x14xi32> to vector<2x8x14xf32>
    %cst_16 = arith.constant dense<0.000000e+00> : vector<2x8xf32>
    %18 = vector.multi_reduction <add>, %17, %cst_16 [2] : vector<2x8x14xf32> to vector<2x8xf32>
    %cst_17 = arith.constant 1.400000e+01 : f32
    %19 = vector.broadcast %cst_17 : f32 to vector<2x8xf32>
    %20 = arith.cmpf oeq, %18, %19 : vector<2x8xf32>
    %21 = vector.shape_cast %20 : vector<2x8xi1> to vector<2x1x8xi1>
    %cst_18 = arith.constant dense<0.000000e+00> : vector<16x36xf32>
    %22 = tpu.matmul %13, %1, %cst_18 {dimension_numbers = #tpu.dot_dimension_numbers<[1], [0], [0], [1], [0, 0, 1, 1], [], []>} : vector<16x14xf32>, vector<14x36xf32>, vector<16x36xf32> -> vector<16x36xf32>
    %23 = vector.broadcast %5 : vector<1x36xf32> to vector<16x36xf32>
    %24 = arith.addf %22, %23 : vector<16x36xf32>
    %25 = vector.extract_strided_slice %24 {offsets = [0, 0], sizes = [16, 12], strides = [1, 1]} : vector<16x36xf32> to vector<16x12xf32>
    %26 = vector.shape_cast %25 : vector<16x12xf32> to vector<2x8x12xf32>
    %27 = vector.extract_strided_slice %24 {offsets = [0, 12], sizes = [16, 12], strides = [1, 1]} : vector<16x36xf32> to vector<16x12xf32>
    %28 = vector.shape_cast %27 : vector<16x12xf32> to vector<2x8x12xf32>
    %29 = vector.extract_strided_slice %24 {offsets = [0, 24], sizes = [16, 12], strides = [1, 1]} : vector<16x36xf32> to vector<16x12xf32>
    %30 = vector.shape_cast %29 : vector<16x12xf32> to vector<2x8x12xf32>
    %31 = tpu.iota {dimensions = array<i32: 2>} : vector<1x1x12xi32>
    %cst_19 = arith.constant 0.000000e+00 : f32
    %32 = vector.broadcast %cst_19 : f32 to vector<2x8x12xf32>
    %c0_i32 = arith.constant 0 : i32
    %33 = vector.broadcast %c0_i32 : i32 to vector<1x1x12xi32>
    %34 = arith.cmpi sge, %31, %33 : vector<1x1x12xi32>
    %c3_i32 = arith.constant 3 : i32
    %35 = vector.broadcast %c3_i32 : i32 to vector<1x1x12xi32>
    %36 = arith.cmpi slt, %31, %35 : vector<1x1x12xi32>
    %37 = arith.andi %34, %36 : vector<1x1x12xi1>
    %38 = arith.extui %37 : vector<1x1x12xi1> to vector<1x1x12xi32>
    %39 = arith.sitofp %38 : vector<1x1x12xi32> to vector<1x1x12xf32>
    %40 = vector.broadcast %39 : vector<1x1x12xf32> to vector<2x8x12xf32>
    %41 = arith.mulf %26, %40 : vector<2x8x12xf32>
    "tpu.trace_start"() <{level = 10 : i32, message = "bqd,bkd->bqk"}> : () -> ()
    %cst_20 = arith.constant dense<0.000000e+00> : vector<2x8x8xf32>
    %42 = tpu.matmul %41, %28, %cst_20 {dimension_numbers = #tpu.dot_dimension_numbers<[2], [2], [1], [1], [0, 0, 0, 1, 1, 1], [0], [0]>} : vector<2x8x12xf32>, vector<2x8x12xf32>, vector<2x8x8xf32> -> vector<2x8x8xf32>
    "tpu.trace_stop"() : () -> ()
    %cst_21 = arith.constant 0.577350259 : f32
    %43 = vector.broadcast %cst_21 : f32 to vector<2x8x8xf32>
    %44 = arith.mulf %42, %43 : vector<2x8x8xf32>
    %cst_22 = arith.constant -1.000000e+30 : f32
    %45 = vector.shape_cast %21 : vector<2x1x8xi1> to vector<2x1x8xi1>
    %46 = vector.broadcast %45 : vector<2x1x8xi1> to vector<2x8x8xi1>
    %47 = vector.broadcast %cst_22 : f32 to vector<2x8x8xf32>
    %48 = arith.select %46, %47, %44 : vector<2x8x8xi1>, vector<2x8x8xf32>
    %cst_23 = arith.constant dense<0xFF800000> : vector<2x8xf32>
    %49 = vector.multi_reduction <maximumf>, %48, %cst_23 [2] : vector<2x8x8xf32> to vector<2x8xf32>
    %50 = vector.shape_cast %49 : vector<2x8xf32> to vector<2x8x1xf32>
    %51 = vector.broadcast %50 : vector<2x8x1xf32> to vector<2x8x8xf32>
    %52 = arith.subf %48, %51 : vector<2x8x8xf32>
    %53 = math.exp %52 : vector<2x8x8xf32>
    %cst_24 = arith.constant dense<0.000000e+00> : vector<2x8xf32>
    %54 = vector.multi_reduction <add>, %53, %cst_24 [2] : vector<2x8x8xf32> to vector<2x8xf32>
    %55 = vector.shape_cast %54 : vector<2x8xf32> to vector<2x8x1xf32>
    %56 = tpu.reciprocal %55 {approx = true} : vector<2x8x1xf32> -> vector<2x8x1xf32>
    %57 = vector.broadcast %56 : vector<2x8x1xf32> to vector<2x8x8xf32>
    %58 = arith.mulf %53, %57 : vector<2x8x8xf32>
    %59 = vector.broadcast %39 : vector<1x1x12xf32> to vector<2x8x12xf32>
    %60 = arith.mulf %30, %59 : vector<2x8x12xf32>
    "tpu.trace_start"() <{level = 10 : i32, message = "bqk,bkd->bqd"}> : () -> ()
    %cst_25 = arith.constant dense<0.000000e+00> : vector<2x8x12xf32>
    %61 = tpu.matmul %58, %60, %cst_25 {dimension_numbers = #tpu.dot_dimension_numbers<[2], [1], [1], [2], [0, 0, 0, 1, 1, 2], [0], [0]>} : vector<2x8x8xf32>, vector<2x8x12xf32>, vector<2x8x12xf32> -> vector<2x8x12xf32>
    "tpu.trace_stop"() : () -> ()
    %62 = arith.addf %32, %61 : vector<2x8x12xf32>
    %c3_i32_26 = arith.constant 3 : i32
    %63 = vector.broadcast %c3_i32_26 : i32 to vector<1x1x12xi32>
    %64 = arith.cmpi sge, %31, %63 : vector<1x1x12xi32>
    %c6_i32 = arith.constant 6 : i32
    %65 = vector.broadcast %c6_i32 : i32 to vector<1x1x12xi32>
    %66 = arith.cmpi slt, %31, %65 : vector<1x1x12xi32>
    %67 = arith.andi %64, %66 : vector<1x1x12xi1>
    %68 = arith.extui %67 : vector<1x1x12xi1> to vector<1x1x12xi32>
    %69 = arith.sitofp %68 : vector<1x1x12xi32> to vector<1x1x12xf32>
    %70 = vector.broadcast %69 : vector<1x1x12xf32> to vector<2x8x12xf32>
    %71 = arith.mulf %26, %70 : vector<2x8x12xf32>
    "tpu.trace_start"() <{level = 10 : i32, message = "bqd,bkd->bqk"}> : () -> ()
    %cst_27 = arith.constant dense<0.000000e+00> : vector<2x8x8xf32>
    %72 = tpu.matmul %71, %28, %cst_27 {dimension_numbers = #tpu.dot_dimension_numbers<[2], [2], [1], [1], [0, 0, 0, 1, 1, 1], [0], [0]>} : vector<2x8x12xf32>, vector<2x8x12xf32>, vector<2x8x8xf32> -> vector<2x8x8xf32>
    "tpu.trace_stop"() : () -> ()
    %cst_28 = arith.constant 0.577350259 : f32
    %73 = vector.broadcast %cst_28 : f32 to vector<2x8x8xf32>
    %74 = arith.mulf %72, %73 : vector<2x8x8xf32>
    %cst_29 = arith.constant -1.000000e+30 : f32
    %75 = vector.shape_cast %21 : vector<2x1x8xi1> to vector<2x1x8xi1>
    %76 = vector.broadcast %75 : vector<2x1x8xi1> to vector<2x8x8xi1>
    %77 = vector.broadcast %cst_29 : f32 to vector<2x8x8xf32>
    %78 = arith.select %76, %77, %74 : vector<2x8x8xi1>, vector<2x8x8xf32>
    %cst_30 = arith.constant dense<0xFF800000> : vector<2x8xf32>
    %79 = vector.multi_reduction <maximumf>, %78, %cst_30 [2] : vector<2x8x8xf32> to vector<2x8xf32>
    %80 = vector.shape_cast %79 : vector<2x8xf32> to vector<2x8x1xf32>
    %81 = vector.broadcast %80 : vector<2x8x1xf32> to vector<2x8x8xf32>
    %82 = arith.subf %78, %81 : vector<2x8x8xf32>
    %83 = math.exp %82 : vector<2x8x8xf32>
    %cst_31 = arith.constant dense<0.000000e+00> : vector<2x8xf32>
    %84 = vector.multi_reduction <add>, %83, %cst_31 [2] : vector<2x8x8xf32> to vector<2x8xf32>
    %85 = vector.shape_cast %84 : vector<2x8xf32> to vector<2x8x1xf32>
    %86 = tpu.reciprocal %85 {approx = true} : vector<2x8x1xf32> -> vector<2x8x1xf32>
    %87 = vector.broadcast %86 : vector<2x8x1xf32> to vector<2x8x8xf32>
    %88 = arith.mulf %83, %87 : vector<2x8x8xf32>
    %89 = vector.broadcast %69 : vector<1x1x12xf32> to vector<2x8x12xf32>
    %90 = arith.mulf %30, %89 : vector<2x8x12xf32>
    "tpu.trace_start"() <{level = 10 : i32, message = "bqk,bkd->bqd"}> : () -> ()
    %cst_32 = arith.constant dense<0.000000e+00> : vector<2x8x12xf32>
    %91 = tpu.matmul %88, %90, %cst_32 {dimension_numbers = #tpu.dot_dimension_numbers<[2], [1], [1], [2], [0, 0, 0, 1, 1, 2], [0], [0]>} : vector<2x8x8xf32>, vector<2x8x12xf32>, vector<2x8x12xf32> -> vector<2x8x12xf32>
    "tpu.trace_stop"() : () -> ()
    %92 = arith.addf %62, %91 : vector<2x8x12xf32>
    %c6_i32_33 = arith.constant 6 : i32
    %93 = vector.broadcast %c6_i32_33 : i32 to vector<1x1x12xi32>
    %94 = arith.cmpi sge, %31, %93 : vector<1x1x12xi32>
    %c9_i32 = arith.constant 9 : i32
    %95 = vector.broadcast %c9_i32 : i32 to vector<1x1x12xi32>
    %96 = arith.cmpi slt, %31, %95 : vector<1x1x12xi32>
    %97 = arith.andi %94, %96 : vector<1x1x12xi1>
    %98 = arith.extui %97 : vector<1x1x12xi1> to vector<1x1x12xi32>
    %99 = arith.sitofp %98 : vector<1x1x12xi32> to vector<1x1x12xf32>
    %100 = vector.broadcast %99 : vector<1x1x12xf32> to vector<2x8x12xf32>
    %101 = arith.mulf %26, %100 : vector<2x8x12xf32>
    "tpu.trace_start"() <{level = 10 : i32, message = "bqd,bkd->bqk"}> : () -> ()
    %cst_34 = arith.constant dense<0.000000e+00> : vector<2x8x8xf32>
    %102 = tpu.matmul %101, %28, %cst_34 {dimension_numbers = #tpu.dot_dimension_numbers<[2], [2], [1], [1], [0, 0, 0, 1, 1, 1], [0], [0]>} : vector<2x8x12xf32>, vector<2x8x12xf32>, vector<2x8x8xf32> -> vector<2x8x8xf32>
    "tpu.trace_stop"() : () -> ()
    %cst_35 = arith.constant 0.577350259 : f32
    %103 = vector.broadcast %cst_35 : f32 to vector<2x8x8xf32>
    %104 = arith.mulf %102, %103 : vector<2x8x8xf32>
    %cst_36 = arith.constant -1.000000e+30 : f32
    %105 = vector.shape_cast %21 : vector<2x1x8xi1> to vector<2x1x8xi1>
    %106 = vector.broadcast %105 : vector<2x1x8xi1> to vector<2x8x8xi1>
    %107 = vector.broadcast %cst_36 : f32 to vector<2x8x8xf32>
    %108 = arith.select %106, %107, %104 : vector<2x8x8xi1>, vector<2x8x8xf32>
    %cst_37 = arith.constant dense<0xFF800000> : vector<2x8xf32>
    %109 = vector.multi_reduction <maximumf>, %108, %cst_37 [2] : vector<2x8x8xf32> to vector<2x8xf32>
    %110 = vector.shape_cast %109 : vector<2x8xf32> to vector<2x8x1xf32>
    %111 = vector.broadcast %110 : vector<2x8x1xf32> to vector<2x8x8xf32>
    %112 = arith.subf %108, %111 : vector<2x8x8xf32>
    %113 = math.exp %112 : vector<2x8x8xf32>
    %cst_38 = arith.constant dense<0.000000e+00> : vector<2x8xf32>
    %114 = vector.multi_reduction <add>, %113, %cst_38 [2] : vector<2x8x8xf32> to vector<2x8xf32>
    %115 = vector.shape_cast %114 : vector<2x8xf32> to vector<2x8x1xf32>
    %116 = tpu.reciprocal %115 {approx = true} : vector<2x8x1xf32> -> vector<2x8x1xf32>
    %117 = vector.broadcast %116 : vector<2x8x1xf32> to vector<2x8x8xf32>
    %118 = arith.mulf %113, %117 : vector<2x8x8xf32>
    %119 = vector.broadcast %99 : vector<1x1x12xf32> to vector<2x8x12xf32>
    %120 = arith.mulf %30, %119 : vector<2x8x12xf32>
    "tpu.trace_start"() <{level = 10 : i32, message = "bqk,bkd->bqd"}> : () -> ()
    %cst_39 = arith.constant dense<0.000000e+00> : vector<2x8x12xf32>
    %121 = tpu.matmul %118, %120, %cst_39 {dimension_numbers = #tpu.dot_dimension_numbers<[2], [1], [1], [2], [0, 0, 0, 1, 1, 2], [0], [0]>} : vector<2x8x8xf32>, vector<2x8x12xf32>, vector<2x8x12xf32> -> vector<2x8x12xf32>
    "tpu.trace_stop"() : () -> ()
    %122 = arith.addf %92, %121 : vector<2x8x12xf32>
    %c9_i32_40 = arith.constant 9 : i32
    %123 = vector.broadcast %c9_i32_40 : i32 to vector<1x1x12xi32>
    %124 = arith.cmpi sge, %31, %123 : vector<1x1x12xi32>
    %c12_i32 = arith.constant 12 : i32
    %125 = vector.broadcast %c12_i32 : i32 to vector<1x1x12xi32>
    %126 = arith.cmpi slt, %31, %125 : vector<1x1x12xi32>
    %127 = arith.andi %124, %126 : vector<1x1x12xi1>
    %128 = arith.extui %127 : vector<1x1x12xi1> to vector<1x1x12xi32>
    %129 = arith.sitofp %128 : vector<1x1x12xi32> to vector<1x1x12xf32>
    %130 = vector.broadcast %129 : vector<1x1x12xf32> to vector<2x8x12xf32>
    %131 = arith.mulf %26, %130 : vector<2x8x12xf32>
    "tpu.trace_start"() <{level = 10 : i32, message = "bqd,bkd->bqk"}> : () -> ()
    %cst_41 = arith.constant dense<0.000000e+00> : vector<2x8x8xf32>
    %132 = tpu.matmul %131, %28, %cst_41 {dimension_numbers = #tpu.dot_dimension_numbers<[2], [2], [1], [1], [0, 0, 0, 1, 1, 1], [0], [0]>} : vector<2x8x12xf32>, vector<2x8x12xf32>, vector<2x8x8xf32> -> vector<2x8x8xf32>
    "tpu.trace_stop"() : () -> ()
    %cst_42 = arith.constant 0.577350259 : f32
    %133 = vector.broadcast %cst_42 : f32 to vector<2x8x8xf32>
    %134 = arith.mulf %132, %133 : vector<2x8x8xf32>
    %cst_43 = arith.constant -1.000000e+30 : f32
    %135 = vector.shape_cast %21 : vector<2x1x8xi1> to vector<2x1x8xi1>
    %136 = vector.broadcast %135 : vector<2x1x8xi1> to vector<2x8x8xi1>
    %137 = vector.broadcast %cst_43 : f32 to vector<2x8x8xf32>
    %138 = arith.select %136, %137, %134 : vector<2x8x8xi1>, vector<2x8x8xf32>
    %cst_44 = arith.constant dense<0xFF800000> : vector<2x8xf32>
    %139 = vector.multi_reduction <maximumf>, %138, %cst_44 [2] : vector<2x8x8xf32> to vector<2x8xf32>
    %140 = vector.shape_cast %139 : vector<2x8xf32> to vector<2x8x1xf32>
    %141 = vector.broadcast %140 : vector<2x8x1xf32> to vector<2x8x8xf32>
    %142 = arith.subf %138, %141 : vector<2x8x8xf32>
    %143 = math.exp %142 : vector<2x8x8xf32>
    %cst_45 = arith.constant dense<0.000000e+00> : vector<2x8xf32>
    %144 = vector.multi_reduction <add>, %143, %cst_45 [2] : vector<2x8x8xf32> to vector<2x8xf32>
    %145 = vector.shape_cast %144 : vector<2x8xf32> to vector<2x8x1xf32>
    %146 = tpu.reciprocal %145 {approx = true} : vector<2x8x1xf32> -> vector<2x8x1xf32>
    %147 = vector.broadcast %146 : vector<2x8x1xf32> to vector<2x8x8xf32>
    %148 = arith.mulf %143, %147 : vector<2x8x8xf32>
    %149 = vector.broadcast %129 : vector<1x1x12xf32> to vector<2x8x12xf32>
    %150 = arith.mulf %30, %149 : vector<2x8x12xf32>
    "tpu.trace_start"() <{level = 10 : i32, message = "bqk,bkd->bqd"}> : () -> ()
    %cst_46 = arith.constant dense<0.000000e+00> : vector<2x8x12xf32>
    %151 = tpu.matmul %148, %150, %cst_46 {dimension_numbers = #tpu.dot_dimension_numbers<[2], [1], [1], [2], [0, 0, 0, 1, 1, 2], [0], [0]>} : vector<2x8x8xf32>, vector<2x8x12xf32>, vector<2x8x12xf32> -> vector<2x8x12xf32>
    "tpu.trace_stop"() : () -> ()
    %152 = arith.addf %122, %151 : vector<2x8x12xf32>
    %153 = vector.shape_cast %152 : vector<2x8x12xf32> to vector<16x12xf32>
    %cst_47 = arith.constant dense<0.000000e+00> : vector<16x14xf32>
    %154 = tpu.matmul %153, %2, %cst_47 {dimension_numbers = #tpu.dot_dimension_numbers<[1], [0], [0], [1], [0, 0, 1, 1], [], []>} : vector<16x12xf32>, vector<12x14xf32>, vector<16x14xf32> -> vector<16x14xf32>
    %155 = arith.addf %13, %154 : vector<16x14xf32>
    %156 = vector.broadcast %6 : vector<1x14xf32> to vector<16x14xf32>
    %157 = arith.addf %155, %156 : vector<16x14xf32>
    %cst_48 = arith.constant dense<0.000000e+00> : vector<16xf32>
    %158 = vector.multi_reduction <add>, %157, %cst_48 [1] : vector<16x14xf32> to vector<16xf32>
    %159 = vector.shape_cast %158 : vector<16xf32> to vector<16x1xf32>
    %cst_49 = arith.constant 1.400000e+01 : f32
    %160 = vector.broadcast %cst_49 : f32 to vector<16x1xf32>
    %161 = arith.divf %159, %160 : vector<16x1xf32>
    %162 = vector.broadcast %161 : vector<16x1xf32> to vector<16x14xf32>
    %163 = arith.subf %157, %162 : vector<16x14xf32>
    %164 = arith.mulf %163, %163 : vector<16x14xf32>
    %cst_50 = arith.constant dense<0.000000e+00> : vector<16xf32>
    %165 = vector.multi_reduction <add>, %164, %cst_50 [1] : vector<16x14xf32> to vector<16xf32>
    %166 = vector.shape_cast %165 : vector<16xf32> to vector<16x1xf32>
    %cst_51 = arith.constant 1.400000e+01 : f32
    %167 = vector.broadcast %cst_51 : f32 to vector<16x1xf32>
    %168 = arith.divf %166, %167 : vector<16x1xf32>
    %169 = vector.broadcast %161 : vector<16x1xf32> to vector<16x14xf32>
    %170 = arith.subf %157, %169 : vector<16x14xf32>
    %cst_52 = arith.constant 9.99999974E-6 : f32
    %171 = vector.broadcast %cst_52 : f32 to vector<16x1xf32>
    %172 = arith.addf %168, %171 : vector<16x1xf32>
    %173 = math.rsqrt %172 : vector<16x1xf32>
    %174 = vector.broadcast %173 : vector<16x1xf32> to vector<16x14xf32>
    %175 = arith.mulf %170, %174 : vector<16x14xf32>
    %176 = vector.broadcast %7 : vector<1x14xf32> to vector<16x14xf32>
    %177 = arith.mulf %175, %176 : vector<16x14xf32>
    %178 = vector.broadcast %8 : vector<1x14xf32> to vector<16x14xf32>
    %179 = arith.addf %177, %178 : vector<16x14xf32>
    %cst_53 = arith.constant dense<0.000000e+00> : vector<16x64xf32>
    %180 = tpu.matmul %179, %3, %cst_53 {dimension_numbers = #tpu.dot_dimension_numbers<[1], [0], [0], [1], [0, 0, 1, 1], [], []>} : vector<16x14xf32>, vector<14x64xf32>, vector<16x64xf32> -> vector<16x64xf32>
    %181 = vector.broadcast %9 : vector<1x64xf32> to vector<16x64xf32>
    %182 = arith.addf %180, %181 : vector<16x64xf32>
    %cst_54 = arith.constant 0.000000e+00 : f32
    %183 = vector.broadcast %cst_54 : f32 to vector<16x64xf32>
    %184 = arith.maximumf %182, %183 : vector<16x64xf32>
    %cst_55 = arith.constant dense<0.000000e+00> : vector<16x14xf32>
    %185 = tpu.matmul %184, %4, %cst_55 {dimension_numbers = #tpu.dot_dimension_numbers<[1], [0], [0], [1], [0, 0, 1, 1], [], []>} : vector<16x64xf32>, vector<64x14xf32>, vector<16x14xf32> -> vector<16x14xf32>
    %186 = arith.addf %179, %185 : vector<16x14xf32>
    %187 = vector.broadcast %10 : vector<1x14xf32> to vector<16x14xf32>
    %188 = arith.addf %186, %187 : vector<16x14xf32>
    %cst_56 = arith.constant dense<0.000000e+00> : vector<16xf32>
    %189 = vector.multi_reduction <add>, %188, %cst_56 [1] : vector<16x14xf32> to vector<16xf32>
    %190 = vector.shape_cast %189 : vector<16xf32> to vector<16x1xf32>
    %cst_57 = arith.constant 1.400000e+01 : f32
    %191 = vector.broadcast %cst_57 : f32 to vector<16x1xf32>
    %192 = arith.divf %190, %191 : vector<16x1xf32>
    %193 = vector.broadcast %192 : vector<16x1xf32> to vector<16x14xf32>
    %194 = arith.subf %188, %193 : vector<16x14xf32>
    %195 = arith.mulf %194, %194 : vector<16x14xf32>
    %cst_58 = arith.constant dense<0.000000e+00> : vector<16xf32>
    %196 = vector.multi_reduction <add>, %195, %cst_58 [1] : vector<16x14xf32> to vector<16xf32>
    %197 = vector.shape_cast %196 : vector<16xf32> to vector<16x1xf32>
    %cst_59 = arith.constant 1.400000e+01 : f32
    %198 = vector.broadcast %cst_59 : f32 to vector<16x1xf32>
    %199 = arith.divf %197, %198 : vector<16x1xf32>
    %200 = vector.broadcast %192 : vector<16x1xf32> to vector<16x14xf32>
    %201 = arith.subf %188, %200 : vector<16x14xf32>
    %cst_60 = arith.constant 9.99999974E-6 : f32
    %202 = vector.broadcast %cst_60 : f32 to vector<16x1xf32>
    %203 = arith.addf %199, %202 : vector<16x1xf32>
    %204 = math.rsqrt %203 : vector<16x1xf32>
    %205 = vector.broadcast %204 : vector<16x1xf32> to vector<16x14xf32>
    %206 = arith.mulf %201, %205 : vector<16x14xf32>
    %207 = vector.broadcast %11 : vector<1x14xf32> to vector<16x14xf32>
    %208 = arith.mulf %206, %207 : vector<16x14xf32>
    %209 = vector.broadcast %12 : vector<1x14xf32> to vector<16x14xf32>
    %210 = arith.addf %208, %209 : vector<16x14xf32>
    %211 = vector.shape_cast %210 : vector<16x14xf32> to vector<2x8x14xf32>
    %c0_61 = arith.constant 0 : index
    %c0_62 = arith.constant 0 : index
    %c0_63 = arith.constant 0 : index
    %212 = vector.load %arg4[%c0_61, %c0_62, %c0_63] : memref<2x8x14xf32, #tpu.memory_space<vmem>>, vector<2x8x14xf32>
    tpu.vector_store %arg4[%c0_61, %c0_62, %c0_63], %211 {strides = array<i32>} : memref<2x8x14xf32, #tpu.memory_space<vmem>>, vector<2x8x14xf32>,
    return
  }
  func.func @transform_0(%arg0: i32) -> (i32, i32, i32) {
    %c0_i32 = arith.constant 0 : i32
    %c0_i32_0 = arith.constant 0 : i32
    %c0_i32_1 = arith.constant 0 : i32
    return %arg0, %c0_i32, %c0_i32_0 : i32, i32, i32
  }
  func.func @transform_1(%arg0: i32) -> (i32, i32) {
    %c0_i32 = arith.constant 0 : i32
    %c0_i32_0 = arith.constant 0 : i32
    %c0_i32_1 = arith.constant 0 : i32
    return %c0_i32, %c0_i32_0 : i32, i32
  }
  func.func @transform_2(%arg0: i32) -> (i32, i32) {
    %c0_i32 = arith.constant 0 : i32
    %c0_i32_0 = arith.constant 0 : i32
    %c0_i32_1 = arith.constant 0 : i32
    return %c0_i32, %c0_i32_0 : i32, i32
  }
  func.func @transform_3(%arg0: i32) -> (i32, i32, i32) {
    %c0_i32 = arith.constant 0 : i32
    %c0_i32_0 = arith.constant 0 : i32
    %c0_i32_1 = arith.constant 0 : i32
    return %arg0, %c0_i32, %c0_i32_0 : i32, i32, i32
  }
}

</mosaic_0001>

<bundles_post_ra>
// kernel: tpu_custom_call.1
= control target key start
LH: loop header
LB: loop body
LE: loop exit
PB: predicated region body
PF: predicated region fallthrough
CT: control target
= control target key end

     0   :  { %vm7151_vm0 = vcmask 1045504   ;;  %vm45_vm1 = vcmask 113664   ;;  %s7121_s0 = inlined_call_operand.vmem [shape: f32[2,8,14], index: 0, kind: input, shape index: {}]   ;;  %s7122_s1 = inlined_call_operand.vmem [shape: f32[112,64], index: 1, kind: input, shape index: {}]   ;;  %s7123_s2 = inlined_call_operand.vmem [shape: f32[8,64], index: 2, kind: input, shape index: {}]   ;;  %s7124_s3 = inlined_call_operand.hbm [shape: f32[2,8,14], index: 3, kind: output, shape index: {}]  }
   0x1   :  { %v18_v0 = vld [vmem:[%s7122_s1 + $0x8] sm:$0x3f]  ;;  %v17_v1 = vld [vmem:[%s7122_s1] sm:$0xff] }
   0x2   :  { %v15_v2 = vld [vmem:[%s7121_s0] sm:$0xff]  ;;  %5167 = vmatprep.subr.msk.mxu0 %vm7151_vm0, %v18_v0 }
   0x3   :  { %5171 = vmatprep.mubr.msk.f32.mxu0 %vm45_vm1, %v15_v2 }
   0x4   :  { %8 = vsyncpa [#allocation3], 0  ;;  %5168 = vmatpush3.msk.msra.mxu0 %vm7151_vm0, %v18_v0  ;;  %v16_v3 = vld [vmem:[%s7121_s0 + $0x8] sm:$0xff]  ;;  %v7125_v4 = vmov 0.0   ;;  %vm5480_vm2 = vmmov 0   ;;  %vm39_vm3 = vcmp.eq.f32.partialorder %v15_v2, 0.0  ;;  %v143_v14 = vlaneseq }
   0x5   :  { %5169 = vmatprep.subr.mxu0 %v17_v1  ;;  %5184 = vmatprep.subr.mxu1 %v7125_v4  ;;  %v5066_v6 = vld [vmem:[%s7123_s2] ss:$0 sm:$0xff]  ;;  %v5064_v9 = vsel %vm39_vm3, 1.0, %v7125_v4  ;;  %vm40_vm4 = vcmp.eq.f32.partialorder %v16_v3, 0.0  ;;  %s5481_s22 = smov 116   ;;  %vm155_vm7 = vcmask 97280  }
   0x6   :  { %5170 = vmatpush3.msra.mxu0 %v17_v1  ;;  %5186 = vmatprep.mubr.msk.f32.mxu1 %vm5480_vm2, %v7125_v4  ;;  %v46_v10 = vsel %vm45_vm1, %v5064_v9, 0.0  ;;  %v5065_v11 = vsel %vm40_vm4, 1.0, %v7125_v4  ;;  %v5543_v15 = vand.u32 127, %v143_v14  ;;  %v5482_v24 = vmov 0   ;;  %s5483_s23 = smov 24   ;;  %s5484_s24 = smov 104  }
   0x7   :  { %5172 = vmatmul.mubr.msk.f32.vlgmr.msra.gmra.mxu0 %vm45_vm1, %v16_v3  ;;  %5174 = vmatprep.subr.mxu0 %v7125_v4  ;;  %v49_v13 = vsel %vm45_vm1, %v5065_v11, 0.0  ;;  %v5590_v25 = vshrl.u32 %v143_v14, 7  ;;  %vm589_vm12 = vcmask 1041409   ;;  %vm591_vm13 = vcmask 1042434   ;;  %s5485_s10 = smov [#allocation2]  }
   0x8   :  { %5176 = vmatprep.mubr.msk.f32.mxu0 %vm5480_vm2, %v7125_v4  ;;  %47 = vadd.xlane.f32.xlu1 %v46_v10  ;;  %7154 = vst [vmem:[#allocation7_spill] sm:$0xff] %v5543_v15  ;;  %vm1005_vm5 = vcmp.ge.s32.totalorder %v5543_v15, 3  ;;  %vm1006_vm6 = vcmp.lt.s32.totalorder %v5543_v15, 6  ;;  %vm146_vm8 = vcmp.lt.s32.totalorder %v5543_v15, 3  ;;  %vm593_vm14 = vcmask 1043459   ;;  %s5053_s11 = sshll.u32 %s5485_s10, 4  ;;  %s5054_s11 = int_to_ptr.vmem [resolvable:$true] %s5053_s11 }
   0x9   :  { %vm1007_vm9 = vmand %vm1005_vm5, %vm1006_vm6  ;;  %v5555_v17 = vsel %vm146_vm8, 1.0, %v7125_v4  ;;  %5297 = vset.pattern.permute.xlu0 %v5482_v24  ;;  %5296 = vset.pattern.permute.xlu1 %v5482_v24  ;;  %v5593_v26 = vsub.s32 0, %v5590_v25  ;;  %v5596_v27 = vsub.s32 1, %v5590_v25  ;;  %v5599_v33 = vsub.s32 2, %v5590_v25  ;;  %s5457_s12 = scalar_lea.vmem %s5054_s11, 256  ;;  %p5462_p1 = scmp.lt.s32.totalorder %s5054_s11, %s5054_s11 }
   0xa   :  { %7156 = vst [vmem:[#allocation9_spill] sm:$0xff] %v5555_v17  ;;  %v5558_v18 = vsel %vm1007_vm9, 1.0, %v7125_v4  ;;  %v5604_v39 = vsub.s32 3, %v5590_v25  ;;  %v5607_v40 = vsub.s32 6, %v5590_v25  ;;  %v5612_v45 = vsub.s32 4, %v5590_v25  ;;  %p5458_p0 = scmp.ne.s32.totalorder %s5054_s11, %s5457_s12  ;;  %p5463_p2 = scmp.lt.s32.totalorder %s5457_s12, %s5457_s12 }
   0xb   :  { %7157 = vst [vmem:[#allocation10_spill] sm:$0xff] %v5558_v18  ;;  %v5617_v48 = vsub.s32 7, %v5590_v25  ;;  %v5622_v51 = vsub.s32 5, %v5590_v25  ;;  %vm595_vm15 = vcmask 1044484   ;;  %vm597_vm3 = vcmask 1045509  }
   0xc   :  { %50 = vadd.xlane.f32.xlu1 %v49_v13  ;;  %vm599_vm4 = vcmask 1046534   ;;  %vm601_vm5 = vcmask 1047559   ;;  %vm612_vm6 = vcmask 64512   ;;  %p5464_p3 = por %p5463_p2, %p5462_p1 }
   0xe   :  { %p5465_p4 = pnand %p5464_p3, %p5458_p0 }
  0xc7   :  { %v5173_v5 = vpop.f32.mrf.mxu0 }
  0xc8   :  { %v5539_v12 = vadd.f32 %v5173_v5, %v5066_v6 }
  0xc9   :  { %v134_v7 = vpop.f32.mrf.mxu0 }
  0xca   :  { %v5533_v8 = vadd.f32 %v5066_v6, %v134_v7  ;;  %7153 = vst [vmem:[#allocation6_spill] sm:$0xff] %v5539_v12  ;;  %v151_v22 = vmul.f32 %v5555_v17, %v5539_v12  ;;  %v1011_v23 = vmul.f32 %v5558_v18, %v5539_v12 }
  0xcc   :  { %7152 = vst [vmem:[#allocation5_spill] sm:$0xff] %v5533_v8  ;;  %153 = vrot.lane.b32.xlu0 %v5533_v8, %s5481_s22  ;;  %v150_v19 = vmul.f32 %v5555_v17, %v5533_v8  ;;  %v1010_v20 = vmul.f32 %v5558_v18, %v5533_v8 }
  0xd0   :  { %232 = vrot.lane.b32.xlu0 %v5539_v12, %s5481_s22 }
 0x13e   :  { %v5548_v16 = vpop.permute.xlu0 %153 }
 0x13f   :  { %7155 = vst [vmem:[#allocation8_spill] sm:$0xff] %v5548_v16  ;;  %5175 = vmatpush3.xpose.msk.msra.mxu0 %vm155_vm7, %v5548_v16  ;;  %5185 = vmatpush3.xpose.msk.msra.mxu1 %vm155_vm7, %v5548_v16 }
 0x140   :  { %5179 = vmatprep.subr.mxu0 %v7125_v4  ;;  %5194 = vmatprep.subr.mxu1 %v7125_v4 }
 0x142   :  { %v5566_v21 = vpop.permute.xlu0 %232  ;;  %5177 = vmatmul.mubr.msk.f32.vlgmr.msra.gmra.mxu0 %vm155_vm7, %v150_v19  ;;  %5187 = vmatmul.mubr.msk.f32.vlgmr.msra.gmra.mxu1 %vm155_vm7, %v1010_v20 }
 0x143   :  { %7158 = vst [vmem:[#allocation11_spill] sm:$0xff] %v5566_v21  ;;  %5180 = vmatpush3.xpose.msk.msra.mxu0 %vm155_vm7, %v5566_v21  ;;  %5181 = vmatprep.mubr.msk.f32.mxu0 %vm5480_vm2, %v7125_v4 }
 0x144   :  { %5189 = vmatprep.subr.mxu0 %v7125_v4  ;;  %5196 = vmatprep.mubr.msk.f32.mxu1 %vm5480_vm2, %v7125_v4 }
 0x146   :  { %5182 = vmatmul.mubr.msk.f32.vlgmr.msra.gmra.mxu0 %vm155_vm7, %v151_v22  ;;  %v5648_v22 = vpop.xlane.xlu1 %47 }
 0x147   :  { %5190 = vmatpush3.xpose.msk.msra.mxu0 %vm155_vm7, %v5566_v21  ;;  %5191 = vmatprep.mubr.msk.f32.mxu0 %vm5480_vm2, %v7125_v4  ;;  %7159 = vst [vmem:[#allocation12_spill] sm:$0xff] %v5648_v22  ;;  %vm52_vm10 = vcmp.eq.f32.partialorder %v5648_v22, 14.0 }
 0x148   :  { %5199 = vmatprep.subr.mxu0 %v7125_v4 }
 0x14a   :  { %5192 = vmatmul.mubr.msk.f32.vlgmr.msra.gmra.mxu0 %vm155_vm7, %v1011_v23  ;;  %v5650_v23 = vpop.xlane.xlu1 %50 }
 0x14b   :  { %5201 = vmatprep.mubr.msk.f32.mxu0 %vm5480_vm2, %v7125_v4  ;;  %7160 = vst [vmem:[#allocation13_spill] sm:$0xff] %v5650_v23  ;;  %vm53_vm11 = vcmp.eq.f32.partialorder %v5650_v23, 14.0 }
 0x202   :  { %v227_v28 = vpop.f32.mrf.mxu0  ;;  %v1081_v29 = vpop.f32.mrf.mxu1 }
 0x203   :  { %v1158_v30 = vmul.f32 0.57735026, %v1081_v29  ;;  %v309_v34 = vmul.f32 0.57735026, %v227_v28 }
 0x204   :  { %v5178_v31 = vpop.f32.mrf.mxu0  ;;  %v5188_v32 = vpop.f32.mrf.mxu1 }
 0x205   :  { %v1165_v35 = vrot.slane %v1158_v30, %v5593_v26  ;;  %v1172_v36 = vrot.slane %v1158_v30, %v5596_v27  ;;  %v1179_v41 = vrot.slane %v1158_v30, %v5599_v33  ;;  %v327_v42 = vrot.slane %v309_v34, %v5596_v27 }
 0x206   :  { %v305_v37 = vpop.f32.mrf.mxu0  ;;  %v1186_v46 = vrot.slane %v1158_v30, %v5604_v39  ;;  %v1207_v47 = vrot.slane %v1158_v30, %v5607_v40  ;;  %v1193_v49 = vrot.slane %v1158_v30, %v5612_v45  ;;  %v341_v50 = vrot.slane %v309_v34, %v5604_v39 }
 0x207   :  { %1167 = vbcast.lane.b32.xlu0 %v1165_v35, 256  ;;  %1174 = vbcast.lane.b32.xlu1 %v1172_v36, 256  ;;  %v320_v52 = vrot.slane %v309_v34, %v5593_v26  ;;  %v1214_v53 = vrot.slane %v1158_v30, %v5617_v48  ;;  %v310_v54 = vmul.f32 0.57735026, %v305_v37  ;;  %v1200_v55 = vrot.slane %v1158_v30, %v5622_v51 }
 0x208   :  { %v5183_v38 = vpop.f32.mrf.mxu0  ;;  %v348_v56 = vrot.slane %v309_v34, %v5612_v45  ;;  %v334_v57 = vrot.slane %v309_v34, %v5599_v33  ;;  %v355_v59 = vrot.slane %v309_v34, %v5622_v51  ;;  %v362_v61 = vrot.slane %v309_v34, %v5607_v40 }
 0x209   :  { %v376_v58 = vrot.slane %v310_v54, %v5593_v26  ;;  %v404_v60 = vrot.slane %v310_v54, %v5612_v45  ;;  %v411_v62 = vrot.slane %v310_v54, %v5622_v51  ;;  %v369_v0 = vrot.slane %v309_v34, %v5617_v48 }
 0x20a   :  { %v1154_v43 = vpop.f32.mrf.mxu0  ;;  %v418_v1 = vrot.slane %v310_v54, %v5607_v40  ;;  %v383_v2 = vrot.slane %v310_v54, %v5596_v27  ;;  %v390_v5 = vrot.slane %v310_v54, %v5599_v33  ;;  %v397_v7 = vrot.slane %v310_v54, %v5604_v39 }
 0x20b   :  { %1181 = vbcast.lane.b32.xlu0 %v1179_v41, 256  ;;  %329 = vbcast.lane.b32.xlu1 %v327_v42, 256  ;;  %v1159_v63 = vmul.f32 0.57735026, %v1154_v43  ;;  %v425_v20 = vrot.slane %v310_v54, %v5617_v48 }
 0x20c   :  { %v5193_v44 = vpop.f32.mrf.mxu0 }
 0x20d   :  { %v1235_v3 = vrot.slane %v1159_v63, %v5599_v33  ;;  %v1242_v6 = vrot.slane %v1159_v63, %v5604_v39  ;;  %v1249_v9 = vrot.slane %v1159_v63, %v5612_v45  ;;  %v1221_v10 = vrot.slane %v1159_v63, %v5593_v26 }
 0x20e   :  { %v1270_v11 = vrot.slane %v1159_v63, %v5617_v48  ;;  %v1228_v13 = vrot.slane %v1159_v63, %v5596_v27  ;;  %v1256_v14 = vrot.slane %v1159_v63, %v5622_v51  ;;  %v1263_v19 = vrot.slane %v1159_v63, %v5607_v40 }
 0x20f   :  { %1188 = vbcast.lane.b32.xlu0 %v1186_v46, 256  ;;  %1209 = vbcast.lane.b32.xlu1 %v1207_v47, 256 }
 0x213   :  { %1195 = vbcast.lane.b32.xlu0 %v1193_v49, 256  ;;  %343 = vbcast.lane.b32.xlu1 %v341_v50, 256 }
 0x217   :  { %322 = vbcast.lane.b32.xlu0 %v320_v52, 256  ;;  %1216 = vbcast.lane.b32.xlu1 %v1214_v53, 256 }
 0x21b   :  { %1202 = vbcast.lane.b32.xlu0 %v1200_v55, 256  ;;  %350 = vbcast.lane.b32.xlu1 %v348_v56, 256 }
 0x21f   :  { %336 = vbcast.lane.b32.xlu0 %v334_v57, 256  ;;  %378 = vbcast.lane.b32.xlu1 %v376_v58, 256 }
 0x223   :  { %357 = vbcast.lane.b32.xlu0 %v355_v59, 256  ;;  %406 = vbcast.lane.b32.xlu1 %v404_v60, 256 }
 0x227   :  { %364 = vbcast.lane.b32.xlu0 %v362_v61, 256  ;;  %413 = vbcast.lane.b32.xlu1 %v411_v62, 256 }
 0x22b   :  { %371 = vbcast.lane.b32.xlu0 %v369_v0, 256  ;;  %420 = vbcast.lane.b32.xlu1 %v418_v1, 256 }
 0x22f   :  { %385 = vbcast.lane.b32.xlu0 %v383_v2, 256  ;;  %1237 = vbcast.lane.b32.xlu1 %v1235_v3, 256 }
 0x233   :  { %392 = vbcast.lane.b32.xlu0 %v390_v5, 256  ;;  %1244 = vbcast.lane.b32.xlu1 %v1242_v6, 256 }
 0x237   :  { %399 = vbcast.lane.b32.xlu0 %v397_v7, 256  ;;  %1251 = vbcast.lane.b32.xlu1 %v1249_v9, 256 }
 0x23b   :  { %1223 = vbcast.lane.b32.xlu0 %v1221_v10, 256  ;;  %1272 = vbcast.lane.b32.xlu1 %v1270_v11, 256 }
 0x23f   :  { %1230 = vbcast.lane.b32.xlu0 %v1228_v13, 256 }
 0x243   :  { %1258 = vbcast.lane.b32.xlu0 %v1256_v14, 256 }
 0x247   :  { %1265 = vbcast.lane.b32.xlu0 %v1263_v19, 256 }
 0x24b   :  { %427 = vbcast.lane.b32.xlu0 %v425_v20, 256 }
 0x279   :  { %v1168_v24 = vpop.permute.xlu0 %1167  ;;  %v1175_v28 = vpop.permute.xlu1 %1174 }
 0x27a   :  { %v5655_v29 = vsel %vm52_vm10, -1e+30, %v1168_v24  ;;  %v5659_v30 = vsel %vm52_vm10, -1e+30, %v1175_v28 }
 0x27b   :  { %1323 = vperm.xlu1 %5296, %v5655_v29   ;;  %1326 = vperm.xlu0 %5297, %v5659_v30  }
 0x27d   :  { %v1182_v31 = vpop.permute.xlu0 %1181  ;;  %v330_v32 = vpop.permute.xlu1 %329 }
 0x27e   :  { %v5665_v34 = vsel %vm52_vm10, -1e+30, %v1182_v31  ;;  %v5669_v35 = vsel %vm52_vm10, -1e+30, %v330_v32 }
 0x27f   :  { %1329 = vperm.xlu1 %5296, %v5665_v34   ;;  %481 = vperm.xlu0 %5297, %v5669_v35  }
 0x281   :  { %v1189_v36 = vpop.permute.xlu0 %1188  ;;  %v1210_v37 = vpop.permute.xlu1 %1209 }
 0x282   :  { %v5675_v38 = vsel %vm52_vm10, -1e+30, %v1189_v36  ;;  %v5679_v41 = vsel %vm52_vm10, -1e+30, %v1210_v37 }
 0x283   :  { %1332 = vperm.xlu1 %5296, %v5675_v38   ;;  %1341 = vperm.xlu0 %5297, %v5679_v41  }
 0x285   :  { %v1196_v42 = vpop.permute.xlu0 %1195  ;;  %v344_v43 = vpop.permute.xlu1 %343 }
 0x286   :  { %v5685_v44 = vsel %vm52_vm10, -1e+30, %v1196_v42  ;;  %v5689_v46 = vsel %vm52_vm10, -1e+30, %v344_v43 }
 0x287   :  { %1335 = vperm.xlu1 %5296, %v5685_v44   ;;  %487 = vperm.xlu0 %5297, %v5689_v46  }
 0x289   :  { %v323_v47 = vpop.permute.xlu0 %322  ;;  %v1217_v49 = vpop.permute.xlu1 %1216 }
 0x28a   :  { %v5695_v50 = vsel %vm52_vm10, -1e+30, %v323_v47  ;;  %v5699_v52 = vsel %vm52_vm10, -1e+30, %v1217_v49 }
 0x28b   :  { %478 = vperm.xlu1 %5296, %v5695_v50   ;;  %1344 = vperm.xlu0 %5297, %v5699_v52  }
 0x28d   :  { %v1203_v53 = vpop.permute.xlu0 %1202  ;;  %v351_v54 = vpop.permute.xlu1 %350 }
 0x28e   :  { %v5705_v55 = vsel %vm52_vm10, -1e+30, %v1203_v53  ;;  %v5709_v56 = vsel %vm52_vm10, -1e+30, %v351_v54 }
 0x28f   :  { %1338 = vperm.xlu1 %5296, %v5705_v55   ;;  %490 = vperm.xlu0 %5297, %v5709_v56  }
 0x291   :  { %v337_v57 = vpop.permute.xlu0 %336  ;;  %v379_v58 = vpop.permute.xlu1 %378 }
 0x292   :  { %v5716_v59 = vsel %vm52_vm10, -1e+30, %v337_v57  ;;  %v5720_v60 = vsel %vm53_vm11, -1e+30, %v379_v58 }
 0x293   :  { %484 = vperm.xlu1 %5296, %v5716_v59   ;;  %502 = vperm.xlu0 %5297, %v5720_v60  }
 0x295   :  { %v358_v61 = vpop.permute.xlu0 %357  ;;  %v407_v62 = vpop.permute.xlu1 %406 }
 0x296   :  { %v5726_v63 = vsel %vm52_vm10, -1e+30, %v358_v61  ;;  %v5730_v0 = vsel %vm53_vm11, -1e+30, %v407_v62 }
 0x297   :  { %493 = vperm.xlu1 %5296, %v5726_v63   ;;  %514 = vperm.xlu0 %5297, %v5730_v0  }
 0x299   :  { %v365_v1 = vpop.permute.xlu0 %364  ;;  %v414_v2 = vpop.permute.xlu1 %413 }
 0x29a   :  { %v5736_v3 = vsel %vm52_vm10, -1e+30, %v365_v1  ;;  %v5740_v5 = vsel %vm53_vm11, -1e+30, %v414_v2 }
 0x29b   :  { %496 = vperm.xlu1 %5296, %v5736_v3   ;;  %517 = vperm.xlu0 %5297, %v5740_v5  }
 0x29d   :  { %v372_v6 = vpop.permute.xlu0 %371  ;;  %v421_v13 = vpop.permute.xlu1 %420 }
 0x29e   :  { %v5791_v57 = vsel %vm52_vm10, -1e+30, %v372_v6  ;;  %v5811_v6 = vsel %vm53_vm11, -1e+30, %v421_v13 }
 0x29f   :  { %7164 = vst [vmem:[#allocation17_spill] sm:$0xff] %v5811_v6 }
 0x2a1   :  { %v386_v7 = vpop.permute.xlu0 %385  ;;  %v1238_v20 = vpop.permute.xlu1 %1237 }
 0x2a2   :  { %v5746_v9 = vsel %vm53_vm11, -1e+30, %v386_v7  ;;  %v5775_v43 = vsel %vm53_vm11, -1e+30, %v1238_v20 }
 0x2a3   :  { %505 = vperm.xlu1 %5296, %v5746_v9  }
 0x2a5   :  { %v393_v10 = vpop.permute.xlu0 %392  ;;  %v1245_v36 = vpop.permute.xlu1 %1244 }
 0x2a6   :  { %v5751_v11 = vsel %vm53_vm11, -1e+30, %v393_v10  ;;  %v5785_v54 = vsel %vm53_vm11, -1e+30, %v1245_v36  ;;  %v5816_v36 = vsub.s32 %v5543_v15, %v5590_v25 }
 0x2a7   :  { %508 = vperm.xlu1 %5296, %v5751_v11  }
 0x2a9   :  { %v400_v14 = vpop.permute.xlu0 %399  ;;  %v1252_v47 = vpop.permute.xlu1 %1251 }
 0x2aa   :  { %v5756_v19 = vsel %vm53_vm11, -1e+30, %v400_v14  ;;  %v5795_v58 = vsel %vm53_vm11, -1e+30, %v1252_v47 }
 0x2ab   :  { %511 = vperm.xlu1 %5296, %v5756_v19   ;;  %7161 = vst [vmem:[#allocation14_spill] sm:$0xff] %v5795_v58 }
 0x2ad   :  { %v1224_v24 = vpop.permute.xlu0 %1223  ;;  %v1273_v61 = vpop.permute.xlu1 %1272 }
 0x2ae   :  { %v5761_v28 = vsel %vm53_vm11, -1e+30, %v1224_v24  ;;  %v5805_v2 = vsel %vm53_vm11, -1e+30, %v1273_v61 }
 0x2af   :  { %1347 = vperm.xlu1 %5296, %v5761_v28   ;;  %7163 = vst [vmem:[#allocation16_spill] sm:$0xff] %v5805_v2 }
 0x2b1   :  { %v1231_v31 = vpop.permute.xlu0 %1230 }
 0x2b2   :  { %v5766_v32 = vsel %vm53_vm11, -1e+30, %v1231_v31 }
 0x2b3   :  { %1350 = vperm.xlu0 %5297, %v5766_v32  }
 0x2b5   :  { %v1259_v37 = vpop.permute.xlu0 %1258 }
 0x2b6   :  { %v5771_v42 = vsel %vm53_vm11, -1e+30, %v1259_v37 }
 0x2b7   :  { %1362 = vperm.xlu1 %5296, %v5771_v42   ;;  %1353 = vperm.xlu0 %5297, %v5775_v43  }
 0x2b9   :  { %v1266_v49 = vpop.permute.xlu0 %1265 }
 0x2ba   :  { %v5781_v53 = vsel %vm53_vm11, -1e+30, %v1266_v49 }
 0x2bb   :  { %1365 = vperm.xlu1 %5296, %v5781_v53   ;;  %1356 = vperm.xlu0 %5297, %v5785_v54  }
 0x2bd   :  { %v428_v62 = vpop.permute.xlu0 %427 }
 0x2be   :  { %v5801_v1 = vsel %vm53_vm11, -1e+30, %v428_v62 }
 0x2bf   :  { %499 = vperm.xlu1 %5296, %v5791_v57   ;;  %1359 = vperm.xlu0 %5297, %v5795_v58   ;;  %7162 = vst [vmem:[#allocation15_spill] sm:$0xff] %v5801_v1 }
 0x2c3   :  { %523 = vperm.xlu1 %5296, %v5801_v1   ;;  %1368 = vperm.xlu0 %5297, %v5805_v2  }
 0x2c7   :  { %520 = vperm.xlu0 %5297, %v5811_v6  }
 0x2f6   :  { %v1327_v7 = vpop.permute.xlu0 %1326  ;;  %v1324_v10 = vpop.permute.xlu1 %1323 }
 0x2f7   :  { %v1377_v49 = vrot.slane %v1327_v7, %v5816_v36  ;;  %v1373_v61 = vrot.slane %v1324_v10, %v5816_v36 }
 0x2f9   :  { %v1434_v22 = vsel %vm589_vm12, %v1377_v49, %v1373_v61 }
 0x2fa   :  { %v482_v14 = vpop.permute.xlu0 %481  ;;  %v1330_v20 = vpop.permute.xlu1 %1329 }
 0x2fb   :  { %v1381_v13 = vrot.slane %v1330_v20, %v5816_v36 }
 0x2fd   :  { %v1435_v25 = vsel %vm591_vm13, %v1381_v13, %v1434_v22 }
 0x2fe   :  { %v1342_v24 = vpop.permute.xlu0 %1341  ;;  %v1333_v31 = vpop.permute.xlu1 %1332 }
 0x2ff   :  { %v1385_v4 = vrot.slane %v1333_v31, %v5816_v36  ;;  %v1397_v20 = vrot.slane %v1342_v24, %v5816_v36 }
 0x301   :  { %v1436_v7 = vsel %vm593_vm14, %v1385_v4, %v1435_v25 }
 0x302   :  { %v1336_v37 = vpop.permute.xlu1 %1335  ;;  %v488_v47 = vpop.permute.xlu0 %487 }
 0x303   :  { %v1389_v23 = vrot.slane %v1336_v37, %v5816_v36 }
 0x305   :  { %v1437_v31 = vsel %vm595_vm15, %v1389_v23, %v1436_v7 }
 0x306   :  { %v479_v62 = vpop.permute.xlu1 %478  ;;  %v1345_v16 = vpop.permute.xlu0 %1344 }
 0x307   :  { %v1401_v37 = vrot.slane %v1345_v16, %v5816_v36  ;;  %v528_v17 = vrot.slane %v479_v62, %v5816_v36 }
 0x30a   :  { %v1339_v21 = vpop.permute.xlu1 %1338  ;;  %v491_v25 = vpop.permute.xlu0 %490 }
 0x30b   :  { %v1393_v10 = vrot.slane %v1339_v21, %v5816_v36  ;;  %v544_v2 = vrot.slane %v491_v25, %v5816_v36 }
 0x30d   :  { %v1438_v49 = vsel %vm597_vm3, %v1393_v10, %v1437_v31 }
 0x30e   :  { %v485_v61 = vpop.permute.xlu1 %484  ;;  %v1439_v22 = vsel %vm599_vm4, %v1397_v20, %v1438_v49  ;;  %v503_v24 = vpop.permute.xlu0 %502  ;;  %v532_v20 = vrot.slane %v482_v14, %v5816_v36 }
 0x30f   :  { %v1440_v13 = vsel %vm601_vm5, %v1401_v37, %v1439_v22  ;;  %v536_v10 = vrot.slane %v485_v61, %v5816_v36 }
 0x310   :  { %v1450_v4 = vsel %vm612_vm6, %v1440_v13, -inf  ;;  %v590_v49 = vsel %vm589_vm12, %v532_v20, %v528_v17  ;;  %v540_v13 = vrot.slane %v488_v47, %v5816_v36 }
 0x311   :  { %1451 = vmax.xlane.f32.xlu0 %v1450_v4  ;;  %v592_v22 = vsel %vm591_vm13, %v536_v10, %v590_v49 }
 0x312   :  { %v494_v21 = vpop.permute.xlu1 %493  ;;  %v515_v7 = vpop.permute.xlu0 %514  ;;  %v594_v6 = vsel %vm593_vm14, %v540_v13, %v592_v22 }
 0x313   :  { %v548_v14 = vrot.slane %v494_v21, %v5816_v36  ;;  %v596_v17 = vsel %vm595_vm15, %v544_v2, %v594_v6 }
 0x315   :  { %v598_v6 = vsel %vm597_vm3, %v548_v14, %v596_v17 }
 0x316   :  { %v497_v15 = vpop.permute.xlu1 %496  ;;  %v518_v16 = vpop.permute.xlu0 %517 }
 0x317   :  { %v552_v10 = vrot.slane %v497_v15, %v5816_v36 }
 0x31e   :  { %v506_v8 = vpop.permute.xlu1 %505 }
 0x31f   :  { %v564_v47 = vrot.slane %v506_v8, %v5816_v36 }
 0x322   :  { %v509_v23 = vpop.permute.xlu1 %508 }
 0x323   :  { %v568_v25 = vrot.slane %v509_v23, %v5816_v36 }
 0x326   :  { %v512_v12 = vpop.permute.xlu1 %511 }
 0x327   :  { %v572_v22 = vrot.slane %v512_v12, %v5816_v36  ;;  %v600_v12 = vsel %vm599_vm4, %v552_v10, %v598_v6 }
 0x32a   :  { %v1348_v31 = vpop.permute.xlu1 %1347 }
 0x32b   :  { %v1405_v20 = vrot.slane %v1348_v31, %v5816_v36 }
 0x32e   :  { %v1351_v37 = vpop.permute.xlu0 %1350 }
 0x32f   :  { %v1409_v62 = vrot.slane %v1351_v37, %v5816_v36  ;;  %v560_v37 = vrot.slane %v503_v24, %v5816_v36 }
 0x331   :  { %v1441_v21 = vsel %vm589_vm12, %v1409_v62, %v1405_v20 }
 0x332   :  { %v1354_v4 = vpop.permute.xlu0 %1353  ;;  %v1363_v18 = vpop.permute.xlu1 %1362 }
 0x333   :  { %v1413_v58 = vrot.slane %v1354_v4, %v5816_v36  ;;  %v1425_v23 = vrot.slane %v1363_v18, %v5816_v36  ;;  %v576_v18 = vrot.slane %v515_v7, %v5816_v36 }
 0x335   :  { %v1442_v2 = vsel %vm591_vm13, %v1413_v58, %v1441_v21 }
 0x336   :  { %v1357_v1 = vpop.permute.xlu0 %1356  ;;  %v1366_v61 = vpop.permute.xlu1 %1365 }
 0x337   :  { %v1417_v49 = vrot.slane %v1357_v1, %v5816_v36  ;;  %v603_v1 = vsel %vm589_vm12, %v564_v47, %v560_v37  ;;  %v1429_v62 = vrot.slane %v1366_v61, %v5816_v36  ;;  %v580_v37 = vrot.slane %v518_v16, %v5816_v36 }
 0x338   :  { %v604_v31 = vsel %vm591_vm13, %v568_v25, %v603_v1 }
 0x339   :  { %v1443_v24 = vsel %vm593_vm14, %v1417_v49, %v1442_v2  ;;  %v605_v21 = vsel %vm593_vm14, %v572_v22, %v604_v31 }
 0x33a   :  { %v1360_v13 = vpop.permute.xlu0 %1359  ;;  %v500_v4 = vpop.permute.xlu1 %499  ;;  %v606_v25 = vsel %vm595_vm15, %v576_v18, %v605_v21 }
 0x33b   :  { %v1421_v15 = vrot.slane %v1360_v13, %v5816_v36  ;;  %v556_v8 = vrot.slane %v500_v4, %v5816_v36 }
 0x33d   :  { %v1444_v58 = vsel %vm595_vm15, %v1421_v15, %v1443_v24  ;;  %v602_v20 = vsel %vm601_vm5, %v556_v8, %v600_v12  ;;  %v607_v15 = vsel %vm597_vm3, %v580_v37, %v606_v25 }
 0x33e   :  { %v1369_v13 = vpop.permute.xlu0 %1368  ;;  %v613_v14 = vsel %vm612_vm6, %v602_v20, -inf  ;;  %v1445_v17 = vsel %vm597_vm3, %v1425_v23, %v1444_v58  ;;  %v524_v49 = vpop.permute.xlu1 %523 }
 0x33f   :  { %v1433_v47 = vrot.slane %v1369_v13, %v5816_v36  ;;  %614 = vmax.xlane.f32.xlu0 %v613_v14  ;;  %v1446_v10 = vsel %vm599_vm4, %v1429_v62, %v1445_v17  ;;  %v588_v7 = vrot.slane %v524_v49, %v5816_v36 }
 0x341   :  { %v1447_v61 = vsel %vm601_vm5, %v1433_v47, %v1446_v10 }
 0x342   :  { %v521_v22 = vpop.permute.xlu0 %520  ;;  %v1453_v4 = vsel %vm612_vm6, %v1447_v61, -inf }
 0x343   :  { %v584_v2 = vrot.slane %v521_v22, %v5816_v36  ;;  %1454 = vmax.xlane.f32.xlu1 %v1453_v4 }
 0x345   :  { %v608_v8 = vsel %vm599_vm4, %v584_v2, %v607_v15 }
 0x346   :  { %v609_v6 = vsel %vm601_vm5, %v588_v7, %v608_v8 }
 0x347   :  { %v616_v1 = vsel %vm612_vm6, %v609_v6, -inf }
 0x348   :  { %617 = vmax.xlane.f32.xlu0 %v616_v1 }
 0x39a   :  { %v1452_v23 = vpop.xlane.xlu0 %1451 }
 0x39b   :  { %v1461_v16 = vrot.slane %v1452_v23, %v5593_v26  ;;  %v1465_v24 = vrot.slane %v1452_v23, %v5596_v27  ;;  %v1469_v12 = vrot.slane %v1452_v23, %v5599_v33  ;;  %v1473_v31 = vrot.slane %v1452_v23, %v5604_v39 }
 0x39c   :  { %v1477_v14 = vrot.slane %v1452_v23, %v5612_v45  ;;  %v1481_v61 = vrot.slane %v1452_v23, %v5622_v51  ;;  %v1485_v25 = vrot.slane %v1452_v23, %v5607_v40 }
 0x39d   :  { %v1538_v62 = vsub.f32 %v5655_v29, %v1461_v16  ;;  %v1539_v58 = vsub.f32 %v5659_v30, %v1465_v24  ;;  %v1540_v20 = vsub.f32 %v5665_v34, %v1469_v12  ;;  %v1541_v17 = vsub.f32 %v5675_v38, %v1473_v31 }
 0x39e   :  { %v1542_v47 = vsub.f32 %v5685_v44, %v1477_v14  ;;  %v1543_v2 = vsub.f32 %v5705_v55, %v1481_v61  ;;  %v1544_v6 = vsub.f32 %v5679_v41, %v1485_v25 }
 0x39f   :  { %v1554_v21 = vmul.f32 1.442695, %v1538_v62  ;;  %v1556_v13 = vmul.f32 1.442695, %v1539_v58  ;;  %v1558_v18 = vmul.f32 1.442695, %v1540_v20  ;;  %v1489_v62 = vrot.slane %v1452_v23, %v5617_v48 }
 0x3a0   :  { %v1560_v10 = vmul.f32 1.442695, %v1541_v17  ;;  %v1562_v49 = vmul.f32 1.442695, %v1542_v47  ;;  %v1564_v12 = vmul.f32 1.442695, %v1543_v2 }
 0x3a1   :  { %5303 = vpow2.f32 %v1554_v21  ;;  %v1566_v58 = vmul.f32 1.442695, %v1544_v6  ;;  %v1545_v21 = vsub.f32 %v5699_v52, %v1489_v62 }
 0x3a2   :  { %5305 = vpow2.f32 %v1556_v13 }
 0x3a3   :  { %5307 = vpow2.f32 %v1558_v18  ;;  %v1568_v18 = vmul.f32 1.442695, %v1545_v21 }
 0x3a4   :  { %5309 = vpow2.f32 %v1560_v10 }
 0x3a5   :  { %5311 = vpow2.f32 %v1562_v49 }
 0x3ae   :  { %v5892_v29 = vpop.eup %5303 }
 0x3af   :  { %v5894_v30 = vpop.eup %5305  ;;  %1603 = vperm.xlu1 %5296, %v5892_v29  }
 0x3b0   :  { %1606 = vperm.xlu0 %5297, %v5894_v30   ;;  %v5898_v34 = vpop.eup %5307 }
 0x3b1   :  { %v5901_v38 = vpop.eup %5309 }
 0x3b2   :  { %v5904_v44 = vpop.eup %5311 }
 0x3b3   :  { %1609 = vperm.xlu1 %5296, %v5898_v34  }
 0x3b7   :  { %1612 = vperm.xlu1 %5296, %v5901_v38  }
 0x3bb   :  { %1615 = vperm.xlu1 %5296, %v5904_v44  }
 0x3c8   :  { %v5909_v37 = vpop.xlane.xlu0 %614 }
 0x3c9   :  { %v624_v22 = vrot.slane %v5909_v37, %v5593_v26  ;;  %v628_v4 = vrot.slane %v5909_v37, %v5596_v27  ;;  %v632_v7 = vrot.slane %v5909_v37, %v5599_v33  ;;  %v636_v1 = vrot.slane %v5909_v37, %v5604_v39 }
 0x3ca   :  { %v644_v31 = vrot.slane %v5909_v37, %v5622_v51 }
 0x3cb   :  { %v701_v15 = vsub.f32 %v5695_v50, %v624_v22  ;;  %v702_v8 = vsub.f32 %v5669_v35, %v628_v4  ;;  %v703_v55 = vsub.f32 %v5716_v59, %v632_v7  ;;  %v704_v50 = vsub.f32 %v5689_v46, %v636_v1 }
 0x3cc   :  { %v648_v35 = vrot.slane %v5909_v37, %v5607_v40  ;;  %v706_v41 = vsub.f32 %v5726_v63, %v644_v31  ;;  %v640_v59 = vrot.slane %v5909_v37, %v5612_v45 }
 0x3cd   :  { %v717_v16 = vmul.f32 1.442695, %v701_v15  ;;  %v719_v24 = vmul.f32 1.442695, %v702_v8  ;;  %v721_v20 = vmul.f32 1.442695, %v703_v55  ;;  %v5959_v15 = vpop.xlane.xlu1 %1454 }
 0x3ce   :  { %v723_v13 = vmul.f32 1.442695, %v704_v50  ;;  %v707_v23 = vsub.f32 %v5736_v3, %v648_v35  ;;  %v727_v46 = vmul.f32 1.442695, %v706_v41  ;;  %v705_v63 = vsub.f32 %v5709_v56, %v640_v59 }
 0x3cf   :  { %5313 = vpow2.f32 %v717_v16  ;;  %v1497_v31 = vrot.slane %v5959_v15, %v5596_v27 }
 0x3d0   :  { %5315 = vpow2.f32 %v719_v24  ;;  %v729_v47 = vmul.f32 1.442695, %v707_v23  ;;  %v725_v61 = vmul.f32 1.442695, %v705_v63 }
 0x3d1   :  { %5317 = vpow2.f32 %v1564_v12  ;;  %v5934_v14 = vpop.xlane.xlu0 %617  ;;  %v1547_v41 = vsub.f32 %v5766_v32, %v1497_v31  ;;  %v1505_v32 = vrot.slane %v5959_v15, %v5604_v39 }
 0x3d2   :  { %5319 = vpow2.f32 %v1566_v58  ;;  %v660_v17 = vrot.slane %v5934_v14, %v5596_v27  ;;  %v656_v52 = vrot.slane %v5934_v14, %v5593_v26  ;;  %v664_v10 = vrot.slane %v5934_v14, %v5599_v33 }
 0x3d3   :  { %5321 = vpow2.f32 %v721_v20  ;;  %v672_v25 = vrot.slane %v5934_v14, %v5612_v45  ;;  %v668_v4 = vrot.slane %v5934_v14, %v5604_v39  ;;  %v680_v31 = vrot.slane %v5934_v14, %v5607_v40 }
 0x3d4   :  { %5323 = vpow2.f32 %v723_v13  ;;  %v710_v49 = vsub.f32 %v5746_v9, %v660_v17  ;;  %v709_v56 = vsub.f32 %v5720_v60, %v656_v52  ;;  %v711_v9 = vsub.f32 %v5751_v11, %v664_v10 }
 0x3d5   :  { %5325 = vpow2.f32 %v727_v46  ;;  %v676_v60 = vrot.slane %v5934_v14, %v5622_v51  ;;  %v713_v8 = vsub.f32 %v5730_v0, %v672_v25  ;;  %v1493_v11 = vrot.slane %v5959_v15, %v5593_v26 }
 0x3d6   :  { %5327 = vpow2.f32 %v1568_v18  ;;  %v735_v2 = vmul.f32 1.442695, %v710_v49  ;;  %v733_v6 = vmul.f32 1.442695, %v709_v56  ;;  %v712_v16 = vsub.f32 %v5756_v19, %v668_v4  ;;  %v7165_v4 = vld [vmem:[#allocation14_spill] sm:$0xff] }
 0x3d7   :  { %5329 = vpow2.f32 %v729_v47  ;;  %v737_v24 = vmul.f32 1.442695, %v711_v9  ;;  %v714_v0 = vsub.f32 %v5740_v5, %v676_v60  ;;  %v741_v55 = vmul.f32 1.442695, %v713_v8  ;;  %v7166_v8 = vld [vmem:[#allocation15_spill] sm:$0xff] }
 0x3d8   :  { %5331 = vpow2.f32 %v725_v61  ;;  %v1513_v19 = vrot.slane %v5959_v15, %v5622_v51  ;;  %v1546_v58 = vsub.f32 %v5761_v28, %v1493_v11  ;;  %v739_v50 = vmul.f32 1.442695, %v712_v16  ;;  %v7167_v16 = vld [vmem:[#allocation16_spill] sm:$0xff] }
 0x3d9   :  { %5333 = vpow2.f32 %v735_v2  ;;  %v1501_v5 = vrot.slane %v5959_v15, %v5599_v33  ;;  %v743_v20 = vmul.f32 1.442695, %v714_v0  ;;  %v1517_v28 = vrot.slane %v5959_v15, %v5607_v40 }
 0x3da   :  { %5335 = vpow2.f32 %v733_v6  ;;  %v1551_v59 = vsub.f32 %v5771_v42, %v1513_v19  ;;  %v1570_v13 = vmul.f32 1.442695, %v1546_v58  ;;  %v1572_v17 = vmul.f32 1.442695, %v1547_v41 }
 0x3db   :  { %5337 = vpow2.f32 %v737_v24  ;;  %v1548_v46 = vsub.f32 %v5775_v43, %v1501_v5  ;;  %v652_v42 = vrot.slane %v5909_v37, %v5617_v48  ;;  %v1552_v63 = vsub.f32 %v5781_v53, %v1517_v28 }
 0x3dc   :  { %v5945_v3 = vpop.eup %5313  ;;  %5339 = vpow2.f32 %v741_v55  ;;  %v1580_v52 = vmul.f32 1.442695, %v1551_v59  ;;  %v1509_v43 = vrot.slane %v5959_v15, %v5612_v45  ;;  %v1549_v10 = vsub.f32 %v5785_v54, %v1505_v32 }
 0x3dd   :  { %v5950_v22 = vpop.eup %5315  ;;  %766 = vperm.xlu1 %5296, %v5945_v3   ;;  %5341 = vpow2.f32 %v739_v50  ;;  %v1574_v49 = vmul.f32 1.442695, %v1548_v46  ;;  %v708_v37 = vsub.f32 %v5791_v57, %v652_v42  ;;  %v1582_v53 = vmul.f32 1.442695, %v1552_v63  ;;  %v7168_v50 = vld [vmem:[#allocation17_spill] sm:$0xff]  ;;  %v7172_v63 = vld [vmem:[#allocation10_spill] sm:$0xff] }
 0x3de   :  { %769 = vperm.xlu0 %5297, %v5950_v22   ;;  %v5957_v7 = vpop.eup %5317  ;;  %5343 = vpow2.f32 %v743_v20  ;;  %v684_v25 = vrot.slane %v5934_v14, %v5617_v48  ;;  %v1521_v54 = vrot.slane %v5959_v15, %v5617_v48  ;;  %v1550_v9 = vsub.f32 %v7165_v4, %v1509_v43 }
 0x3df   :  { %v5964_v1 = vpop.eup %5319  ;;  %5345 = vpow2.f32 %v1570_v13  ;;  %v1576_v2 = vmul.f32 1.442695, %v1549_v10  ;;  %v731_v57 = vmul.f32 1.442695, %v708_v37  ;;  %v715_v5 = vsub.f32 %v7168_v50, %v680_v31 }
 0x3e0   :  { %v5971_v12 = vpop.eup %5321  ;;  %5347 = vpow2.f32 %v1572_v17  ;;  %v716_v6 = vsub.f32 %v7166_v8, %v684_v25  ;;  %v1553_v24 = vsub.f32 %v7167_v16, %v1521_v54  ;;  %v1578_v15 = vmul.f32 1.442695, %v1550_v9 }
 0x3e1   :  { %1618 = vperm.xlu1 %5296, %v5957_v7   ;;  %v5976_v62 = vpop.eup %5323  ;;  %5349 = vpow2.f32 %v1580_v52  ;;  %v745_v20 = vmul.f32 1.442695, %v715_v5  ;;  %v7173_v52 = vld [vmem:[#allocation9_spill] sm:$0xff] }
 0x3e2   :  { %1621 = vperm.xlu0 %5297, %v5964_v1   ;;  %v5983_v35 = vpop.eup %5325  ;;  %5351 = vpow2.f32 %v1574_v49  ;;  %v747_v55 = vmul.f32 1.442695, %v716_v6  ;;  %v1584_v58 = vmul.f32 1.442695, %v1553_v24  ;;  %v5298_v43 = vpack.i.bf16 %v7173_v52, %v7172_v63 }
 0x3e3   :  { %v5988_v21 = vpop.eup %5327  ;;  %5353 = vpow2.f32 %v1582_v53 }
 0x3e4   :  { %v5995_v23 = vpop.eup %5329  ;;  %5355 = vpow2.f32 %v1576_v2 }
 0x3e5   :  { %772 = vperm.xlu1 %5296, %v5971_v12   ;;  %v6000_v18 = vpop.eup %5331  ;;  %5357 = vpow2.f32 %v731_v57 }
 0x3e6   :  { %775 = vperm.xlu0 %5297, %v5976_v62   ;;  %v6007_v47 = vpop.eup %5333  ;;  %5359 = vpow2.f32 %v1578_v15 }
 0x3e7   :  { %v6012_v61 = vpop.eup %5335  ;;  %5361 = vpow2.f32 %v747_v55 }
 0x3e8   :  { %v6019_v56 = vpop.eup %5337  ;;  %5363 = vpow2.f32 %v1584_v58 }
 0x3e9   :  { %781 = vperm.xlu1 %5296, %v5983_v35   ;;  %v6024_v60 = vpop.eup %5339  ;;  %5365 = vpow2.f32 %v745_v20 }
 0x3ea   :  { %1624 = vperm.xlu0 %5297, %v5988_v21   ;;  %v6029_v11 = vpop.eup %5341 }
 0x3eb   :  { %v6034_v0 = vpop.eup %5343 }
 0x3ec   :  { %v6038_v19 = vpop.eup %5345 }
 0x3ed   :  { %784 = vperm.xlu1 %5296, %v5995_v23   ;;  %v6041_v41 = vpop.eup %5347 }
 0x3ee   :  { %778 = vperm.xlu0 %5297, %v6000_v18   ;;  %v6045_v14 = vpop.eup %5349 }
 0x3ef   :  { %7169 = vst [vmem:[#allocation14_spill] sm:$0xff] %v6045_v14  ;;  %v6047_v28 = vpop.eup %5351 }
 0x3f0   :  { %v6051_v59 = vpop.eup %5353 }
 0x3f1   :  { %793 = vperm.xlu1 %5296, %v6007_v47   ;;  %v6053_v13 = vpop.eup %5355 }
 0x3f2   :  { %790 = vperm.xlu0 %5297, %v6012_v61   ;;  %v6057_v32 = vpop.eup %5357 }
 0x3f3   :  { %v6059_v46 = vpop.eup %5359 }
 0x3f4   :  { %v6063_v17 = vpop.eup %5361 }
 0x3f5   :  { %796 = vperm.xlu1 %5296, %v6019_v56   ;;  %7170 = vst [vmem:[#allocation15_spill] sm:$0xff] %v6063_v17  ;;  %v6065_v42 = vpop.eup %5363 }
 0x3f6   :  { %802 = vperm.xlu0 %5297, %v6024_v60   ;;  %7171 = vst [vmem:[#allocation16_spill] sm:$0xff] %v6065_v42  ;;  %v6071_v10 = vpop.eup %5365 }
 0x3f7   :  { %7174 = vst [vmem:[#allocation17_spill] sm:$0xff] %v6071_v10 }
 0x3f9   :  { %799 = vperm.xlu1 %5296, %v6029_v11  }
 0x3fa   :  { %805 = vperm.xlu0 %5297, %v6034_v0  }
 0x3fd   :  { %1627 = vperm.xlu1 %5296, %v6038_v19  }
 0x3fe   :  { %1630 = vperm.xlu0 %5297, %v6041_v41  }
 0x401   :  { %1642 = vperm.xlu1 %5296, %v6045_v14  }
 0x402   :  { %1633 = vperm.xlu0 %5297, %v6047_v28  }
 0x405   :  { %1645 = vperm.xlu1 %5296, %v6051_v59  }
 0x406   :  { %1636 = vperm.xlu0 %5297, %v6053_v13  }
 0x409   :  { %787 = vperm.xlu1 %5296, %v6057_v32  }
 0x40a   :  { %1639 = vperm.xlu0 %5297, %v6059_v46  }
 0x40d   :  { %811 = vperm.xlu1 %5296, %v6063_v17  }
 0x40e   :  { %1648 = vperm.xlu0 %5297, %v6065_v42  }
 0x411   :  { %5299 = vrot.lane.b32.xlu1 %v5298_v43, %s5483_s23 }
 0x412   :  { %808 = vperm.xlu0 %5297, %v6071_v10  }
 0x42a   :  { %v1604_v49 = vpop.permute.xlu1 %1603 }
 0x42b   :  { %v1607_v54 = vpop.permute.xlu0 %1606  ;;  %v1653_v57 = vrot.slane %v1604_v49, %v5816_v36 }
 0x42c   :  { %v1657_v2 = vrot.slane %v1607_v54, %v5816_v36 }
 0x42e   :  { %v1610_v37 = vpop.permute.xlu1 %1609  ;;  %v1714_v31 = vsel %vm589_vm12, %v1657_v2, %v1653_v57 }
 0x42f   :  { %v1661_v6 = vrot.slane %v1610_v37, %v5816_v36 }
 0x431   :  { %v1715_v50 = vsel %vm591_vm13, %v1661_v6, %v1714_v31 }
 0x432   :  { %v1613_v53 = vpop.permute.xlu1 %1612 }
 0x433   :  { %v1665_v24 = vrot.slane %v1613_v53, %v5816_v36 }
 0x435   :  { %v1716_v20 = vsel %vm593_vm14, %v1665_v24, %v1715_v50 }
 0x436   :  { %v1616_v25 = vpop.permute.xlu1 %1615 }
 0x437   :  { %v1669_v15 = vrot.slane %v1616_v25, %v5816_v36 }
 0x439   :  { %v1717_v63 = vsel %vm595_vm15, %v1669_v15, %v1716_v20 }
 0x458   :  { %v767_v4 = vpop.permute.xlu1 %766 }
 0x459   :  { %v770_v9 = vpop.permute.xlu0 %769  ;;  %v816_v20 = vrot.slane %v767_v4, %v5816_v36 }
 0x45c   :  { %v1619_v8 = vpop.permute.xlu1 %1618 }
 0x45d   :  { %v1622_v16 = vpop.permute.xlu0 %1621  ;;  %v1673_v55 = vrot.slane %v1619_v8, %v5816_v36 }
 0x45e   :  { %v1677_v52 = vrot.slane %v1622_v16, %v5816_v36 }
 0x45f   :  { %v1718_v43 = vsel %vm597_vm3, %v1673_v55, %v1717_v63  ;;  %v820_v55 = vrot.slane %v770_v9, %v5816_v36 }
 0x460   :  { %v773_v58 = vpop.permute.xlu1 %772  ;;  %v1719_v25 = vsel %vm599_vm4, %v1677_v52, %v1718_v43 }
 0x461   :  { %v776_v5 = vpop.permute.xlu0 %775  ;;  %v824_v63 = vrot.slane %v773_v58, %v5816_v36 }
 0x464   :  { %v782_v49 = vpop.permute.xlu1 %781 }
 0x465   :  { %v1625_v37 = vpop.permute.xlu0 %1624  ;;  %v836_v4 = vrot.slane %v782_v49, %v5816_v36 }
 0x466   :  { %v1681_v53 = vrot.slane %v1625_v37, %v5816_v36  ;;  %v877_v37 = vsel %vm589_vm12, %v820_v55, %v816_v20 }
 0x468   :  { %v785_v54 = vpop.permute.xlu1 %784  ;;  %v1720_v2 = vsel %vm601_vm5, %v1681_v53, %v1719_v25  ;;  %v828_v53 = vrot.slane %v776_v5, %v5816_v36  ;;  %v878_v25 = vsel %vm591_vm13, %v824_v63, %v877_v37 }
 0x469   :  { %v779_v57 = vpop.permute.xlu0 %778  ;;  %v1730_v8 = vsel %vm612_vm6, %v1720_v2, 0.0 }
 0x46a   :  { %1731 = vadd.xlane.f32.xlu0 %v1730_v8  ;;  %v832_v2 = vrot.slane %v779_v57, %v5816_v36  ;;  %v879_v42 = vsel %vm593_vm14, %v828_v53, %v878_v25 }
 0x46c   :  { %v794_v6 = vpop.permute.xlu1 %793  ;;  %v880_v9 = vsel %vm595_vm15, %v832_v2, %v879_v42  ;;  %v840_v42 = vrot.slane %v785_v54, %v5816_v36 }
 0x46d   :  { %v791_v24 = vpop.permute.xlu0 %790  ;;  %v852_v57 = vrot.slane %v794_v6, %v5816_v36  ;;  %v881_v37 = vsel %vm597_vm3, %v836_v4, %v880_v9 }
 0x46e   :  { %v848_v20 = vrot.slane %v791_v24, %v5816_v36  ;;  %v882_v2 = vsel %vm599_vm4, %v840_v42, %v881_v37 }
 0x470   :  { %v797_v15 = vpop.permute.xlu1 %796  ;;  %v884_v9 = vsel %vm589_vm12, %v852_v57, %v848_v20 }
 0x471   :  { %v803_v31 = vpop.permute.xlu0 %802  ;;  %v856_v53 = vrot.slane %v797_v15, %v5816_v36 }
 0x474   :  { %v800_v16 = vpop.permute.xlu1 %799 }
 0x475   :  { %v806_v50 = vpop.permute.xlu0 %805 }
 0x478   :  { %v1628_v52 = vpop.permute.xlu1 %1627 }
 0x479   :  { %v1631_v43 = vpop.permute.xlu0 %1630  ;;  %v1685_v14 = vrot.slane %v1628_v52, %v5816_v36 }
 0x47a   :  { %v1689_v58 = vrot.slane %v1631_v43, %v5816_v36  ;;  %v860_v43 = vrot.slane %v800_v16, %v5816_v36  ;;  %v885_v16 = vsel %vm591_vm13, %v856_v53, %v884_v9  ;;  %v868_v53 = vrot.slane %v806_v50, %v5816_v36 }
 0x47c   :  { %v1643_v8 = vpop.permute.xlu1 %1642  ;;  %v1721_v52 = vsel %vm589_vm12, %v1689_v58, %v1685_v14 }
 0x47d   :  { %v1634_v10 = vpop.permute.xlu0 %1633  ;;  %v1705_v54 = vrot.slane %v1643_v8, %v5816_v36  ;;  %v864_v8 = vrot.slane %v803_v31, %v5816_v36 }
 0x47e   :  { %v1693_v5 = vrot.slane %v1634_v10, %v5816_v36 }
 0x480   :  { %v1646_v17 = vpop.permute.xlu1 %1645  ;;  %v1722_v24 = vsel %vm591_vm13, %v1693_v5, %v1721_v52  ;;  %v886_v5 = vsel %vm593_vm14, %v860_v43, %v885_v16 }
 0x481   :  { %v1637_v55 = vpop.permute.xlu0 %1636  ;;  %v1709_v14 = vrot.slane %v1646_v17, %v5816_v36  ;;  %v887_v37 = vsel %vm595_vm15, %v864_v8, %v886_v5 }
 0x482   :  { %v1697_v63 = vrot.slane %v1637_v55, %v5816_v36  ;;  %v888_v31 = vsel %vm597_vm3, %v868_v53, %v887_v37 }
 0x484   :  { %v788_v49 = vpop.permute.xlu1 %787  ;;  %v1723_v15 = vsel %vm593_vm14, %v1697_v63, %v1722_v24 }
 0x485   :  { %v1640_v25 = vpop.permute.xlu0 %1639  ;;  %v844_v10 = vrot.slane %v788_v49, %v5816_v36 }
 0x486   :  { %v1701_v6 = vrot.slane %v1640_v25, %v5816_v36 }
 0x487   :  { %v883_v4 = vsel %vm601_vm5, %v844_v10, %v882_v2 }
 0x488   :  { %v1724_v58 = vsel %vm595_vm15, %v1701_v6, %v1723_v15  ;;  %v893_v55 = vsel %vm612_vm6, %v883_v4, 0.0  ;;  %v812_v42 = vpop.permute.xlu1 %811 }
 0x489   :  { %v1649_v49 = vpop.permute.xlu0 %1648  ;;  %894 = vadd.xlane.f32.xlu0 %v893_v55  ;;  %v1725_v20 = vsel %vm597_vm3, %v1705_v54, %v1724_v58  ;;  %v876_v10 = vrot.slane %v812_v42, %v5816_v36 }
 0x48a   :  { %v1713_v57 = vrot.slane %v1649_v49, %v5816_v36  ;;  %v1726_v63 = vsel %vm599_vm4, %v1709_v14, %v1725_v20 }
 0x48c   :  { %v1727_v17 = vsel %vm601_vm5, %v1713_v57, %v1726_v63  ;;  %v6157_v37 = vpop.permute.xlu1 %5299 }
 0x48d   :  { %v809_v52 = vpop.permute.xlu0 %808  ;;  %v1733_v43 = vsel %vm612_vm6, %v1727_v17, 0.0 }
 0x48e   :  { %v872_v25 = vrot.slane %v809_v52, %v5816_v36  ;;  %1734 = vadd.xlane.f32.xlu1 %v1733_v43 }
 0x490   :  { %v889_v24 = vsel %vm599_vm4, %v872_v25, %v888_v31 }
 0x491   :  { %v890_v6 = vsel %vm601_vm5, %v876_v10, %v889_v24 }
 0x492   :  { %v896_v2 = vsel %vm612_vm6, %v890_v6, 0.0 }
 0x493   :  { %897 = vadd.xlane.f32.xlu0 %v896_v2 }
 0x4f3   :  { %v1732_v9 = vpop.xlane.xlu0 %1731 }
 0x4f4   :  { %5367 = vrcp.f32 %v1732_v9 }
 0x501   :  { %v5368_v50 = vpop.eup %5367 }
 0x502   :  { %v1747_v54 = vrot.slane %v5368_v50, %v5596_v27  ;;  %v1743_v15 = vrot.slane %v5368_v50, %v5593_v26  ;;  %v1751_v14 = vrot.slane %v5368_v50, %v5599_v33  ;;  %v1755_v58 = vrot.slane %v5368_v50, %v5604_v39 }
 0x503   :  { %v1759_v49 = vrot.slane %v5368_v50, %v5612_v45  ;;  %v1767_v17 = vrot.slane %v5368_v50, %v5607_v40 }
 0x504   :  { %v1821_v4 = vmul.f32 %v5894_v30, %v1747_v54  ;;  %v1820_v16 = vmul.f32 %v5892_v29, %v1743_v15  ;;  %v1822_v55 = vmul.f32 %v5898_v34, %v1751_v14  ;;  %v1823_v5 = vmul.f32 %v5901_v38, %v1755_v58 }
 0x505   :  { %v1824_v20 = vmul.f32 %v5904_v44, %v1759_v49  ;;  %v1763_v30 = vrot.slane %v5368_v50, %v5622_v51  ;;  %v1826_v43 = vmul.f32 %v5964_v1, %v1767_v17 }
 0x506   :  { %1854 = vperm.xlu1 %5296, %v1821_v4   ;;  %1851 = vperm.xlu0 %5297, %v1820_v16  }
 0x507   :  { %v1825_v29 = vmul.f32 %v5957_v7, %v1763_v30  ;;  %v1771_v7 = vrot.slane %v5368_v50, %v5617_v48 }
 0x509   :  { %v1827_v52 = vmul.f32 %v5988_v21, %v1771_v7  ;;  %v7178_v7 = vld [vmem:[#allocation16_spill] sm:$0xff] }
 0x50a   :  { %1857 = vperm.xlu1 %5296, %v1822_v55   ;;  %1860 = vperm.xlu0 %5297, %v1823_v5  }
 0x50e   :  { %1863 = vperm.xlu0 %5297, %v1824_v20  }
 0x512   :  { %1866 = vperm.xlu0 %5297, %v1825_v29   ;;  %v895_v8 = vpop.xlane.xlu0 %894 }
 0x513   :  { %5369 = vrcp.f32 %v895_v8 }
 0x517   :  { %v1735_v53 = vpop.xlane.xlu1 %1734 }
 0x51c   :  { %v898_v57 = vpop.xlane.xlu0 %897 }
 0x51d   :  { %5371 = vrcp.f32 %v898_v57 }
 0x51e   :  { %5373 = vrcp.f32 %v1735_v53 }
 0x520   :  { %v6151_v63 = vpop.eup %5369 }
 0x521   :  { %v910_v34 = vrot.slane %v6151_v63, %v5596_v27  ;;  %v906_v38 = vrot.slane %v6151_v63, %v5593_v26  ;;  %v918_v25 = vrot.slane %v6151_v63, %v5604_v39  ;;  %v914_v10 = vrot.slane %v6151_v63, %v5599_v33 }
 0x522   :  { %v922_v21 = vrot.slane %v6151_v63, %v5612_v45  ;;  %v926_v2 = vrot.slane %v6151_v63, %v5622_v51  ;;  %v930_v50 = vrot.slane %v6151_v63, %v5607_v40  ;;  %v934_v20 = vrot.slane %v6151_v63, %v5617_v48 }
 0x523   :  { %v984_v44 = vmul.f32 %v5950_v22, %v910_v34  ;;  %v983_v42 = vmul.f32 %v5945_v3, %v906_v38  ;;  %v986_v22 = vmul.f32 %v5976_v62, %v918_v25  ;;  %v985_v31 = vmul.f32 %v5971_v12, %v914_v10  ;;  %v7176_v34 = vld [vmem:[#allocation15_spill] sm:$0xff]  ;;  %v7180_v10 = vld [vmem:[#allocation5_spill] sm:$0xff] }
 0x524   :  { %v987_v24 = vmul.f32 %v6000_v18, %v922_v21  ;;  %v988_v12 = vmul.f32 %v5983_v35, %v926_v2  ;;  %v989_v54 = vmul.f32 %v5995_v23, %v930_v50 }
 0x525   :  { %2148 = vperm.xlu1 %5296, %v984_v44   ;;  %2145 = vperm.xlu0 %5297, %v983_v42  }
 0x529   :  { %1872 = vperm.xlu1 %5296, %v1827_v52   ;;  %1869 = vperm.xlu0 %5297, %v1826_v43   ;;  %v7179_v43 = vld [vmem:[#allocation17_spill] sm:$0xff] }
 0x52a   :  { %v6169_v3 = vpop.eup %5371 }
 0x52b   :  { %v938_v1 = vrot.slane %v6169_v3, %v5593_v26  ;;  %v950_v62 = vrot.slane %v6169_v3, %v5604_v39  ;;  %v954_v18 = vrot.slane %v6169_v3, %v5612_v45  ;;  %v942_v4 = vrot.slane %v6169_v3, %v5596_v27 }
 0x52c   :  { %v958_v35 = vrot.slane %v6169_v3, %v5622_v51  ;;  %v946_v14 = vrot.slane %v6169_v3, %v5599_v33  ;;  %v966_v57 = vrot.slane %v6169_v3, %v5617_v48  ;;  %v962_v53 = vrot.slane %v6169_v3, %v5607_v40 }
 0x52d   :  { %2154 = vperm.xlu1 %5296, %v986_v22   ;;  %2151 = vperm.xlu0 %5297, %v985_v31   ;;  %v991_v6 = vmul.f32 %v6012_v61, %v938_v1  ;;  %v994_v9 = vmul.f32 %v6029_v11, %v950_v62  ;;  %v5374_v61 = vpop.eup %5373  ;;  %v995_v15 = vmul.f32 %v6024_v60, %v954_v18 }
 0x52e   :  { %v992_v11 = vmul.f32 %v6007_v47, %v942_v4  ;;  %v996_v16 = vmul.f32 %v6034_v0, %v958_v35  ;;  %v1779_v58 = vrot.slane %v5374_v61, %v5596_v27  ;;  %v993_v23 = vmul.f32 %v6019_v56, %v946_v14 }
 0x52f   :  { %v1783_v55 = vrot.slane %v5374_v61, %v5599_v33  ;;  %v1775_v5 = vrot.slane %v5374_v61, %v5593_v26  ;;  %v1787_v49 = vrot.slane %v5374_v61, %v5604_v39  ;;  %v1791_v30 = vrot.slane %v5374_v61, %v5612_v45 }
 0x530   :  { %v1829_v60 = vmul.f32 %v6041_v41, %v1779_v58  ;;  %v990_v41 = vmul.f32 %v6057_v32, %v934_v20  ;;  %v1799_v29 = vrot.slane %v5374_v61, %v5607_v40  ;;  %v1795_v8 = vrot.slane %v5374_v61, %v5622_v51  ;;  %v7175_v32 = vld [vmem:[#allocation14_spill] sm:$0xff] }
 0x531   :  { %2157 = vperm.xlu0 %5297, %v987_v24   ;;  %2292 = vperm.xlu1 %5296, %v991_v6   ;;  %v1830_v47 = vmul.f32 %v6047_v28, %v1783_v55  ;;  %v1828_v0 = vmul.f32 %v6038_v19, %v1775_v5  ;;  %v1831_v56 = vmul.f32 %v6053_v13, %v1787_v49  ;;  %v5301_v13 = vunpack.i.l.bf16 %v6157_v37 }
 0x532   :  { %v1832_v28 = vmul.f32 %v6059_v46, %v1791_v30  ;;  %v1834_v19 = vmul.f32 %v6051_v59, %v1799_v29  ;;  %v1833_v63 = vmul.f32 %v7175_v32, %v1795_v8  ;;  %v998_v38 = vmul.f32 %v7176_v34, %v966_v57  ;;  %v7177_v59 = vld [vmem:[#allocation6_spill] sm:$0xff] }
 0x533   :  { %v1803_v44 = vrot.slane %v5374_v61, %v5617_v48  ;;  %v5302_v46 = vunpack.i.h.bf16 %v6157_v37  ;;  %v1841_v42 = vmul.f32 %v5301_v13, %v7177_v59  ;;  %v997_v25 = vmul.f32 %v7179_v43, %v962_v53 }
 0x534   :  { %v1840_v37 = vmul.f32 %v5301_v13, %v7180_v10 }
 0x535   :  { %2160 = vperm.xlu0 %5297, %v988_v12   ;;  %2301 = vperm.xlu1 %5296, %v994_v9   ;;  %v1835_v17 = vmul.f32 %v7178_v7, %v1803_v44  ;;  %v1004_v52 = vmul.f32 %v5302_v46, %v7177_v59  ;;  %v1003_v22 = vmul.f32 %v5302_v46, %v7180_v10 }
 0x539   :  { %2163 = vperm.xlu0 %5297, %v989_v54   ;;  %2304 = vperm.xlu1 %5296, %v995_v15  }
 0x53d   :  { %2295 = vperm.xlu0 %5297, %v992_v11   ;;  %2307 = vperm.xlu1 %5296, %v996_v16  }
 0x541   :  { %2298 = vperm.xlu0 %5297, %v993_v23   ;;  %2001 = vperm.xlu1 %5296, %v1829_v60  }
 0x545   :  { %2004 = vperm.xlu1 %5296, %v1830_v47   ;;  %1998 = vperm.xlu0 %5297, %v1828_v0  }
 0x549   :  { %2007 = vperm.xlu1 %5296, %v1831_v56   ;;  %2166 = vperm.xlu0 %5297, %v990_v41  }
 0x54d   :  { %2010 = vperm.xlu1 %5296, %v1832_v28   ;;  %2016 = vperm.xlu0 %5297, %v1834_v19  }
 0x551   :  { %2013 = vperm.xlu1 %5296, %v1833_v63   ;;  %2313 = vperm.xlu0 %5297, %v998_v38  }
 0x555   :  { %2019 = vperm.xlu1 %5296, %v1835_v17   ;;  %2061 = vrot.lane.b32.xlu0 %v1841_v42, %s5484_s24 }
 0x559   :  { %2310 = vperm.xlu1 %5296, %v997_v25   ;;  %2355 = vrot.lane.b32.xlu0 %v1004_v52, %s5484_s24 }
 0x55d   :  { %1914 = vrot.lane.b32.xlu1 %v1840_v37, %s5484_s24 }
 0x561   :  { %2208 = vrot.lane.b32.xlu1 %v1003_v22, %s5484_s24 }
 0x581   :  { %v1852_v3 = vpop.permute.xlu0 %1851  ;;  %v1855_v21 = vpop.permute.xlu1 %1854 }
 0x582   :  { %v1877_v8 = vrot.slane %v1852_v3, %v5816_v36  ;;  %v1881_v57 = vrot.slane %v1855_v21, %v5816_v36 }
 0x584   :  { %v1906_v53 = vsel %vm589_vm12, %v1881_v57, %v1877_v8 }
 0x585   :  { %v6235_v31 = vpop.permute.xlu0 %1860  ;;  %v1858_v24 = vpop.permute.xlu1 %1857 }
 0x586   :  { %v1885_v63 = vrot.slane %v1858_v24, %v5816_v36  ;;  %v1889_v52 = vrot.slane %v6235_v31, %v5816_v36 }
 0x588   :  { %v1907_v37 = vsel %vm591_vm13, %v1885_v63, %v1906_v53 }
 0x589   :  { %v6237_v1 = vpop.permute.xlu0 %1863 }
 0x58a   :  { %v1893_v22 = vrot.slane %v6237_v1, %v5816_v36 }
 0x58d   :  { %v6239_v6 = vpop.permute.xlu0 %1866 }
 0x58e   :  { %v1897_v3 = vrot.slane %v6239_v6, %v5816_v36 }
 0x5a0   :  { %v6241_v2 = vpop.permute.xlu0 %2145  ;;  %v6243_v62 = vpop.permute.xlu1 %2148 }
 0x5a1   :  { %v2171_v24 = vrot.slane %v6241_v2, %v5816_v36  ;;  %v2175_v31 = vrot.slane %v6243_v62, %v5816_v36  ;;  %v1908_v2 = vsel %vm593_vm14, %v1889_v52, %v1907_v37  ;;  %v7184_v52 = vld [vmem:[#allocation8_spill] sm:$0xff] }
 0x5a4   :  { %v6245_v12 = vpop.permute.xlu0 %1869  ;;  %v6247_v9 = vpop.permute.xlu1 %1872 }
 0x5a5   :  { %v1901_v1 = vrot.slane %v6245_v12, %v5816_v36  ;;  %v1909_v12 = vsel %vm595_vm15, %v1893_v22, %v1908_v2 }
 0x5a8   :  { %v6249_v50 = vpop.permute.xlu0 %2151  ;;  %v6251_v18 = vpop.permute.xlu1 %2154 }
 0x5a9   :  { %v2179_v62 = vrot.slane %v6249_v50, %v5816_v36 }
 0x5ac   :  { %v6253_v61 = vpop.permute.xlu0 %2157  ;;  %v2293_v54 = vpop.permute.xlu1 %2292 }
 0x5ad   :  { %v2318_v13 = vrot.slane %v2293_v54, %v5816_v36 }
 0x5b0   :  { %v6255_v15 = vpop.permute.xlu0 %2160  ;;  %v2302_v4 = vpop.permute.xlu1 %2301 }
 0x5b1   :  { %v2330_v43 = vrot.slane %v2302_v4, %v5816_v36  ;;  %v2191_v57 = vrot.slane %v6255_v15, %v5816_v36 }
 0x5b4   :  { %v6257_v35 = vpop.permute.xlu0 %2163  ;;  %v2305_v11 = vpop.permute.xlu1 %2304 }
 0x5b8   :  { %v2296_v16 = vpop.permute.xlu0 %2295  ;;  %v6259_v14 = vpop.permute.xlu1 %2307 }
 0x5b9   :  { %v2322_v20 = vrot.slane %v2296_v16, %v5816_v36  ;;  %v2338_v50 = vrot.slane %v6259_v14, %v5816_v36  ;;  %v2187_v14 = vrot.slane %v6253_v61, %v5816_v36 }
 0x5bb   :  { %v2347_v34 = vsel %vm589_vm12, %v2322_v20, %v2318_v13  ;;  %v2200_v20 = vsel %vm589_vm12, %v2175_v31, %v2171_v24 }
 0x5bc   :  { %v2299_v58 = vpop.permute.xlu0 %2298  ;;  %v2002_v23 = vpop.permute.xlu1 %2001 }
 0x5bd   :  { %v2028_v49 = vrot.slane %v2002_v23, %v5816_v36  ;;  %v2326_v29 = vrot.slane %v2299_v58, %v5816_v36  ;;  %v2334_v23 = vrot.slane %v2305_v11, %v5816_v36 }
 0x5bf   :  { %v2348_v42 = vsel %vm591_vm13, %v2326_v29, %v2347_v34 }
 0x5c0   :  { %v1999_v60 = vpop.permute.xlu0 %1998  ;;  %v2005_v55 = vpop.permute.xlu1 %2004  ;;  %v2349_v54 = vsel %vm593_vm14, %v2330_v43, %v2348_v42  ;;  %v7183_v42 = vld [vmem:[#allocation11_spill] sm:$0xff] }
 0x5c1   :  { %v2024_v0 = vrot.slane %v1999_v60, %v5816_v36  ;;  %v2032_v56 = vrot.slane %v2005_v55, %v5816_v36  ;;  %v7181_v60 = vld [vmem:[#allocation7_spill] sm:$0xff]  ;;  %v2350_v11 = vsel %vm595_vm15, %v2334_v23, %v2349_v54 }
 0x5c2   :  { %vm2430_vm8 = vcmp.ge.s32.totalorder %v7181_v60, 6  ;;  %vm2431_vm9 = vcmp.lt.s32.totalorder %v7181_v60, 9 }
 0x5c3   :  { %v2053_v28 = vsel %vm589_vm12, %v2028_v49, %v2024_v0  ;;  %v1910_v49 = vsel %vm597_vm3, %v1897_v3, %v1909_v12  ;;  %vm2432_vm0 = vmand %vm2430_vm8, %vm2431_vm9  ;;  %vm3564_vm8 = vcmp.lt.s32.totalorder %v7181_v60, 12 }
 0x5c4   :  { %v6261_v5 = vpop.permute.xlu0 %2166  ;;  %v2008_v47 = vpop.permute.xlu1 %2007  ;;  %v2054_v38 = vsel %vm591_vm13, %v2032_v56, %v2053_v28  ;;  %v1905_v56 = vrot.slane %v6247_v9, %v5816_v36  ;;  %v1911_v29 = vsel %vm599_vm4, %v1901_v1, %v1910_v49  ;;  %v2183_v28 = vrot.slane %v6251_v18, %v5816_v36 }
 0x5c5   :  { %v2036_v19 = vrot.slane %v2008_v47, %v5816_v36  ;;  %v7182_v47 = vmov 0.0   ;;  %v2201_v9 = vsel %vm591_vm13, %v2179_v62, %v2200_v20  ;;  %v2351_v18 = vsel %vm597_vm3, %v2338_v50, %v2350_v11 }
 0x5c6   :  { %v2202_v61 = vsel %vm593_vm14, %v2183_v28, %v2201_v9  ;;  %v1912_v15 = vsel %vm601_vm5, %v1905_v56, %v1911_v29 }
 0x5c7   :  { %v2055_v7 = vsel %vm593_vm14, %v2036_v19, %v2054_v38  ;;  %v6341_v38 = vsel %vm2432_vm0, 1.0, %v7182_v47  ;;  %vm3563_vm0 = vcmp.ge.s32.totalorder %v7181_v60, 9 }
 0x5c8   :  { %v2017_v41 = vpop.permute.xlu0 %2016  ;;  %v2011_v30 = vpop.permute.xlu1 %2010  ;;  %v2435_v43 = vmul.f32 %v6341_v38, %v7180_v10  ;;  %vm3565_vm9 = vmand %vm3563_vm0, %vm3564_vm8 }
 0x5c9   :  { %v2040_v32 = vrot.slane %v2011_v30, %v5816_v36  ;;  %v2048_v4 = vrot.slane %v2017_v41, %v5816_v36  ;;  %v6698_v60 = vsel %vm3565_vm9, 1.0, %v7182_v47 }
 0x5cb   :  { %v2056_v25 = vsel %vm595_vm15, %v2040_v32, %v2055_v7  ;;  %v2195_v32 = vrot.slane %v6257_v35, %v5816_v36 }
 0x5cc   :  { %v2314_v44 = vpop.permute.xlu0 %2313  ;;  %v2014_v46 = vpop.permute.xlu1 %2013 }
 0x5cd   :  { %v2044_v17 = vrot.slane %v2014_v46, %v5816_v36  ;;  %v2346_v8 = vrot.slane %v2314_v44, %v5816_v36  ;;  %v2199_v44 = vrot.slane %v6261_v5, %v5816_v36  ;;  %v2203_v46 = vsel %vm595_vm15, %v2187_v14, %v2202_v61 }
 0x5ce   :  { %v2204_v35 = vsel %vm597_vm3, %v2191_v57, %v2203_v46  ;;  %v2436_v5 = vmul.f32 %v6341_v38, %v7177_v59 }
 0x5cf   :  { %v2057_v21 = vsel %vm597_vm3, %v2044_v17, %v2056_v25  ;;  %v2205_v7 = vsel %vm599_vm4, %v2195_v32, %v2204_v35 }
 0x5d0   :  { %v2020_v16 = vpop.permute.xlu1 %2019  ;;  %v2062_v58 = vpop.permute.xlu0 %2061  ;;  %v2058_v55 = vsel %vm599_vm4, %v2048_v4, %v2057_v21  ;;  %v2206_v53 = vsel %vm601_vm5, %v2199_v44, %v2205_v7 }
 0x5d1   :  { %v2052_v6 = vrot.slane %v2020_v16, %v5816_v36  ;;  %5200 = vmatpush3.msra.mxu0 %v2062_v58 }
 0x5d2   :  { %5209 = vmatprep.subr.mxu0 %v7182_v47 }
 0x5d3   :  { %v2059_v0 = vsel %vm601_vm5, %v2052_v6, %v2058_v55 }
 0x5d4   :  { %v2311_v41 = vpop.permute.xlu1 %2310  ;;  %5202 = vmatmul.mubr.msk.f32.vlgmr.msra.gmra.mxu0 %vm612_vm6, %v2059_v0  ;;  %v2356_v30 = vpop.permute.xlu0 %2355 }
 0x5d5   :  { %v2342_v19 = vrot.slane %v2311_v41, %v5816_v36  ;;  %5210 = vmatpush3.msra.mxu0 %v2356_v30  ;;  %5211 = vmatprep.mubr.msk.f32.mxu0 %vm5480_vm2, %v7182_v47 }
 0x5d6   :  { %5219 = vmatprep.subr.mxu0 %v7182_v47 }
 0x5d7   :  { %v2352_v13 = vsel %vm599_vm4, %v2342_v19, %v2351_v18 }
 0x5d8   :  { %v1915_v63 = vpop.permute.xlu1 %1914  ;;  %v2353_v34 = vsel %vm601_vm5, %v2346_v8, %v2352_v13 }
 0x5d9   :  { %5195 = vmatpush3.msra.mxu1 %v1915_v63  ;;  %5212 = vmatmul.mubr.msk.f32.vlgmr.msra.gmra.mxu0 %vm612_vm6, %v2353_v34 }
 0x5da   :  { %5220 = vmatpush3.xpose.msk.msra.mxu0 %vm155_vm7, %v7183_v42  ;;  %5197 = vmatmul.mubr.msk.f32.vlgmr.msra.gmra.mxu1 %vm612_vm6, %v1912_v15 }
 0x5db   :  { %5204 = vmatprep.subr.mxu1 %v7182_v47  ;;  %5221 = vmatprep.mubr.msk.f32.mxu0 %vm5480_vm2, %v7182_v47 }
 0x5dc   :  { %v2209_v17 = vpop.permute.xlu1 %2208  ;;  %5206 = vmatprep.mubr.msk.f32.mxu1 %vm5480_vm2, %v7182_v47  ;;  %5229 = vmatprep.subr.mxu0 %v7182_v47 }
 0x5dd   :  { %5205 = vmatpush3.msra.mxu1 %v2209_v17  ;;  %5222 = vmatmul.mubr.msk.f32.vlgmr.msra.gmra.mxu0 %vm155_vm7, %v2436_v5 }
 0x5de   :  { %5207 = vmatmul.mubr.msk.f32.vlgmr.msra.gmra.mxu1 %vm612_vm6, %v2206_v53  ;;  %5214 = vmatprep.subr.mxu1 %v7182_v47 }
 0x5df   :  { %5215 = vmatpush3.xpose.msk.msra.mxu1 %vm155_vm7, %v7184_v52  ;;  %5216 = vmatprep.mubr.msk.f32.mxu1 %vm5480_vm2, %v7182_v47 }
 0x5e0   :  { %5224 = vmatprep.subr.mxu1 %v7182_v47  ;;  %5231 = vmatprep.mubr.msk.f32.mxu0 %vm5480_vm2, %v7182_v47 }
 0x5e2   :  { %5217 = vmatmul.mubr.msk.f32.vlgmr.msra.gmra.mxu1 %vm155_vm7, %v2435_v43 }
 0x5e3   :  { %5226 = vmatprep.mubr.msk.f32.mxu1 %vm5480_vm2, %v7182_v47 }
 0x694   :  { %v2132_v25 = vpop.f32.mrf.mxu0 }
 0x696   :  { %v5203_v37 = vpop.f32.mrf.mxu0 }
 0x699   :  { %v2426_v22 = vpop.f32.mrf.mxu0 }
 0x69a   :  { %v6378_v3 = vadd.f32 %v2426_v22, %v2132_v25  ;;  %v1985_v21 = vpop.f32.mrf.mxu1 }
 0x69b   :  { %v5213_v24 = vpop.f32.mrf.mxu0 }
 0x69c   :  { %v5198_v31 = vpop.f32.mrf.mxu1 }
 0x69d   :  { %v2579_v54 = vpop.f32.mrf.mxu0 }
 0x69e   :  { %v2279_v4 = vpop.f32.mrf.mxu1  ;;  %v2584_v12 = vmul.f32 0.57735026, %v2579_v54 }
 0x69f   :  { %v6380_v16 = vadd.f32 %v2279_v4, %v1985_v21  ;;  %v5223_v58 = vpop.f32.mrf.mxu0 }
 0x6a0   :  { %v5208_v1 = vpop.f32.mrf.mxu1  ;;  %v2653_v20 = vrot.slane %v2584_v12, %v5596_v27  ;;  %v2660_v50 = vrot.slane %v2584_v12, %v5599_v33  ;;  %v2667_v30 = vrot.slane %v2584_v12, %v5604_v39  ;;  %v2646_v29 = vrot.slane %v2584_v12, %v5593_v26 }
 0x6a1   :  { %v2674_v28 = vrot.slane %v2584_v12, %v5612_v45  ;;  %v2681_v9 = vrot.slane %v2584_v12, %v5622_v51  ;;  %v2695_v14 = vrot.slane %v2584_v12, %v5617_v48  ;;  %v2688_v8 = vrot.slane %v2584_v12, %v5607_v40 }
 0x6a2   :  { %v2506_v23 = vpop.f32.mrf.mxu1 }
 0x6a3   :  { %v2583_v6 = vmul.f32 0.57735026, %v2506_v23 }
 0x6a4   :  { %v5218_v2 = vpop.f32.mrf.mxu1 }
 0x6a5   :  { %v2597_v62 = vrot.slane %v2583_v6, %v5596_v27  ;;  %v2590_v55 = vrot.slane %v2583_v6, %v5593_v26  ;;  %v2611_v11 = vrot.slane %v2583_v6, %v5604_v39  ;;  %v2604_v0 = vrot.slane %v2583_v6, %v5599_v33 }
 0x6a6   :  { %v2618_v49 = vrot.slane %v2583_v6, %v5612_v45  ;;  %v2625_v56 = vrot.slane %v2583_v6, %v5622_v51  ;;  %v2632_v41 = vrot.slane %v2583_v6, %v5607_v40  ;;  %v2639_v19 = vrot.slane %v2583_v6, %v5617_v48 }
 0x6a7   :  { %2599 = vbcast.lane.b32.xlu0 %v2597_v62, 256  ;;  %2592 = vbcast.lane.b32.xlu1 %v2590_v55, 256 }
 0x6ab   :  { %2613 = vbcast.lane.b32.xlu0 %v2611_v11, 256  ;;  %2606 = vbcast.lane.b32.xlu1 %v2604_v0, 256 }
 0x6af   :  { %2620 = vbcast.lane.b32.xlu0 %v2618_v49, 256  ;;  %2655 = vbcast.lane.b32.xlu1 %v2653_v20, 256 }
 0x6b3   :  { %2627 = vbcast.lane.b32.xlu0 %v2625_v56, 256  ;;  %2662 = vbcast.lane.b32.xlu1 %v2660_v50, 256 }
 0x6b7   :  { %2634 = vbcast.lane.b32.xlu0 %v2632_v41, 256  ;;  %2669 = vbcast.lane.b32.xlu1 %v2667_v30, 256 }
 0x6bb   :  { %2648 = vbcast.lane.b32.xlu0 %v2646_v29, 256  ;;  %2676 = vbcast.lane.b32.xlu1 %v2674_v28, 256 }
 0x6bf   :  { %2641 = vbcast.lane.b32.xlu0 %v2639_v19, 256  ;;  %2683 = vbcast.lane.b32.xlu1 %v2681_v9, 256 }
 0x6c3   :  { %2697 = vbcast.lane.b32.xlu0 %v2695_v14, 256  ;;  %2690 = vbcast.lane.b32.xlu1 %v2688_v8, 256 }
 0x719   :  { %v2600_v18 = vpop.permute.xlu0 %2599  ;;  %v2593_v57 = vpop.permute.xlu1 %2592 }
 0x71a   :  { %v6400_v32 = vsel %vm52_vm10, -1e+30, %v2600_v18  ;;  %v6404_v63 = vsel %vm52_vm10, -1e+30, %v2593_v57 }
 0x71b   :  { %2751 = vperm.xlu0 %5297, %v6400_v32   ;;  %2748 = vperm.xlu1 %5296, %v6404_v63  }
 0x71d   :  { %v2614_v34 = vpop.permute.xlu0 %2613  ;;  %v2607_v61 = vpop.permute.xlu1 %2606 }
 0x71e   :  { %v6410_v44 = vsel %vm52_vm10, -1e+30, %v2614_v34  ;;  %v6414_v15 = vsel %vm52_vm10, -1e+30, %v2607_v61 }
 0x71f   :  { %2757 = vperm.xlu0 %5297, %v6410_v44   ;;  %2754 = vperm.xlu1 %5296, %v6414_v15  }
 0x721   :  { %v2621_v46 = vpop.permute.xlu0 %2620  ;;  %v2656_v35 = vpop.permute.xlu1 %2655 }
 0x722   :  { %v6420_v5 = vsel %vm52_vm10, -1e+30, %v2621_v46  ;;  %v6424_v17 = vsel %vm53_vm11, -1e+30, %v2656_v35 }
 0x723   :  { %2760 = vperm.xlu0 %5297, %v6420_v5   ;;  %2775 = vperm.xlu1 %5296, %v6424_v17  }
 0x725   :  { %v2628_v53 = vpop.permute.xlu0 %2627  ;;  %v2663_v43 = vpop.permute.xlu1 %2662 }
 0x726   :  { %v6430_v25 = vsel %vm52_vm10, -1e+30, %v2628_v53  ;;  %v6434_v37 = vsel %vm53_vm11, -1e+30, %v2663_v43 }
 0x727   :  { %2763 = vperm.xlu0 %5297, %v6430_v25   ;;  %2778 = vperm.xlu1 %5296, %v6434_v37  }
 0x729   :  { %v2635_v22 = vpop.permute.xlu0 %2634  ;;  %v2670_v21 = vpop.permute.xlu1 %2669 }
 0x72a   :  { %v6440_v24 = vsel %vm52_vm10, -1e+30, %v2635_v22  ;;  %v6444_v31 = vsel %vm53_vm11, -1e+30, %v2670_v21 }
 0x72b   :  { %2766 = vperm.xlu0 %5297, %v6440_v24   ;;  %2781 = vperm.xlu1 %5296, %v6444_v31  }
 0x72d   :  { %v2649_v54 = vpop.permute.xlu0 %2648  ;;  %v2677_v4 = vpop.permute.xlu1 %2676 }
 0x72e   :  { %v6450_v58 = vsel %vm53_vm11, -1e+30, %v2649_v54  ;;  %v6454_v1 = vsel %vm53_vm11, -1e+30, %v2677_v4 }
 0x72f   :  { %2772 = vperm.xlu0 %5297, %v6450_v58   ;;  %2784 = vperm.xlu1 %5296, %v6454_v1  }
 0x731   :  { %v2642_v23 = vpop.permute.xlu0 %2641  ;;  %v2684_v6 = vpop.permute.xlu1 %2683 }
 0x732   :  { %v6460_v2 = vsel %vm52_vm10, -1e+30, %v2642_v23  ;;  %v6464_v62 = vsel %vm53_vm11, -1e+30, %v2684_v6 }
 0x733   :  { %2769 = vperm.xlu0 %5297, %v6460_v2   ;;  %2787 = vperm.xlu1 %5296, %v6464_v62  }
 0x735   :  { %v2698_v55 = vpop.permute.xlu0 %2697  ;;  %v2691_v12 = vpop.permute.xlu1 %2690 }
 0x736   :  { %v6470_v11 = vsel %vm53_vm11, -1e+30, %v2698_v55  ;;  %v6474_v0 = vsel %vm53_vm11, -1e+30, %v2691_v12 }
 0x737   :  { %2793 = vperm.xlu0 %5297, %v6470_v11   ;;  %2790 = vperm.xlu1 %5296, %v6474_v0  }
 0x796   :  { %v2752_v49 = vpop.permute.xlu0 %2751  ;;  %v2749_v20 = vpop.permute.xlu1 %2748 }
 0x797   :  { %v2802_v19 = vrot.slane %v2752_v49, %v5816_v36  ;;  %v2798_v9 = vrot.slane %v2749_v20, %v5816_v36 }
 0x799   :  { %v2859_v57 = vsel %vm589_vm12, %v2802_v19, %v2798_v9 }
 0x79a   :  { %v2758_v56 = vpop.permute.xlu0 %2757  ;;  %v2755_v50 = vpop.permute.xlu1 %2754 }
 0x79b   :  { %v2806_v14 = vrot.slane %v2755_v50, %v5816_v36  ;;  %v2810_v34 = vrot.slane %v2758_v56, %v5816_v36 }
 0x79d   :  { %v2860_v61 = vsel %vm591_vm13, %v2806_v14, %v2859_v57 }
 0x79e   :  { %v2761_v41 = vpop.permute.xlu0 %2760  ;;  %v2776_v30 = vpop.permute.xlu1 %2775  ;;  %v2861_v23 = vsel %vm593_vm14, %v2810_v34, %v2860_v61 }
 0x79f   :  { %v2814_v46 = vrot.slane %v2761_v41, %v5816_v36  ;;  %v2834_v43 = vrot.slane %v2776_v30, %v5816_v36 }
 0x7a1   :  { %v2862_v12 = vsel %vm595_vm15, %v2814_v46, %v2861_v23 }
 0x7a2   :  { %v2764_v29 = vpop.permute.xlu0 %2763  ;;  %v2779_v28 = vpop.permute.xlu1 %2778 }
 0x7a3   :  { %v2818_v22 = vrot.slane %v2764_v29, %v5816_v36  ;;  %v2838_v54 = vrot.slane %v2779_v28, %v5816_v36 }
 0x7a5   :  { %v2863_v50 = vsel %vm597_vm3, %v2818_v22, %v2862_v12 }
 0x7a6   :  { %v2767_v8 = vpop.permute.xlu0 %2766  ;;  %v2782_v18 = vpop.permute.xlu1 %2781 }
 0x7a7   :  { %v2822_v4 = vrot.slane %v2767_v8, %v5816_v36  ;;  %v2842_v6 = vrot.slane %v2782_v18, %v5816_v36 }
 0x7a9   :  { %v2864_v19 = vsel %vm599_vm4, %v2822_v4, %v2863_v50 }
 0x7aa   :  { %v2773_v35 = vpop.permute.xlu0 %2772  ;;  %v2785_v53 = vpop.permute.xlu1 %2784 }
 0x7ab   :  { %v2830_v21 = vrot.slane %v2773_v35, %v5816_v36  ;;  %v2846_v30 = vrot.slane %v2785_v53, %v5816_v36 }
 0x7ad   :  { %v2866_v55 = vsel %vm589_vm12, %v2834_v43, %v2830_v21 }
 0x7ae   :  { %v2867_v49 = vsel %vm591_vm13, %v2838_v54, %v2866_v55  ;;  %v2770_v20 = vpop.permute.xlu0 %2769  ;;  %v2788_v56 = vpop.permute.xlu1 %2787 }
 0x7af   :  { %v2868_v41 = vsel %vm593_vm14, %v2842_v6, %v2867_v49  ;;  %v2826_v29 = vrot.slane %v2770_v20, %v5816_v36  ;;  %v2850_v28 = vrot.slane %v2788_v56, %v5816_v36 }
 0x7b0   :  { %v2869_v9 = vsel %vm595_vm15, %v2846_v30, %v2868_v41 }
 0x7b1   :  { %v2865_v14 = vsel %vm601_vm5, %v2826_v29, %v2864_v19  ;;  %v2870_v46 = vsel %vm597_vm3, %v2850_v28, %v2869_v9 }
 0x7b2   :  { %v2794_v8 = vpop.permute.xlu0 %2793  ;;  %v2791_v18 = vpop.permute.xlu1 %2790  ;;  %v2875_v57 = vsel %vm612_vm6, %v2865_v14, -inf }
 0x7b3   :  { %v2858_v34 = vrot.slane %v2794_v8, %v5816_v36  ;;  %v2854_v61 = vrot.slane %v2791_v18, %v5816_v36  ;;  %2876 = vmax.xlane.f32.xlu1 %v2875_v57 }
 0x7b5   :  { %v2871_v35 = vsel %vm599_vm4, %v2854_v61, %v2870_v46 }
 0x7b6   :  { %v2872_v53 = vsel %vm601_vm5, %v2858_v34, %v2871_v35 }
 0x7b7   :  { %v2878_v43 = vsel %vm612_vm6, %v2872_v53, -inf }
 0x7b8   :  { %2879 = vmax.xlane.f32.xlu0 %v2878_v43 }
 0x83c   :  { %v2877_v22 = vpop.xlane.xlu1 %2876 }
 0x83d   :  { %v2886_v21 = vrot.slane %v2877_v22, %v5593_v26  ;;  %v2890_v54 = vrot.slane %v2877_v22, %v5596_v27  ;;  %v2894_v4 = vrot.slane %v2877_v22, %v5599_v33  ;;  %v2898_v23 = vrot.slane %v2877_v22, %v5604_v39 }
 0x83e   :  { %v2902_v6 = vrot.slane %v2877_v22, %v5612_v45  ;;  %v2906_v30 = vrot.slane %v2877_v22, %v5622_v51  ;;  %v2914_v35 = vrot.slane %v2877_v22, %v5617_v48 }
 0x83f   :  { %v2963_v55 = vsub.f32 %v6404_v63, %v2886_v21  ;;  %v2964_v12 = vsub.f32 %v6400_v32, %v2890_v54  ;;  %v2966_v49 = vsub.f32 %v6410_v44, %v2898_v23  ;;  %v2965_v20 = vsub.f32 %v6414_v15, %v2894_v4 }
 0x840   :  { %v2967_v29 = vsub.f32 %v6420_v5, %v2902_v6  ;;  %v2910_v44 = vrot.slane %v2877_v22, %v5607_v40  ;;  %v2968_v15 = vsub.f32 %v6430_v25, %v2906_v30 }
 0x841   :  { %v2979_v56 = vmul.f32 1.442695, %v2963_v55  ;;  %v2981_v50 = vmul.f32 1.442695, %v2964_v12  ;;  %v2880_v41 = vpop.xlane.xlu0 %2879  ;;  %v2985_v28 = vmul.f32 1.442695, %v2966_v49 }
 0x842   :  { %v2922_v19 = vrot.slane %v2880_v41, %v5596_v27  ;;  %v2983_v9 = vmul.f32 1.442695, %v2965_v20  ;;  %v2926_v63 = vrot.slane %v2880_v41, %v5599_v33  ;;  %v2987_v14 = vmul.f32 1.442695, %v2967_v29 }
 0x843   :  { %5375 = vpow2.f32 %v2979_v56  ;;  %v2930_v8 = vrot.slane %v2880_v41, %v5604_v39  ;;  %v2969_v57 = vsub.f32 %v6440_v24, %v2910_v44  ;;  %v2989_v34 = vmul.f32 1.442695, %v2968_v15 }
 0x844   :  { %5377 = vpow2.f32 %v2981_v50  ;;  %v2972_v32 = vsub.f32 %v6424_v17, %v2922_v19  ;;  %v2973_v5 = vsub.f32 %v6434_v37, %v2926_v63  ;;  %v2918_v61 = vrot.slane %v2880_v41, %v5593_v26 }
 0x845   :  { %5379 = vpow2.f32 %v2985_v28  ;;  %v2934_v17 = vrot.slane %v2880_v41, %v5612_v45  ;;  %v2974_v46 = vsub.f32 %v6444_v31, %v2930_v8  ;;  %v2991_v53 = vmul.f32 1.442695, %v2969_v57 }
 0x846   :  { %5381 = vpow2.f32 %v2983_v9  ;;  %v2997_v18 = vmul.f32 1.442695, %v2972_v32  ;;  %v2999_v25 = vmul.f32 1.442695, %v2973_v5  ;;  %v2971_v43 = vsub.f32 %v6450_v58, %v2918_v61 }
 0x847   :  { %5383 = vpow2.f32 %v2987_v14  ;;  %v2938_v24 = vrot.slane %v2880_v41, %v5622_v51  ;;  %v2975_v21 = vsub.f32 %v6454_v1, %v2934_v17  ;;  %v3001_v54 = vmul.f32 1.442695, %v2974_v46 }
 0x848   :  { %5385 = vpow2.f32 %v2997_v18  ;;  %v2970_v31 = vsub.f32 %v6460_v2, %v2914_v35  ;;  %v2946_v22 = vrot.slane %v2880_v41, %v5617_v48  ;;  %v2995_v58 = vmul.f32 1.442695, %v2971_v43 }
 0x849   :  { %5387 = vpow2.f32 %v2989_v34  ;;  %v2942_v6 = vrot.slane %v2880_v41, %v5607_v40  ;;  %v2976_v1 = vsub.f32 %v6464_v62, %v2938_v24  ;;  %v3003_v55 = vmul.f32 1.442695, %v2975_v21 }
 0x84a   :  { %5389 = vpow2.f32 %v2999_v25  ;;  %v2993_v49 = vmul.f32 1.442695, %v2970_v31  ;;  %v2978_v2 = vsub.f32 %v6470_v11, %v2946_v22 }
 0x84b   :  { %5391 = vpow2.f32 %v2991_v53  ;;  %v2977_v56 = vsub.f32 %v6474_v0, %v2942_v6  ;;  %v3005_v50 = vmul.f32 1.442695, %v2976_v1 }
 0x84c   :  { %5393 = vpow2.f32 %v3001_v54  ;;  %v3009_v62 = vmul.f32 1.442695, %v2978_v2 }
 0x84d   :  { %5395 = vpow2.f32 %v2995_v58  ;;  %v3007_v29 = vmul.f32 1.442695, %v2977_v56 }
 0x84e   :  { %5397 = vpow2.f32 %v3003_v55 }
 0x84f   :  { %5399 = vpow2.f32 %v2993_v49 }
 0x850   :  { %v6534_v37 = vpop.eup %5375  ;;  %5401 = vpow2.f32 %v3005_v50 }
 0x851   :  { %v6538_v4 = vpop.eup %5377  ;;  %3028 = vperm.xlu0 %5297, %v6534_v37   ;;  %5403 = vpow2.f32 %v3009_v62 }
 0x852   :  { %3031 = vperm.xlu1 %5296, %v6538_v4   ;;  %v6544_v23 = vpop.eup %5379  ;;  %5405 = vpow2.f32 %v3007_v29 }
 0x853   :  { %v6548_v12 = vpop.eup %5381 }
 0x854   :  { %v6553_v20 = vpop.eup %5383 }
 0x855   :  { %3037 = vperm.xlu0 %5297, %v6544_v23   ;;  %v6556_v41 = vpop.eup %5385 }
 0x856   :  { %3034 = vperm.xlu1 %5296, %v6548_v12   ;;  %v6560_v30 = vpop.eup %5387 }
 0x857   :  { %v6562_v11 = vpop.eup %5389 }
 0x858   :  { %v6566_v0 = vpop.eup %5391 }
 0x859   :  { %3040 = vperm.xlu0 %5297, %v6553_v20   ;;  %v6568_v28 = vpop.eup %5393 }
 0x85a   :  { %3055 = vperm.xlu1 %5296, %v6556_v41   ;;  %v6572_v19 = vpop.eup %5395 }
 0x85b   :  { %v6574_v9 = vpop.eup %5397 }
 0x85c   :  { %v6578_v63 = vpop.eup %5399 }
 0x85d   :  { %3043 = vperm.xlu0 %5297, %v6560_v30   ;;  %v6580_v32 = vpop.eup %5401 }
 0x85e   :  { %3058 = vperm.xlu1 %5296, %v6562_v11   ;;  %v6584_v44 = vpop.eup %5403 }
 0x85f   :  { %v6586_v15 = vpop.eup %5405 }
 0x861   :  { %3046 = vperm.xlu0 %5297, %v6566_v0  }
 0x862   :  { %3061 = vperm.xlu1 %5296, %v6568_v28  }
 0x865   :  { %3052 = vperm.xlu0 %5297, %v6572_v19  }
 0x866   :  { %3064 = vperm.xlu1 %5296, %v6574_v9  }
 0x869   :  { %3049 = vperm.xlu0 %5297, %v6578_v63  }
 0x86a   :  { %3067 = vperm.xlu1 %5296, %v6580_v32  }
 0x86d   :  { %3073 = vperm.xlu0 %5297, %v6584_v44  }
 0x86e   :  { %3070 = vperm.xlu1 %5296, %v6586_v15  }
 0x8cc   :  { %v3029_v14 = vpop.permute.xlu0 %3028 }
 0x8cd   :  { %v3032_v8 = vpop.permute.xlu1 %3031  ;;  %v3078_v25 = vrot.slane %v3029_v14, %v5816_v36 }
 0x8ce   :  { %v3082_v46 = vrot.slane %v3032_v8, %v5816_v36 }
 0x8d0   :  { %v3038_v5 = vpop.permute.xlu0 %3037  ;;  %v3139_v24 = vsel %vm589_vm12, %v3082_v46, %v3078_v25 }
 0x8d1   :  { %v3035_v18 = vpop.permute.xlu1 %3034  ;;  %v3090_v21 = vrot.slane %v3038_v5, %v5816_v36 }
 0x8d2   :  { %v3086_v35 = vrot.slane %v3035_v18, %v5816_v36 }
 0x8d4   :  { %v3041_v57 = vpop.permute.xlu0 %3040  ;;  %v3140_v54 = vsel %vm591_vm13, %v3086_v35, %v3139_v24 }
 0x8d5   :  { %v3056_v34 = vpop.permute.xlu1 %3055  ;;  %v3094_v31 = vrot.slane %v3041_v57, %v5816_v36  ;;  %v3141_v56 = vsel %vm593_vm14, %v3090_v21, %v3140_v54 }
 0x8d6   :  { %v3114_v58 = vrot.slane %v3056_v34, %v5816_v36 }
 0x8d7   :  { %v3142_v29 = vsel %vm595_vm15, %v3094_v31, %v3141_v56 }
 0x8d8   :  { %v3044_v61 = vpop.permute.xlu0 %3043 }
 0x8d9   :  { %v3059_v17 = vpop.permute.xlu1 %3058  ;;  %v3098_v6 = vrot.slane %v3044_v61, %v5816_v36 }
 0x8da   :  { %v3118_v49 = vrot.slane %v3059_v17, %v5816_v36 }
 0x8db   :  { %v3143_v5 = vsel %vm597_vm3, %v3098_v6, %v3142_v29 }
 0x8dc   :  { %v3047_v53 = vpop.permute.xlu0 %3046 }
 0x8dd   :  { %v3062_v43 = vpop.permute.xlu1 %3061  ;;  %v3102_v2 = vrot.slane %v3047_v53, %v5816_v36 }
 0x8de   :  { %v3122_v50 = vrot.slane %v3062_v43, %v5816_v36 }
 0x8df   :  { %v3144_v17 = vsel %vm599_vm4, %v3102_v2, %v3143_v5 }
 0x8e0   :  { %v3053_v22 = vpop.permute.xlu0 %3052 }
 0x8e1   :  { %v3065_v1 = vpop.permute.xlu1 %3064  ;;  %v3110_v55 = vrot.slane %v3053_v22, %v5816_v36 }
 0x8e2   :  { %v3126_v61 = vrot.slane %v3065_v1, %v5816_v36 }
 0x8e3   :  { %v3146_v62 = vsel %vm589_vm12, %v3114_v58, %v3110_v55 }
 0x8e4   :  { %v3147_v14 = vsel %vm591_vm13, %v3118_v49, %v3146_v62  ;;  %v3050_v8 = vpop.permute.xlu0 %3049 }
 0x8e5   :  { %v3068_v18 = vpop.permute.xlu1 %3067  ;;  %v3148_v57 = vsel %vm593_vm14, %v3122_v50, %v3147_v14  ;;  %v3106_v34 = vrot.slane %v3050_v8, %v5816_v36 }
 0x8e6   :  { %v3130_v46 = vrot.slane %v3068_v18, %v5816_v36  ;;  %v3149_v35 = vsel %vm595_vm15, %v3126_v61, %v3148_v57 }
 0x8e7   :  { %v3145_v25 = vsel %vm601_vm5, %v3106_v34, %v3144_v17 }
 0x8e8   :  { %v3074_v53 = vpop.permute.xlu0 %3073  ;;  %v3155_v43 = vsel %vm612_vm6, %v3145_v25, 0.0  ;;  %v3150_v31 = vsel %vm597_vm3, %v3130_v46, %v3149_v35 }
 0x8e9   :  { %v3071_v24 = vpop.permute.xlu1 %3070  ;;  %v3138_v21 = vrot.slane %v3074_v53, %v5816_v36  ;;  %3156 = vadd.xlane.f32.xlu1 %v3155_v43 }
 0x8ea   :  { %v3134_v54 = vrot.slane %v3071_v24, %v5816_v36 }
 0x8ec   :  { %v3151_v22 = vsel %vm599_vm4, %v3134_v54, %v3150_v31 }
 0x8ed   :  { %v3152_v58 = vsel %vm601_vm5, %v3138_v21, %v3151_v22 }
 0x8ee   :  { %v3158_v6 = vsel %vm612_vm6, %v3152_v58, 0.0 }
 0x8ef   :  { %3159 = vadd.xlane.f32.xlu0 %v3158_v6 }
 0x905   :  { %3262 = vrot.lane.b32.xlu0 %v6341_v38, %s5483_s23 }
 0x972   :  { %v3157_v1 = vpop.xlane.xlu1 %3156 }
 0x973   :  { %5407 = vrcp.f32 %v3157_v1 }
 0x978   :  { %v3160_v55 = vpop.xlane.xlu0 %3159 }
 0x979   :  { %5409 = vrcp.f32 %v3160_v55 }
 0x97c   :  { %v3263_v21 = vpop.permute.xlu0 %3262 }
 0x97d   :  { %v3265_v31 = vmul.f32 %v3263_v21, %v7180_v10 }
 0x980   :  { %v5408_v49 = vpop.eup %5407 }
 0x981   :  { %v3168_v2 = vrot.slane %v5408_v49, %v5593_v26  ;;  %v3176_v56 = vrot.slane %v5408_v49, %v5599_v33  ;;  %v3172_v29 = vrot.slane %v5408_v49, %v5596_v27  ;;  %v3180_v5 = vrot.slane %v5408_v49, %v5604_v39 }
 0x982   :  { %v3188_v17 = vrot.slane %v5408_v49, %v5622_v51  ;;  %v3192_v25 = vrot.slane %v5408_v49, %v5607_v40  ;;  %v3196_v24 = vrot.slane %v5408_v49, %v5617_v48 }
 0x983   :  { %v3245_v50 = vmul.f32 %v6534_v37, %v3168_v2  ;;  %v3247_v62 = vmul.f32 %v6548_v12, %v3176_v56  ;;  %v3246_v38 = vmul.f32 %v6538_v4, %v3172_v29  ;;  %v3248_v37 = vmul.f32 %v6544_v23, %v3180_v5 }
 0x984   :  { %v3184_v12 = vrot.slane %v5408_v49, %v5612_v45  ;;  %v3250_v23 = vmul.f32 %v6560_v30, %v3188_v17  ;;  %v3252_v54 = vmul.f32 %v6578_v63, %v3196_v24 }
 0x985   :  { %3276 = vperm.xlu1 %5296, %v3245_v50   ;;  %3282 = vperm.xlu0 %5297, %v3247_v62  }
 0x986   :  { %v5410_v14 = vpop.eup %5409  ;;  %v3249_v4 = vmul.f32 %v6553_v20, %v3184_v12  ;;  %v3251_v20 = vmul.f32 %v6566_v0, %v3192_v25 }
 0x987   :  { %v3204_v8 = vrot.slane %v5410_v14, %v5596_v27  ;;  %v3208_v57 = vrot.slane %v5410_v14, %v5599_v33  ;;  %v3212_v61 = vrot.slane %v5410_v14, %v5604_v39  ;;  %v3216_v46 = vrot.slane %v5410_v14, %v5612_v45 }
 0x988   :  { %v3220_v35 = vrot.slane %v5410_v14, %v5622_v51  ;;  %v3200_v53 = vrot.slane %v5410_v14, %v5593_v26  ;;  %v3224_v43 = vrot.slane %v5410_v14, %v5607_v40  ;;  %v3228_v0 = vrot.slane %v5410_v14, %v5617_v48 }
 0x989   :  { %3279 = vperm.xlu1 %5296, %v3246_v38   ;;  %v3254_v18 = vmul.f32 %v6556_v41, %v3204_v8  ;;  %v3255_v34 = vmul.f32 %v6562_v11, %v3208_v57  ;;  %v3256_v41 = vmul.f32 %v6568_v28, %v3212_v61  ;;  %v3257_v11 = vmul.f32 %v6574_v9, %v3216_v46 }
 0x98a   :  { %v3258_v28 = vmul.f32 %v6580_v32, %v3220_v35  ;;  %v3253_v30 = vmul.f32 %v6572_v19, %v3200_v53  ;;  %v3259_v9 = vmul.f32 %v6586_v15, %v3224_v43  ;;  %v3260_v32 = vmul.f32 %v6584_v44, %v3228_v0 }
 0x98b   :  { %3426 = vperm.xlu0 %5297, %v3254_v18   ;;  %v3266_v19 = vmul.f32 %v3263_v21, %v7177_v59 }
 0x98d   :  { %3285 = vperm.xlu1 %5296, %v3248_v37  }
 0x98f   :  { %3429 = vperm.xlu0 %5297, %v3255_v34  }
 0x991   :  { %3288 = vperm.xlu1 %5296, %v3249_v4  }
 0x993   :  { %3432 = vperm.xlu0 %5297, %v3256_v41  }
 0x995   :  { %3291 = vperm.xlu1 %5296, %v3250_v23  }
 0x997   :  { %3435 = vperm.xlu0 %5297, %v3257_v11  }
 0x999   :  { %3294 = vperm.xlu1 %5296, %v3251_v20  }
 0x99b   :  { %3438 = vperm.xlu0 %5297, %v3258_v28  }
 0x99d   :  { %3423 = vperm.xlu1 %5296, %v3253_v30  }
 0x99f   :  { %3441 = vperm.xlu0 %5297, %v3259_v9  }
 0x9a1   :  { %3297 = vperm.xlu1 %5296, %v3252_v54  }
 0x9a3   :  { %3339 = vrot.lane.b32.xlu0 %v3265_v31, %s5484_s24 }
 0x9a5   :  { %3444 = vperm.xlu1 %5296, %v3260_v32  }
 0x9a9   :  { %3486 = vrot.lane.b32.xlu1 %v3266_v19, %s5484_s24 }
 0xa00   :  { %v3277_v22 = vpop.permute.xlu1 %3276  ;;  %v3283_v15 = vpop.permute.xlu0 %3282 }
 0xa01   :  { %v3302_v44 = vrot.slane %v3277_v22, %v5816_v36  ;;  %v3310_v8 = vrot.slane %v3283_v15, %v5816_v36  ;;  %v3568_v22 = vmul.f32 %v6698_v60, %v7180_v10 }
 0xa04   :  { %v3280_v58 = vpop.permute.xlu1 %3279 }
 0xa05   :  { %v3306_v50 = vrot.slane %v3280_v58, %v5816_v36 }
 0xa06   :  { %v3427_v6 = vpop.permute.xlu0 %3426 }
 0xa07   :  { %v3331_v14 = vsel %vm589_vm12, %v3306_v50, %v3302_v44  ;;  %v3453_v57 = vrot.slane %v3427_v6, %v5816_v36  ;;  %v3569_v6 = vmul.f32 %v6698_v60, %v7177_v59 }
 0xa08   :  { %v3286_v1 = vpop.permute.xlu1 %3285  ;;  %v3332_v34 = vsel %vm591_vm13, %v3310_v8, %v3331_v14 }
 0xa09   :  { %v3314_v38 = vrot.slane %v3286_v1, %v5816_v36 }
 0xa0a   :  { %v3430_v63 = vpop.permute.xlu0 %3429 }
 0xa0b   :  { %v3457_v61 = vrot.slane %v3430_v63, %v5816_v36  ;;  %v3333_v41 = vsel %vm593_vm14, %v3314_v38, %v3332_v34 }
 0xa0c   :  { %v3289_v55 = vpop.permute.xlu1 %3288 }
 0xa0d   :  { %v3318_v5 = vrot.slane %v3289_v55, %v5816_v36 }
 0xa0e   :  { %v3433_v49 = vpop.permute.xlu0 %3432 }
 0xa0f   :  { %v3461_v46 = vrot.slane %v3433_v49, %v5816_v36  ;;  %v3334_v25 = vsel %vm595_vm15, %v3318_v5, %v3333_v41 }
 0xa10   :  { %v3292_v2 = vpop.permute.xlu1 %3291 }
 0xa11   :  { %v3322_v37 = vrot.slane %v3292_v2, %v5816_v36 }
 0xa12   :  { %v3436_v56 = vpop.permute.xlu0 %3435 }
 0xa13   :  { %v3465_v11 = vrot.slane %v3436_v56, %v5816_v36  ;;  %v3335_v53 = vsel %vm597_vm3, %v3322_v37, %v3334_v25 }
 0xa14   :  { %v3295_v62 = vpop.permute.xlu1 %3294 }
 0xa15   :  { %v3326_v4 = vrot.slane %v3295_v62, %v5816_v36 }
 0xa16   :  { %v3439_v29 = vpop.permute.xlu0 %3438 }
 0xa17   :  { %v3336_v30 = vsel %vm599_vm4, %v3326_v4, %v3335_v53  ;;  %v3469_v21 = vrot.slane %v3439_v29, %v5816_v36 }
 0xa18   :  { %v3424_v18 = vpop.permute.xlu1 %3423 }
 0xa19   :  { %v3449_v12 = vrot.slane %v3424_v18, %v5816_v36 }
 0xa1a   :  { %v3442_v17 = vpop.permute.xlu0 %3441 }
 0xa1b   :  { %v3478_v23 = vsel %vm589_vm12, %v3453_v57, %v3449_v12  ;;  %v3473_v19 = vrot.slane %v3442_v17, %v5816_v36 }
 0xa1c   :  { %v3479_v35 = vsel %vm591_vm13, %v3457_v61, %v3478_v23  ;;  %v3298_v20 = vpop.permute.xlu1 %3297 }
 0xa1d   :  { %v3480_v28 = vsel %vm593_vm14, %v3461_v46, %v3479_v35  ;;  %v3330_v43 = vrot.slane %v3298_v20, %v5816_v36 }
 0xa1e   :  { %v3481_v24 = vsel %vm595_vm15, %v3465_v11, %v3480_v28  ;;  %v3340_v9 = vpop.permute.xlu0 %3339 }
 0xa1f   :  { %v3337_v54 = vsel %vm601_vm5, %v3330_v43, %v3336_v30  ;;  %5225 = vmatpush3.msra.mxu1 %v3340_v9  ;;  %v3482_v31 = vsel %vm597_vm3, %v3469_v21, %v3481_v24 }
 0xa20   :  { %5234 = vmatprep.subr.mxu1 %v7182_v47  ;;  %v3445_v0 = vpop.permute.xlu1 %3444  ;;  %5227 = vmatmul.mubr.msk.f32.vlgmr.msra.gmra.mxu1 %vm612_vm6, %v3337_v54  ;;  %v3483_v15 = vsel %vm599_vm4, %v3473_v19, %v3482_v31 }
 0xa21   :  { %v3477_v32 = vrot.slane %v3445_v0, %v5816_v36  ;;  %5235 = vmatpush3.xpose.msk.msra.mxu1 %vm155_vm7, %v7184_v52  ;;  %5236 = vmatprep.mubr.msk.f32.mxu1 %vm5480_vm2, %v7182_v47 }
 0xa22   :  { %5244 = vmatprep.subr.mxu1 %v7182_v47 }
 0xa23   :  { %v3484_v52 = vsel %vm601_vm5, %v3477_v32, %v3483_v15 }
 0xa24   :  { %v3487_v58 = vpop.permute.xlu1 %3486  ;;  %5237 = vmatmul.mubr.msk.f32.vlgmr.msra.gmra.mxu1 %vm155_vm7, %v3568_v22 }
 0xa25   :  { %5230 = vmatpush3.msra.mxu0 %v3487_v58  ;;  %5246 = vmatprep.mubr.msk.f32.mxu1 %vm5480_vm2, %v7182_v47 }
 0xa26   :  { %5232 = vmatmul.mubr.msk.f32.vlgmr.msra.gmra.mxu0 %vm612_vm6, %v3484_v52  ;;  %5239 = vmatprep.subr.mxu0 %v7182_v47 }
 0xa27   :  { %5240 = vmatpush3.xpose.msk.msra.mxu0 %vm155_vm7, %v7183_v42  ;;  %5241 = vmatprep.mubr.msk.f32.mxu0 %vm5480_vm2, %v7182_v47 }
 0xa28   :  { %5249 = vmatprep.subr.mxu0 %v7182_v47 }
 0xa2a   :  { %5242 = vmatmul.mubr.msk.f32.vlgmr.msra.gmra.mxu0 %vm155_vm7, %v3569_v6 }
 0xa2b   :  { %5251 = vmatprep.mubr.msk.f32.mxu0 %vm5480_vm2, %v7182_v47  ;;  %vm4702_vm2 = vcmask 1043456  }
 0xae0   :  { %v3410_v1 = vpop.f32.mrf.mxu1 }
 0xae1   :  { %v6722_v63 = vadd.f32 %v3410_v1, %v6380_v16 }
 0xae2   :  { %v5228_v55 = vpop.f32.mrf.mxu1 }
 0xae4   :  { %v3639_v49 = vpop.f32.mrf.mxu1 }
 0xae5   :  { %v3716_v42 = vmul.f32 0.57735026, %v3639_v49 }
 0xae6   :  { %v3557_v2 = vpop.f32.mrf.mxu0  ;;  %v5238_v56 = vpop.f32.mrf.mxu1 }
 0xae7   :  { %v6725_v50 = vadd.f32 %v3557_v2, %v6378_v3  ;;  %v3730_v62 = vrot.slane %v3716_v42, %v5596_v27  ;;  %v3723_v44 = vrot.slane %v3716_v42, %v5593_v26  ;;  %v3744_v16 = vrot.slane %v3716_v42, %v5604_v39 }
 0xae8   :  { %v5233_v29 = vpop.f32.mrf.mxu0  ;;  %v3737_v38 = vrot.slane %v3716_v42, %v5599_v33  ;;  %v3751_v5 = vrot.slane %v3716_v42, %v5612_v45  ;;  %v3758_v18 = vrot.slane %v3716_v42, %v5622_v51  ;;  %v3765_v37 = vrot.slane %v3716_v42, %v5607_v40 }
 0xae9   :  { %3732 = vbcast.lane.b32.xlu1 %v3730_v62, 256  ;;  %3725 = vbcast.lane.b32.xlu0 %v3723_v44, 256  ;;  %v3772_v4 = vrot.slane %v3716_v42, %v5617_v48 }
 0xaea   :  { %v3712_v47 = vpop.f32.mrf.mxu0 }
 0xaeb   :  { %v3717_v14 = vmul.f32 0.57735026, %v3712_v47 }
 0xaec   :  { %v5243_v8 = vpop.f32.mrf.mxu0 }
 0xaed   :  { %3746 = vbcast.lane.b32.xlu1 %v3744_v16, 256  ;;  %3739 = vbcast.lane.b32.xlu0 %v3737_v38, 256  ;;  %v3786_v3 = vrot.slane %v3717_v14, %v5596_v27  ;;  %v3793_v57 = vrot.slane %v3717_v14, %v5599_v33  ;;  %v3800_v12 = vrot.slane %v3717_v14, %v5604_v39 }
 0xaee   :  { %v3779_v34 = vrot.slane %v3717_v14, %v5593_v26  ;;  %v3807_v61 = vrot.slane %v3717_v14, %v5612_v45  ;;  %v3814_v17 = vrot.slane %v3717_v14, %v5622_v51  ;;  %v3828_v41 = vrot.slane %v3717_v14, %v5617_v48 }
 0xaef   :  { %v3821_v46 = vrot.slane %v3717_v14, %v5607_v40 }
 0xaf1   :  { %3753 = vbcast.lane.b32.xlu1 %v3751_v5, 256  ;;  %3788 = vbcast.lane.b32.xlu0 %v3786_v3, 256 }
 0xaf5   :  { %3760 = vbcast.lane.b32.xlu1 %v3758_v18, 256  ;;  %3795 = vbcast.lane.b32.xlu0 %v3793_v57, 256 }
 0xaf9   :  { %3767 = vbcast.lane.b32.xlu1 %v3765_v37, 256  ;;  %3802 = vbcast.lane.b32.xlu0 %v3800_v12, 256 }
 0xafd   :  { %3781 = vbcast.lane.b32.xlu1 %v3779_v34, 256  ;;  %3809 = vbcast.lane.b32.xlu0 %v3807_v61, 256 }
 0xb01   :  { %3774 = vbcast.lane.b32.xlu1 %v3772_v4, 256  ;;  %3816 = vbcast.lane.b32.xlu0 %v3814_v17, 256 }
 0xb05   :  { %3830 = vbcast.lane.b32.xlu1 %v3828_v41, 256  ;;  %3823 = vbcast.lane.b32.xlu0 %v3821_v46, 256 }
 0xb5b   :  { %v3733_v23 = vpop.permute.xlu1 %3732  ;;  %v3726_v25 = vpop.permute.xlu0 %3725 }
 0xb5c   :  { %v6745_v11 = vsel %vm52_vm10, -1e+30, %v3733_v23  ;;  %v6749_v35 = vsel %vm52_vm10, -1e+30, %v3726_v25 }
 0xb5d   :  { %3884 = vperm.xlu1 %5296, %v6745_v11   ;;  %3881 = vperm.xlu0 %5297, %v6749_v35  }
 0xb5f   :  { %v3747_v20 = vpop.permute.xlu1 %3746  ;;  %v3740_v53 = vpop.permute.xlu0 %3739 }
 0xb60   :  { %v6755_v28 = vsel %vm52_vm10, -1e+30, %v3747_v20  ;;  %v6759_v43 = vsel %vm52_vm10, -1e+30, %v3740_v53 }
 0xb61   :  { %3890 = vperm.xlu1 %5296, %v6755_v28   ;;  %3887 = vperm.xlu0 %5297, %v6759_v43  }
 0xb63   :  { %v3754_v30 = vpop.permute.xlu1 %3753  ;;  %v3789_v24 = vpop.permute.xlu0 %3788 }
 0xb64   :  { %v6765_v9 = vsel %vm52_vm10, -1e+30, %v3754_v30  ;;  %v6769_v21 = vsel %vm53_vm11, -1e+30, %v3789_v24 }
 0xb65   :  { %3893 = vperm.xlu1 %5296, %v6765_v9   ;;  %3908 = vperm.xlu0 %5297, %v6769_v21  }
 0xb67   :  { %v3761_v54 = vpop.permute.xlu1 %3760  ;;  %v3796_v0 = vpop.permute.xlu0 %3795 }
 0xb68   :  { %v6775_v31 = vsel %vm52_vm10, -1e+30, %v3761_v54  ;;  %v6779_v32 = vsel %vm53_vm11, -1e+30, %v3796_v0 }
 0xb69   :  { %3896 = vperm.xlu1 %5296, %v6775_v31   ;;  %3911 = vperm.xlu0 %5297, %v6779_v32  }
 0xb6b   :  { %v3768_v19 = vpop.permute.xlu1 %3767  ;;  %v3803_v22 = vpop.permute.xlu0 %3802 }
 0xb6c   :  { %v6785_v15 = vsel %vm52_vm10, -1e+30, %v3768_v19  ;;  %v6789_v58 = vsel %vm53_vm11, -1e+30, %v3803_v22 }
 0xb6d   :  { %3899 = vperm.xlu1 %5296, %v6785_v15   ;;  %3914 = vperm.xlu0 %5297, %v6789_v58  }
 0xb6f   :  { %v3782_v52 = vpop.permute.xlu1 %3781  ;;  %v3810_v6 = vpop.permute.xlu0 %3809 }
 0xb70   :  { %v6795_v1 = vsel %vm53_vm11, -1e+30, %v3782_v52  ;;  %v6799_v55 = vsel %vm53_vm11, -1e+30, %v3810_v6 }
 0xb71   :  { %3905 = vperm.xlu1 %5296, %v6795_v1   ;;  %3917 = vperm.xlu0 %5297, %v6799_v55  }
 0xb73   :  { %v3775_v49 = vpop.permute.xlu1 %3774  ;;  %v3817_v42 = vpop.permute.xlu0 %3816 }
 0xb74   :  { %v6805_v2 = vsel %vm52_vm10, -1e+30, %v3775_v49  ;;  %v6809_v56 = vsel %vm53_vm11, -1e+30, %v3817_v42 }
 0xb75   :  { %3902 = vperm.xlu1 %5296, %v6805_v2   ;;  %3920 = vperm.xlu0 %5297, %v6809_v56  }
 0xb77   :  { %v3831_v62 = vpop.permute.xlu1 %3830  ;;  %v3824_v44 = vpop.permute.xlu0 %3823 }
 0xb78   :  { %v6815_v29 = vsel %vm53_vm11, -1e+30, %v3831_v62  ;;  %v6819_v47 = vsel %vm53_vm11, -1e+30, %v3824_v44  ;;  %vm4918_vm11 = vcmask 523264  }
 0xb79   :  { %3926 = vperm.xlu1 %5296, %v6815_v29   ;;  %3923 = vperm.xlu0 %5297, %v6819_v47  }
 0xbd8   :  { %v3885_v13 = vpop.permute.xlu1 %3884  ;;  %v3882_v14 = vpop.permute.xlu0 %3881 }
 0xbd9   :  { %v3935_v57 = vrot.slane %v3885_v13, %v5816_v36  ;;  %v3931_v37 = vrot.slane %v3882_v14, %v5816_v36 }
 0xbdb   :  { %v3992_v61 = vsel %vm589_vm12, %v3935_v57, %v3931_v37 }
 0xbdc   :  { %v3891_v16 = vpop.permute.xlu1 %3890  ;;  %v3888_v38 = vpop.permute.xlu0 %3887 }
 0xbdd   :  { %v3939_v7 = vrot.slane %v3888_v38, %v5816_v36  ;;  %v3943_v4 = vrot.slane %v3891_v16, %v5816_v36 }
 0xbdf   :  { %v3993_v17 = vsel %vm591_vm13, %v3939_v7, %v3992_v61 }
 0xbe0   :  { %v3894_v8 = vpop.permute.xlu1 %3893  ;;  %v3909_v5 = vpop.permute.xlu0 %3908  ;;  %v3994_v54 = vsel %vm593_vm14, %v3943_v4, %v3993_v17 }
 0xbe1   :  { %v3947_v41 = vrot.slane %v3894_v8, %v5816_v36  ;;  %v3967_v25 = vrot.slane %v3909_v5, %v5816_v36 }
 0xbe3   :  { %v3995_v22 = vsel %vm595_vm15, %v3947_v41, %v3994_v54 }
 0xbe4   :  { %v3897_v3 = vpop.permute.xlu1 %3896  ;;  %v3912_v18 = vpop.permute.xlu0 %3911 }
 0xbe5   :  { %v3951_v20 = vrot.slane %v3897_v3, %v5816_v36  ;;  %v3971_v30 = vrot.slane %v3912_v18, %v5816_v36 }
 0xbe7   :  { %v3996_v42 = vsel %vm597_vm3, %v3951_v20, %v3995_v22 }
 0xbe8   :  { %v3900_v12 = vpop.permute.xlu1 %3899  ;;  %v3915_v34 = vpop.permute.xlu0 %3914 }
 0xbe9   :  { %v3955_v24 = vrot.slane %v3900_v12, %v5816_v36  ;;  %v3975_v0 = vrot.slane %v3915_v34, %v5816_v36 }
 0xbeb   :  { %v3997_v16 = vsel %vm599_vm4, %v3955_v24, %v3996_v42 }
 0xbec   :  { %v3906_v46 = vpop.permute.xlu1 %3905  ;;  %v3918_v23 = vpop.permute.xlu0 %3917 }
 0xbed   :  { %v3963_v53 = vrot.slane %v3906_v46, %v5816_v36  ;;  %v3979_v44 = vrot.slane %v3918_v23, %v5816_v36 }
 0xbef   :  { %v3999_v19 = vsel %vm589_vm12, %v3967_v25, %v3963_v53 }
 0xbf0   :  { %v4000_v52 = vsel %vm591_vm13, %v3971_v30, %v3999_v19  ;;  %v3903_v6 = vpop.permute.xlu1 %3902  ;;  %v3921_v49 = vpop.permute.xlu0 %3920 }
 0xbf1   :  { %v4001_v62 = vsel %vm593_vm14, %v3975_v0, %v4000_v52  ;;  %v3959_v13 = vrot.slane %v3903_v6, %v5816_v36  ;;  %v3983_v14 = vrot.slane %v3921_v49, %v5816_v36 }
 0xbf2   :  { %v4002_v38 = vsel %vm595_vm15, %v3979_v44, %v4001_v62 }
 0xbf3   :  { %v3998_v8 = vsel %vm601_vm5, %v3959_v13, %v3997_v16  ;;  %v4003_v7 = vsel %vm597_vm3, %v3983_v14, %v4002_v38 }
 0xbf4   :  { %v3927_v5 = vpop.permute.xlu1 %3926  ;;  %v3924_v3 = vpop.permute.xlu0 %3923  ;;  %v4008_v18 = vsel %vm612_vm6, %v3998_v8, -inf }
 0xbf5   :  { %v3991_v57 = vrot.slane %v3927_v5, %v5816_v36  ;;  %v3987_v37 = vrot.slane %v3924_v3, %v5816_v36  ;;  %4009 = vmax.xlane.f32.xlu0 %v4008_v18 }
 0xbf7   :  { %v4004_v12 = vsel %vm599_vm4, %v3987_v37, %v4003_v7 }
 0xbf8   :  { %v4005_v34 = vsel %vm601_vm5, %v3991_v57, %v4004_v12 }
 0xbf9   :  { %v4011_v61 = vsel %vm612_vm6, %v4005_v34, -inf }
 0xbfa   :  { %4012 = vmax.xlane.f32.xlu1 %v4011_v61 }
 0xc7e   :  { %v4010_v4 = vpop.xlane.xlu0 %4009 }
 0xc7f   :  { %v4019_v17 = vrot.slane %v4010_v4, %v5593_v26  ;;  %v4023_v41 = vrot.slane %v4010_v4, %v5596_v27  ;;  %v4027_v46 = vrot.slane %v4010_v4, %v5599_v33  ;;  %v4031_v23 = vrot.slane %v4010_v4, %v5604_v39 }
 0xc80   :  { %v4035_v25 = vrot.slane %v4010_v4, %v5612_v45  ;;  %v4039_v22 = vrot.slane %v4010_v4, %v5622_v51  ;;  %v4047_v5 = vrot.slane %v4010_v4, %v5617_v48 }
 0xc81   :  { %v4096_v20 = vsub.f32 %v6749_v35, %v4019_v17  ;;  %v4097_v53 = vsub.f32 %v6745_v11, %v4023_v41  ;;  %v4098_v30 = vsub.f32 %v6759_v43, %v4027_v46  ;;  %v4099_v24 = vsub.f32 %v6755_v28, %v4031_v23 }
 0xc82   :  { %v4100_v52 = vsub.f32 %v6765_v9, %v4035_v25  ;;  %v4043_v43 = vrot.slane %v4010_v4, %v5607_v40  ;;  %v4101_v28 = vsub.f32 %v6775_v31, %v4039_v22 }
 0xc83   :  { %v4112_v54 = vmul.f32 1.442695, %v4096_v20  ;;  %v4114_v0 = vmul.f32 1.442695, %v4097_v53  ;;  %v4013_v19 = vpop.xlane.xlu1 %4012  ;;  %v4116_v6 = vmul.f32 1.442695, %v4098_v30 }
 0xc84   :  { %v4055_v49 = vrot.slane %v4013_v19, %v5596_v27  ;;  %v4118_v42 = vmul.f32 1.442695, %v4099_v24  ;;  %v4059_v35 = vrot.slane %v4013_v19, %v5599_v33  ;;  %v4120_v62 = vmul.f32 1.442695, %v4100_v52 }
 0xc85   :  { %5411 = vpow2.f32 %v4112_v54  ;;  %v4063_v44 = vrot.slane %v4013_v19, %v5604_v39  ;;  %v4102_v14 = vsub.f32 %v6785_v15, %v4043_v43  ;;  %v4122_v16 = vmul.f32 1.442695, %v4101_v28 }
 0xc86   :  { %5413 = vpow2.f32 %v4114_v0  ;;  %v4105_v11 = vsub.f32 %v6769_v21, %v4055_v49  ;;  %v4106_v9 = vsub.f32 %v6779_v32, %v4059_v35  ;;  %v4051_v38 = vrot.slane %v4013_v19, %v5593_v26 }
 0xc87   :  { %5415 = vpow2.f32 %v4116_v6  ;;  %v4067_v21 = vrot.slane %v4013_v19, %v5612_v45  ;;  %v4107_v8 = vsub.f32 %v6789_v58, %v4063_v44  ;;  %v4124_v3 = vmul.f32 1.442695, %v4102_v14 }
 0xc88   :  { %5417 = vpow2.f32 %v4118_v42  ;;  %v4130_v13 = vmul.f32 1.442695, %v4105_v11  ;;  %v4132_v31 = vmul.f32 1.442695, %v4106_v9  ;;  %v4104_v18 = vsub.f32 %v6795_v1, %v4051_v38 }
 0xc89   :  { %5419 = vpow2.f32 %v4120_v62  ;;  %v4071_v15 = vrot.slane %v4013_v19, %v5622_v51  ;;  %v4108_v57 = vsub.f32 %v6799_v55, %v4067_v21  ;;  %v4134_v37 = vmul.f32 1.442695, %v4107_v8 }
 0xc8a   :  { %5421 = vpow2.f32 %v4130_v13  ;;  %v4103_v58 = vsub.f32 %v6805_v2, %v4047_v5  ;;  %v4075_v12 = vrot.slane %v4013_v19, %v5607_v40  ;;  %v4128_v1 = vmul.f32 1.442695, %v4104_v18 }
 0xc8b   :  { %5423 = vpow2.f32 %v4122_v16  ;;  %v4079_v61 = vrot.slane %v4013_v19, %v5617_v48  ;;  %v4109_v55 = vsub.f32 %v6809_v56, %v4071_v15  ;;  %v4136_v4 = vmul.f32 1.442695, %v4108_v57 }
 0xc8c   :  { %5425 = vpow2.f32 %v4132_v31  ;;  %v4126_v41 = vmul.f32 1.442695, %v4103_v58  ;;  %v4110_v2 = vsub.f32 %v6819_v47, %v4075_v12 }
 0xc8d   :  { %5427 = vpow2.f32 %v4124_v3  ;;  %v4111_v23 = vsub.f32 %v6815_v29, %v4079_v61  ;;  %v4138_v25 = vmul.f32 1.442695, %v4109_v55 }
 0xc8e   :  { %5429 = vpow2.f32 %v4134_v37  ;;  %v4140_v56 = vmul.f32 1.442695, %v4110_v2 }
 0xc8f   :  { %5431 = vpow2.f32 %v4128_v1  ;;  %v4142_v30 = vmul.f32 1.442695, %v4111_v23 }
 0xc90   :  { %5433 = vpow2.f32 %v4136_v4 }
 0xc91   :  { %5435 = vpow2.f32 %v4126_v41 }
 0xc92   :  { %v6879_v32 = vpop.eup %5411  ;;  %5437 = vpow2.f32 %v4138_v25 }
 0xc93   :  { %v6883_v7 = vpop.eup %5413  ;;  %4161 = vperm.xlu0 %5297, %v6879_v32   ;;  %5439 = vpow2.f32 %v4140_v56 }
 0xc94   :  { %4164 = vperm.xlu1 %5296, %v6883_v7   ;;  %v6889_v34 = vpop.eup %5415  ;;  %5441 = vpow2.f32 %v4142_v30 }
 0xc95   :  { %v6893_v17 = vpop.eup %5417 }
 0xc96   :  { %v6898_v46 = vpop.eup %5419 }
 0xc97   :  { %4167 = vperm.xlu0 %5297, %v6889_v34   ;;  %v6901_v20 = vpop.eup %5421 }
 0xc98   :  { %4170 = vperm.xlu1 %5296, %v6893_v17   ;;  %v6905_v53 = vpop.eup %5423 }
 0xc99   :  { %v6907_v47 = vpop.eup %5425 }
 0xc9a   :  { %v6911_v29 = vpop.eup %5427 }
 0xc9b   :  { %4188 = vperm.xlu0 %5297, %v6901_v20   ;;  %v6913_v24 = vpop.eup %5429 }
 0xc9c   :  { %4173 = vperm.xlu1 %5296, %v6898_v46   ;;  %v6917_v54 = vpop.eup %5431 }
 0xc9d   :  { %v6919_v0 = vpop.eup %5433 }
 0xc9e   :  { %v6923_v19 = vpop.eup %5435 }
 0xc9f   :  { %4191 = vperm.xlu0 %5297, %v6907_v47   ;;  %v6925_v22 = vpop.eup %5437 }
 0xca0   :  { %4176 = vperm.xlu1 %5296, %v6905_v53   ;;  %v6929_v52 = vpop.eup %5439 }
 0xca1   :  { %v6931_v6 = vpop.eup %5441 }
 0xca3   :  { %4194 = vperm.xlu0 %5297, %v6913_v24  }
 0xca4   :  { %4179 = vperm.xlu1 %5296, %v6911_v29  }
 0xca7   :  { %4197 = vperm.xlu0 %5297, %v6919_v0  }
 0xca8   :  { %4185 = vperm.xlu1 %5296, %v6917_v54  }
 0xcab   :  { %4200 = vperm.xlu0 %5297, %v6925_v22  }
 0xcac   :  { %4182 = vperm.xlu1 %5296, %v6923_v19  }
 0xcaf   :  { %4203 = vperm.xlu0 %5297, %v6929_v52  }
 0xcb0   :  { %4206 = vperm.xlu1 %5296, %v6931_v6  }
 0xd0e   :  { %v4162_v49 = vpop.permute.xlu0 %4161 }
 0xd0f   :  { %v4165_v42 = vpop.permute.xlu1 %4164  ;;  %v4211_v13 = vrot.slane %v4162_v49, %v5816_v36 }
 0xd10   :  { %v4215_v9 = vrot.slane %v4165_v42, %v5816_v36 }
 0xd12   :  { %v4168_v35 = vpop.permute.xlu0 %4167  ;;  %v4272_v21 = vsel %vm589_vm12, %v4215_v9, %v4211_v13 }
 0xd13   :  { %v4171_v11 = vpop.permute.xlu1 %4170  ;;  %v4219_v14 = vrot.slane %v4168_v35, %v5816_v36 }
 0xd14   :  { %v4223_v8 = vrot.slane %v4171_v11, %v5816_v36 }
 0xd15   :  { %v4273_v31 = vsel %vm591_vm13, %v4219_v14, %v4272_v21 }
 0xd16   :  { %v4189_v28 = vpop.permute.xlu0 %4188  ;;  %v4274_v1 = vsel %vm593_vm14, %v4223_v8, %v4273_v31 }
 0xd17   :  { %v4174_v43 = vpop.permute.xlu1 %4173  ;;  %v4247_v15 = vrot.slane %v4189_v28, %v5816_v36 }
 0xd18   :  { %v4227_v5 = vrot.slane %v4174_v43, %v5816_v36 }
 0xd1a   :  { %v4192_v44 = vpop.permute.xlu0 %4191  ;;  %v4275_v4 = vsel %vm595_vm15, %v4227_v5, %v4274_v1 }
 0xd1b   :  { %v4177_v62 = vpop.permute.xlu1 %4176  ;;  %v4251_v58 = vrot.slane %v4192_v44, %v5816_v36 }
 0xd1c   :  { %v4231_v57 = vrot.slane %v4177_v62, %v5816_v36 }
 0xd1e   :  { %v4195_v38 = vpop.permute.xlu0 %4194  ;;  %v4276_v25 = vsel %vm597_vm3, %v4231_v57, %v4275_v4 }
 0xd1f   :  { %v4180_v16 = vpop.permute.xlu1 %4179  ;;  %v4255_v61 = vrot.slane %v4195_v38, %v5816_v36 }
 0xd20   :  { %v4235_v12 = vrot.slane %v4180_v16, %v5816_v36 }
 0xd22   :  { %v4198_v18 = vpop.permute.xlu0 %4197  ;;  %v4277_v35 = vsel %vm599_vm4, %v4235_v12, %v4276_v25 }
 0xd23   :  { %v4186_v3 = vpop.permute.xlu1 %4185  ;;  %v4259_v30 = vrot.slane %v4198_v18, %v5816_v36 }
 0xd24   :  { %v4243_v37 = vrot.slane %v4186_v3, %v5816_v36 }
 0xd26   :  { %v4279_v55 = vsel %vm589_vm12, %v4247_v15, %v4243_v37  ;;  %v4201_v23 = vpop.permute.xlu0 %4200 }
 0xd27   :  { %v4280_v41 = vsel %vm591_vm13, %v4251_v58, %v4279_v55  ;;  %v4183_v2 = vpop.permute.xlu1 %4182  ;;  %v4263_v42 = vrot.slane %v4201_v23, %v5816_v36 }
 0xd28   :  { %v4281_v56 = vsel %vm593_vm14, %v4255_v61, %v4280_v41  ;;  %v4239_v49 = vrot.slane %v4183_v2, %v5816_v36 }
 0xd29   :  { %v4282_v11 = vsel %vm595_vm15, %v4259_v30, %v4281_v56 }
 0xd2a   :  { %v4278_v43 = vsel %vm601_vm5, %v4239_v49, %v4277_v35  ;;  %v4204_v62 = vpop.permute.xlu0 %4203  ;;  %v4283_v14 = vsel %vm597_vm3, %v4263_v42, %v4282_v11 }
 0xd2b   :  { %v4207_v28 = vpop.permute.xlu1 %4206  ;;  %v4288_v44 = vsel %vm612_vm6, %v4278_v43, 0.0  ;;  %v4267_v13 = vrot.slane %v4204_v62, %v5816_v36 }
 0xd2c   :  { %v4271_v9 = vrot.slane %v4207_v28, %v5816_v36  ;;  %4289 = vadd.xlane.f32.xlu0 %v4288_v44 }
 0xd2d   :  { %v4284_v16 = vsel %vm599_vm4, %v4267_v13, %v4283_v14 }
 0xd2e   :  { %v4285_v38 = vsel %vm601_vm5, %v4271_v9, %v4284_v16 }
 0xd2f   :  { %v4291_v21 = vsel %vm612_vm6, %v4285_v38, 0.0 }
 0xd30   :  { %4292 = vadd.xlane.f32.xlu1 %v4291_v21 }
 0xd42   :  { %4395 = vrot.lane.b32.xlu0 %v6698_v60, %s5483_s23 }
 0xdb5   :  { %v4290_v8 = vpop.xlane.xlu0 %4289 }
 0xdb6   :  { %5443 = vrcp.f32 %v4290_v8 }
 0xdb9   :  { %v4293_v31 = vpop.xlane.xlu1 %4292  ;;  %v4396_v56 = vpop.permute.xlu0 %4395 }
 0xdba   :  { %5445 = vrcp.f32 %v4293_v31  ;;  %v4399_v30 = vmul.f32 %v4396_v56, %v7177_v59 }
 0xdc3   :  { %v5444_v5 = vpop.eup %5443 }
 0xdc4   :  { %v4305_v3 = vrot.slane %v5444_v5, %v5596_v27  ;;  %v4301_v18 = vrot.slane %v5444_v5, %v5593_v26  ;;  %v4313_v37 = vrot.slane %v5444_v5, %v5604_v39  ;;  %v4309_v58 = vrot.slane %v5444_v5, %v5599_v33 }
 0xdc5   :  { %v4317_v61 = vrot.slane %v5444_v5, %v5612_v45  ;;  %v4321_v4 = vrot.slane %v5444_v5, %v5622_v51  ;;  %v4325_v2 = vrot.slane %v5444_v5, %v5607_v40  ;;  %v4329_v25 = vrot.slane %v5444_v5, %v5617_v48 }
 0xdc6   :  { %v4379_v15 = vmul.f32 %v6883_v7, %v4305_v3  ;;  %v4378_v57 = vmul.f32 %v6879_v32, %v4301_v18  ;;  %v4381_v60 = vmul.f32 %v6893_v17, %v4313_v37  ;;  %v4380_v1 = vmul.f32 %v6889_v34, %v4309_v58 }
 0xdc7   :  { %v5446_v12 = vpop.eup %5445  ;;  %v4382_v7 = vmul.f32 %v6898_v46, %v4317_v61  ;;  %v4383_v17 = vmul.f32 %v6905_v53, %v4321_v4  ;;  %v4384_v46 = vmul.f32 %v6911_v29, %v4325_v2  ;;  %v4385_v29 = vmul.f32 %v6923_v19, %v4329_v25 }
 0xdc8   :  { %4412 = vperm.xlu0 %5297, %v4379_v15   ;;  %4409 = vperm.xlu1 %5296, %v4378_v57   ;;  %v4337_v55 = vrot.slane %v5446_v12, %v5596_v27  ;;  %v4341_v41 = vrot.slane %v5446_v12, %v5599_v33  ;;  %v4345_v27 = vrot.slane %v5446_v12, %v5604_v39 }
 0xdc9   :  { %v4333_v23 = vrot.slane %v5446_v12, %v5593_v26  ;;  %v4349_v33 = vrot.slane %v5446_v12, %v5612_v45  ;;  %v4353_v39 = vrot.slane %v5446_v12, %v5622_v51  ;;  %v4361_v26 = vrot.slane %v5446_v12, %v5617_v48 }
 0xdca   :  { %v4387_v32 = vmul.f32 %v6901_v20, %v4337_v55  ;;  %v4388_v34 = vmul.f32 %v6907_v47, %v4341_v41  ;;  %v4389_v20 = vmul.f32 %v6913_v24, %v4345_v27  ;;  %v4357_v45 = vrot.slane %v5446_v12, %v5607_v40 }
 0xdcb   :  { %v4386_v53 = vmul.f32 %v6917_v54, %v4333_v23  ;;  %v4390_v47 = vmul.f32 %v6919_v0, %v4349_v33  ;;  %v4391_v24 = vmul.f32 %v6925_v22, %v4353_v39  ;;  %v4393_v54 = vmul.f32 %v6931_v6, %v4361_v26 }
 0xdcc   :  { %4418 = vperm.xlu0 %5297, %v4381_v60   ;;  %4415 = vperm.xlu1 %5296, %v4380_v1   ;;  %v4392_v0 = vmul.f32 %v6929_v52, %v4357_v45  ;;  %v4398_v51 = vmul.f32 %v4396_v56, %v7180_v10  ;;  %v5101_v45 = vld [vmem:[%s7123_s2 + $0x1] ss:$0 sm:$0xff] }
 0xdd0   :  { %4421 = vperm.xlu0 %5297, %v4382_v7   ;;  %4559 = vperm.xlu1 %5296, %v4387_v32  }
 0xdd4   :  { %4424 = vperm.xlu0 %5297, %v4383_v17   ;;  %4562 = vperm.xlu1 %5296, %v4388_v34  }
 0xdd8   :  { %4427 = vperm.xlu0 %5297, %v4384_v46   ;;  %4565 = vperm.xlu1 %5296, %v4389_v20  }
 0xddc   :  { %4556 = vperm.xlu0 %5297, %v4386_v53   ;;  %4568 = vperm.xlu1 %5296, %v4390_v47   ;;  %v19_v53 = vld [vmem:[%s7122_s1 + $0x10] sm:$0xff] }
 0xde0   :  { %4430 = vperm.xlu0 %5297, %v4385_v29   ;;  %4571 = vperm.xlu1 %5296, %v4391_v24  }
 0xde4   :  { %4577 = vperm.xlu0 %5297, %v4393_v54   ;;  %4574 = vperm.xlu1 %5296, %v4392_v0   ;;  %v5455_v0 = vld [vmem:[%s7121_s0 + $0x8] sm:$0xff] }
 0xde8   :  { %4619 = vrot.lane.b32.xlu0 %v4399_v30, %s5484_s24  ;;  %4472 = vrot.lane.b32.xlu1 %v4398_v51, %s5484_s24 }
 0xe43   :  { %v4410_v48 = vpop.permute.xlu1 %4409  ;;  %v4413_v19 = vpop.permute.xlu0 %4412 }
 0xe44   :  { %v4435_v10 = vrot.slane %v4410_v48, %v5816_v36  ;;  %v4439_v59 = vrot.slane %v4413_v19, %v5816_v36 }
 0xe46   :  { %v4464_v31 = vsel %vm589_vm12, %v4439_v59, %v4435_v10  ;;  %v22_v59 = vld [vmem:[%s7122_s1 + $0x28] sm:$0x3f] }
 0xe47   :  { %v4416_v40 = vpop.permute.xlu1 %4415  ;;  %v4419_v22 = vpop.permute.xlu0 %4418 }
 0xe48   :  { %v4443_v9 = vrot.slane %v4416_v40, %v5816_v36  ;;  %v4447_v5 = vrot.slane %v4419_v22, %v5816_v36 }
 0xe4a   :  { %v4465_v15 = vsel %vm591_vm13, %v4443_v9, %v4464_v31  ;;  %v29_v9 = vld [vmem:[%s7122_s1 + $0x60] sm:$0xff] }
 0xe4b   :  { %v4560_v49 = vpop.permute.xlu1 %4559  ;;  %v4422_v42 = vpop.permute.xlu0 %4421  ;;  %v4466_v55 = vsel %vm593_vm14, %v4447_v5, %v4465_v15 }
 0xe4c   :  { %v4586_v62 = vrot.slane %v4560_v49, %v5816_v36  ;;  %v4451_v57 = vrot.slane %v4422_v42, %v5816_v36 }
 0xe4e   :  { %v4467_v41 = vsel %vm595_vm15, %v4451_v57, %v4466_v55  ;;  %v26_v55 = vld [vmem:[%s7122_s1 + $0x48] sm:$0xff] }
 0xe4f   :  { %v4563_v6 = vpop.permute.xlu1 %4562  ;;  %v4425_v35 = vpop.permute.xlu0 %4424 }
 0xe50   :  { %v4590_v13 = vrot.slane %v4563_v6, %v5816_v36  ;;  %v4455_v58 = vrot.slane %v4425_v35, %v5816_v36 }
 0xe52   :  { %v4468_v34 = vsel %vm597_vm3, %v4455_v58, %v4467_v41  ;;  %v5104_v41 = vld [vmem:[%s7123_s2 + $0x4] ss:$0 sm:$0xff] }
 0xe53   :  { %v4566_v52 = vpop.permute.xlu1 %4565  ;;  %v4428_v11 = vpop.permute.xlu0 %4427 }
 0xe54   :  { %v4594_v14 = vrot.slane %v4566_v52, %v5816_v36  ;;  %v4459_v60 = vrot.slane %v4428_v11, %v5816_v36 }
 0xe56   :  { %v4469_v27 = vsel %vm599_vm4, %v4459_v60, %v4468_v34 }
 0xe57   :  { %v4569_v43 = vpop.permute.xlu1 %4568  ;;  %v4557_v28 = vpop.permute.xlu0 %4556 }
 0xe58   :  { %v4582_v44 = vrot.slane %v4557_v28, %v5816_v36  ;;  %v4598_v3 = vrot.slane %v4569_v43, %v5816_v36 }
 0xe5a   :  { %v4611_v16 = vsel %vm589_vm12, %v4586_v62, %v4582_v44  ;;  %v21_v62 = vld [vmem:[%s7122_s1 + $0x20] sm:$0xff]  ;;  %v30_v44 = vld [vmem:[%s7122_s1 + $0x68] sm:$0xff] }
 0xe5b   :  { %v4612_v38 = vsel %vm591_vm13, %v4590_v13, %v4611_v16  ;;  %v4572_v21 = vpop.permute.xlu1 %4571  ;;  %v4431_v8 = vpop.permute.xlu0 %4430  ;;  %v28_v13 = vld [vmem:[%s7122_s1 + $0x58] sm:$0xff] }
 0xe5c   :  { %v4613_v18 = vsel %vm593_vm14, %v4594_v14, %v4612_v38  ;;  %v4602_v37 = vrot.slane %v4572_v21, %v5816_v36  ;;  %v4463_v7 = vrot.slane %v4431_v8, %v5816_v36  ;;  %v27_v14 = vld [vmem:[%s7122_s1 + $0x50] sm:$0xff] }
 0xe5d   :  { %v4614_v12 = vsel %vm595_vm15, %v4598_v3, %v4613_v18  ;;  %v5102_v18 = vld [vmem:[%s7123_s2 + $0x2] ss:$0 sm:$0xff] }
 0xe5e   :  { %v4615_v17 = vsel %vm597_vm3, %v4602_v37, %v4614_v12  ;;  %v4470_v33 = vsel %vm601_vm5, %v4463_v7, %v4469_v27  ;;  %v5103_v12 = vld [vmem:[%s7123_s2 + $0x3] ss:$0 sm:$0xff] }
 0xe5f   :  { %v4575_v1 = vpop.permute.xlu1 %4574  ;;  %v4578_v61 = vpop.permute.xlu0 %4577  ;;  %v25_v7 = vld [vmem:[%s7122_s1 + $0x40] sm:$0xff] }
 0xe60   :  { %v4606_v32 = vrot.slane %v4575_v1, %v5816_v36  ;;  %v4610_v4 = vrot.slane %v4578_v61, %v5816_v36  ;;  %v20_v36 = vld [vmem:[%s7122_s1 + $0x18] sm:$0xf] }
 0xe62   :  { %v4616_v2 = vsel %vm599_vm4, %v4606_v32, %v4615_v17  ;;  %v24_v32 = vld [vmem:[%s7122_s1 + $0x38] sm:$0xff] }
 0xe63   :  { %v4617_v46 = vsel %vm601_vm5, %v4610_v4, %v4616_v2  ;;  %v4473_v20 = vpop.permute.xlu1 %4472  ;;  %v4620_v23 = vpop.permute.xlu0 %4619  ;;  %v23_v4 = vld [vmem:[%s7122_s1 + $0x30] sm:$0xff] }
 0xe64   :  { %5245 = vmatpush3.msra.mxu1 %v4473_v20  ;;  %5250 = vmatpush3.msra.mxu0 %v4620_v23  ;;  %v5110_v23 = vld [vmem:[%s7123_s2 + $0x5] ss:$0 sm:$0xff] }
 0xe65   :  { %5247 = vmatmul.mubr.msk.f32.vlgmr.msra.gmra.mxu1 %vm612_vm6, %v4470_v33  ;;  %5252 = vmatmul.mubr.msk.f32.vlgmr.msra.gmra.mxu0 %vm612_vm6, %v4617_v46 }
 0xe66   :  { %5254 = vmatprep.subr.msk.mxu1 %vm4702_vm2, %v20_v36 }
 0xe67   :  { %5255 = vmatpush3.msk.msra.mxu1 %vm4702_vm2, %v20_v36 }
 0xe68   :  { %5256 = vmatprep.subr.mxu1 %v19_v53 }
 0xe69   :  { %5257 = vmatpush3.msra.mxu1 %v19_v53 }
 0xe6a   :  { %5268 = vmatprep.subr.mxu1 %v30_v44 }
 0xf25   :  { %v4543_v47 = vpop.f32.mrf.mxu1  ;;  %v4690_v25 = vpop.f32.mrf.mxu0 }
 0xf26   :  { %v4694_v39 = vadd.f32 %v4543_v47, %v6722_v63  ;;  %v4695_v29 = vadd.f32 %v4690_v25, %v6725_v50  ;;  %v5456_v50 = vld [vmem:[%s7121_s0] sm:$0xff] }
 0xf27   :  { %v5248_v24 = vpop.f32.mrf.mxu1  ;;  %v5253_v26 = vpop.f32.mrf.mxu0 }
 0xf28   :  { %5258 = vmatprep.mubr.msk.f32.mxu1 %vm155_vm7, %v4694_v39 }
 0xf29   :  { %5259 = vmatmul.mubr.msk.f32.vlgmr.msra.gmra.mxu1 %vm155_vm7, %v4695_v29  ;;  %vm7187_vm7 = vcmask 1045504  }
 0xf2a   :  { %5261 = vmatprep.subr.msk.mxu0 %vm7187_vm7, %v22_v59  ;;  %vm7188_vm10 = vmmov %vm7187_vm7  ;;  %5269 = vmatpush3.msra.mxu1 %v30_v44 }
 0xf2b   :  { %5262 = vmatpush3.msk.msra.mxu0 %vm7188_vm10, %v22_v59  ;;  %5270 = vmatprep.subr.mxu1 %v29_v9 }
 0xf2c   :  { %5263 = vmatprep.subr.mxu0 %v21_v62  ;;  %5271 = vmatpush3.msra.mxu1 %v29_v9 }
 0xf2d   :  { %5264 = vmatpush3.msra.mxu0 %v21_v62  ;;  %5272 = vmatprep.subr.mxu1 %v28_v13 }
 0xf2e   :  { %5273 = vmatpush3.msra.mxu1 %v28_v13 }
 0xf2f   :  { %5274 = vmatprep.subr.mxu1 %v27_v14 }
 0xf30   :  { %5275 = vmatpush3.msra.mxu1 %v27_v14 }
 0xf31   :  { %5276 = vmatprep.subr.mxu1 %v26_v55 }
 0xf32   :  { %5277 = vmatpush3.msra.mxu1 %v26_v55 }
 0xf33   :  { %5278 = vmatprep.subr.mxu1 %v25_v7 }
 0xf34   :  { %5279 = vmatpush3.msra.mxu1 %v25_v7 }
 0xf35   :  { %5280 = vmatprep.subr.mxu1 %v24_v32 }
 0xf36   :  { %5281 = vmatpush3.msra.mxu1 %v24_v32 }
 0xf37   :  { %5282 = vmatprep.subr.mxu1 %v23_v4 }
 0xf38   :  { %5283 = vmatpush3.msra.mxu1 %v23_v4 }
 0xfe9   :  { %v5260_v54 = vpop.f32.mrf.mxu1 }
 0xfea   :  { %v4782_v56 = vadd.f32 %v5455_v0, %v5260_v54 }
 0xfeb   :  { %v4772_v51 = vpop.f32.mrf.mxu1 }
 0xfec   :  { %v4788_v63 = vadd.f32 %v5101_v45, %v4782_v56  ;;  %v4781_v30 = vadd.f32 %v5456_v50, %v4772_v51 }
 0xfee   :  { %v4787_v48 = vadd.f32 %v5101_v45, %v4781_v30  ;;  %v4792_v19 = vsel %vm45_vm1, %v4788_v63, 0.0 }
 0xfef   :  { %4793 = vadd.xlane.f32.xlu0 %v4792_v19 }
 0xff0   :  { %v4789_v40 = vsel %vm45_vm1, %v4787_v48, 0.0 }
 0xff1   :  { %4790 = vadd.xlane.f32.xlu1 %v4789_v40 }
0x1078   :  { %v4794_v22 = vpop.xlane.xlu0 %4793 }
0x1079   :  { %v4797_v49 = vmul.f32 0.071428575, %v4794_v22 }
0x107a   :  { %v4791_v42 = vpop.xlane.xlu1 %4790 }
0x107b   :  { %v4799_v6 = vsub.f32 %v4788_v63, %v4797_v49  ;;  %v4796_v35 = vmul.f32 0.071428575, %v4791_v42 }
0x107d   :  { %v4798_v52 = vsub.f32 %v4787_v48, %v4796_v35  ;;  %v4801_v11 = vmul.f32 %v4799_v6, %v4799_v6 }
0x107f   :  { %v4805_v43 = vsel %vm45_vm1, %v4801_v11, 0.0  ;;  %v4800_v28 = vmul.f32 %v4798_v52, %v4798_v52 }
0x1080   :  { %4806 = vadd.xlane.f32.xlu1 %v4805_v43 }
0x1081   :  { %v4802_v10 = vsel %vm45_vm1, %v4800_v28, 0.0  ;;  %v5112_v28 = vld [vmem:[%s7123_s2 + $0x7] ss:$0 sm:$0xff] }
0x1082   :  { %4803 = vadd.xlane.f32.xlu0 %v4802_v10 }
0x1109   :  { %v4807_v16 = vpop.xlane.xlu1 %4806 }
0x110a   :  { %v4809_v38 = vmul.f32 0.071428575, %v4807_v16 }
0x110b   :  { %v4804_v21 = vpop.xlane.xlu0 %4803 }
0x110c   :  { %v4811_v8 = vadd.f32 1e-05, %v4809_v38  ;;  %v4808_v31 = vmul.f32 0.071428575, %v4804_v21 }
0x110e   :  { %5447 = vrsqrt.f32 %v4811_v8  ;;  %v4810_v5 = vadd.f32 1e-05, %v4808_v31 }
0x1110   :  { %5449 = vrsqrt.f32 %v4810_v5 }
0x111b   :  { %v5448_v3 = vpop.eup %5447 }
0x111c   :  { %v4815_v15 = vmul.f32 %v5448_v3, %v4799_v6 }
0x111d   :  { %v5450_v57 = vpop.eup %5449 }
0x111e   :  { %v4814_v37 = vmul.f32 %v5450_v57, %v4798_v52  ;;  %v4821_v58 = vmul.f32 %v5102_v18, %v4815_v15  ;;  %v5111_v52 = vld [vmem:[%s7123_s2 + $0x6] ss:$0 sm:$0xff] }
0x1120   :  { %v4820_v60 = vmul.f32 %v5102_v18, %v4814_v37  ;;  %v4827_v61 = vadd.f32 %v5103_v12, %v4821_v58 }
0x1122   :  { %v4826_v1 = vadd.f32 %v5103_v12, %v4820_v60 }
0x1124   :  { %5265 = vmatprep.mubr.msk.f32.mxu0 %vm45_vm1, %v4826_v1 }
0x1125   :  { %5266 = vmatmul.mubr.msk.f32.vlgmr.msra.gmra.mxu0 %vm45_vm1, %v4827_v61 }
0x11e5   :  { %v5267_v17 = vpop.f32.mrf.mxu0 }
0x11e6   :  { %v4913_v34 = vadd.f32 %v5267_v17, %v5104_v41 }
0x11e7   :  { %v4907_v2 = vpop.f32.mrf.mxu0 }
0x11e8   :  { %v4908_v27 = vadd.f32 %v5104_v41, %v4907_v2  ;;  %v4917_v20 = vmax.f32 %v4913_v34, 0.0 }
0x11ea   :  { %v4916_v46 = vmax.f32 %v4908_v27, 0.0 }
0x11ec   :  { %5284 = vmatprep.mubr.msk.f32.mxu1 %vm4918_vm11, %v4916_v46 }
0x11ed   :  { %5285 = vmatmul.mubr.msk.f32.vlgmr.msra.gmra.mxu1 %vm4918_vm11, %v4917_v20 }
0x12ad   :  { %v5286_v33 = vpop.f32.mrf.mxu1 }
0x12ae   :  { %v5001_v36 = vadd.f32 %v5286_v33, %v4827_v61 }
0x12af   :  { %v4991_v53 = vpop.f32.mrf.mxu1 }
0x12b0   :  { %v5007_v47 = vadd.f32 %v5110_v23, %v5001_v36  ;;  %v5000_v25 = vadd.f32 %v4991_v53, %v4826_v1 }
0x12b2   :  { %v5006_v39 = vadd.f32 %v5110_v23, %v5000_v25  ;;  %v5011_v29 = vsel %vm45_vm1, %v5007_v47, 0.0 }
0x12b3   :  { %5012 = vadd.xlane.f32.xlu1 %v5011_v29 }
0x12b4   :  { %v5008_v24 = vsel %vm45_vm1, %v5006_v39, 0.0 }
0x12b5   :  { %5009 = vadd.xlane.f32.xlu0 %v5008_v24 }
0x133c   :  { %v5013_v26 = vpop.xlane.xlu1 %5012 }
0x133d   :  { %v5015_v45 = vmul.f32 0.071428575, %v5013_v26 }
0x133e   :  { %v5010_v54 = vpop.xlane.xlu0 %5009 }
0x133f   :  { %v5017_v0 = vsub.f32 %v5007_v47, %v5015_v45  ;;  %v5014_v56 = vmul.f32 0.071428575, %v5010_v54 }
0x1341   :  { %v5016_v51 = vsub.f32 %v5006_v39, %v5014_v56  ;;  %v5019_v63 = vmul.f32 %v5017_v0, %v5017_v0 }
0x1343   :  { %v5023_v50 = vsel %vm45_vm1, %v5019_v63, 0.0  ;;  %v5018_v30 = vmul.f32 %v5016_v51, %v5016_v51 }
0x1344   :  { %5024 = vadd.xlane.f32.xlu1 %v5023_v50 }
0x1345   :  { %v5020_v48 = vsel %vm45_vm1, %v5018_v30, 0.0 }
0x1346   :  { %5021 = vadd.xlane.f32.xlu0 %v5020_v48 }
0x13cd   :  { %v5025_v19 = vpop.xlane.xlu1 %5024 }
0x13ce   :  { %v5027_v40 = vmul.f32 0.071428575, %v5025_v19 }
0x13cf   :  { %v5022_v22 = vpop.xlane.xlu0 %5021 }
0x13d0   :  { %v5029_v49 = vadd.f32 1e-05, %v5027_v40  ;;  %v5026_v42 = vmul.f32 0.071428575, %v5022_v22 }
0x13d2   :  { %5451 = vrsqrt.f32 %v5029_v49  ;;  %v5028_v6 = vadd.f32 1e-05, %v5026_v42 }
0x13d4   :  { %5453 = vrsqrt.f32 %v5028_v6 }
0x13df   :  { %v5452_v35 = vpop.eup %5451 }
0x13e0   :  { %v5033_v11 = vmul.f32 %v5452_v35, %v5017_v0 }
0x13e1   :  { %v5454_v43 = vpop.eup %5453 }
0x13e2   :  { %v5032_v10 = vmul.f32 %v5454_v43, %v5016_v51  ;;  %v5039_v59 = vmul.f32 %v5111_v52, %v5033_v11 }
0x13e4   :  { %v5038_v62 = vmul.f32 %v5111_v52, %v5032_v10  ;;  %v5045_v44 = vadd.f32 %v5112_v28, %v5039_v59 }
0x13e6   :  { %v5044_v9 = vadd.f32 %v5112_v28, %v5038_v62  ;;  %5047 = vst.msk [vmem:[#allocation2 + $0x8] sm:$0xff] %vm45_vm1, %v5045_v44 }
0x13e8   :  { %5046 = vst.msk [vmem:[#allocation2] sm:$0xff] %vm45_vm1, %v5044_v9 }
0x13e9   :  { %5468 = shalt.err (!%p5465_p4)
}
0x13ea   :  { %s5486_s2 = smov 128   ;;  %s5487_s13 = smov 8  }
0x13eb   :  { %5059 = dma.vmem_to_hbm [thread:$0]  %s5054_s11, 256, %s7124_s3, [#allocation3], %s5486_s2, %s5486_s2, %s5487_s13  }
0x13ec   :  { %5477 = dma.done.wait [#allocation3], 256  }
0x13ed   :  { %5478 = vsyncadd [#allocation3], 4294967040 }
0x13ee   :  { %5063 = vsyncpa [#allocation3], 1 }

</bundles_post_ra>
